<compile_context>
chip_gen: v6e
topology: v6e:2x2x1
jax: 0.10.0
libtpu: 0.0.40
codegen_flags: <defaults>
</compile_context>

<pallas_src>
import functools
import math

import numpy as np
import jax
import jax.numpy as jnp
from jax import lax
from jax.experimental import pallas as pl
from jax.experimental.pallas import tpu as pltpu

LOWPASS_FILTER_WIDTH = 6
ROLLOFF = 0.99


def _round_up(x, m):
    return ((x + m - 1) // m) * m


def sinc_resample_weights(pdm_factor):
    """torchaudio._get_sinc_resample_kernel for orig=1, new=pdm_factor (hann window)."""
    orig, new = 1, int(pdm_factor)
    base_freq = min(orig, new) * ROLLOFF
    width = int(math.ceil(LOWPASS_FILTER_WIDTH * orig / base_freq))
    idx = np.arange(-width, width + orig, dtype=np.float64) / orig            # [K]
    t = np.arange(0, -new, -1, dtype=np.float64)[:, None] / new + idx[None]   # [P, K]
    t *= base_freq
    t = np.clip(t, -LOWPASS_FILTER_WIDTH, LOWPASS_FILTER_WIDTH)
    window = np.cos(t * np.pi / LOWPASS_FILTER_WIDTH / 2.0) ** 2
    t *= np.pi
    scale = base_freq / orig
    safe_t = np.where(t == 0.0, 1.0, t)
    kern = np.where(t == 0.0, 1.0, np.sin(safe_t) / safe_t)
    kern = kern * window * scale
    return kern.astype(np.float32), width   # kern: [P, K], K = 2*width + orig


# ---------------- Pallas kernels ----------------

def _resample_kernel(xa_ref, xb_ref, o_ref, *, weights):
    # xa/xb: two ADJACENT (CH, B) blocks of the sentinel-padded time-major
    #        waveform (halo: frames in this chunk need K-1 extra samples).
    # o    : (P, CH, B) phase-major resampled output for this chunk of frames.
    # weights: numpy [P, K] sinc kernel baked in as compile-time scalar consts.
    n_phase, n_taps = weights.shape
    ch = xa_ref.shape[0]

    # Fused /2 + 0.5 affine; sentinel padding (-1.0) maps to exactly 0.0,
    # matching torchaudio's zero padding of the transformed signal.
    x2 = jnp.concatenate([xa_ref[...], xb_ref[...]], axis=0) * 0.5 + 0.5   # (2*CH, B)
    wins = [x2[k:k + ch, :] for k in range(n_taps)]                         # K shifted views

    for p in range(n_phase):
        acc = None
        for k in range(n_taps):
            w = float(weights[p, k])
            if w == 0.0:
                continue
            term = wins[k] * w
            acc = term if acc is None else acc + term
        if acc is None:
            acc = jnp.zeros_like(wins[0])
        o_ref[p, :, :] = acc


def _pdm_kernel(res_ref, spk_ref, err_ref, stage_ref):
    # res_ref  : (P, CH, B) f32   phase-major resampled chunk
    # spk_ref  : (P, CH, B) int8  phase-major spikes out
    # err_ref  : (1, B)     f32   sigma-delta error, carried across grid steps
    # stage_ref: (P, CH, B) f32   staging buffer written at 8-row granularity
    n_phase, ch, _ = res_ref.shape
    n_groups = ch // 8

    @pl.when(pl.program_id(0) == 0)
    def _init():
        err_ref[...] = jnp.zeros_like(err_ref)

    def group(g, err):
        base = pl.multiple_of(g * 8, 8)
        # One (8, B) tile load per phase -> 8 frames x P phases per iteration.
        tiles = [res_ref[p, pl.ds(base, 8), :] for p in range(n_phase)]
        rows = [[] for _ in range(n_phase)]
        for j in range(8):                       # 8 frames, statically unrolled
            for p in range(n_phase):             # phases in true time order
                v = tiles[p][j:j + 1, :]
                e = err + v
                s = (e > 0.0).astype(jnp.float32)
                rows[p].append(s)
                err = e - s
        for p in range(n_phase):
            stage_ref[p, pl.ds(base, 8), :] = jnp.concatenate(rows[p], axis=0)
        return err

    err_ref[...] = lax.fori_loop(0, n_groups, group, err_ref[...])

    # Single aligned int8 writeback per phase per chunk.
    for p in range(n_phase):
        spk_ref[p, :, :] = stage_ref[p, :, :].astype(jnp.int8)


# ---------------- Wrapper ----------------

def pdm_encode(waveform, pdm_factor=10, chunk_frames=512, return_resampled=False):
    x = jnp.asarray(waveform, jnp.float32)
    B, T = x.shape
    P = int(pdm_factor)

    if P != 1:
        kern, width = sinc_resample_weights(P)    # [P, K]
        K = kern.shape[1]
    else:
        kern, width, K = None, 0, 1

    # Frame chunking (1 frame = 1 original-rate sample; each frame -> P outputs).
    ch = min(int(chunk_frames), _round_up(T, 8))
    ch = _round_up(max(ch, K - 1, 8), 8)          # halo needs ch >= K-1
    n_pad = _round_up(T, ch)
    n_chunks = n_pad // ch

    if P != 1:
        # Time-major, sentinel-padded waveform; extra blocks exist for the halo.
        x_len = (n_chunks + 1) * ch
        xp = jnp.full((x_len, B), -1.0, jnp.float32)
        xp = xp.at[width:width + T, :].set(x.T)

        res_pm = pl.pallas_call(
            functools.partial(_resample_kernel, weights=kern),
            out_shape=jax.ShapeDtypeStruct((P, n_pad, B), jnp.float32),
            grid=(n_chunks,),
            in_specs=[pl.BlockSpec((ch, B), lambda i: (i, 0)),
                      pl.BlockSpec((ch, B), lambda i: (i + 1, 0))],
            out_specs=pl.BlockSpec((P, ch, B), lambda i: (0, i, 0)),
            compiler_params=pltpu.CompilerParams(
                dimension_semantics=("parallel",),
                vmem_limit_bytes=32 * 1024 * 1024),
        )(xp, xp)
    else:
        # No resampler: just the /2 + 0.5 affine, laid out phase-major with P=1.
        res_pm = jnp.zeros((1, n_pad, B), jnp.float32).at[0, :T, :].set(x.T * 0.5 + 0.5)

    spikes_pm = pl.pallas_call(
        _pdm_kernel,
        out_shape=jax.ShapeDtypeStruct((P, n_pad, B), jnp.int8),
        grid=(n_chunks,),
        in_specs=[pl.BlockSpec((P, ch, B), lambda i: (0, i, 0))],
        out_specs=pl.BlockSpec((P, ch, B), lambda i: (0, i, 0)),
        scratch_shapes=[pltpu.VMEM((1, B), jnp.float32),
                        pltpu.VMEM((P, ch, B), jnp.float32)],
        compiler_params=pltpu.CompilerParams(
            dimension_semantics=("arbitrary",),   # sequential: error carry
            vmem_limit_bytes=32 * 1024 * 1024),
    )(res_pm)

    # [P, n, B] -> [B, n, P] -> [B, T*P] (sample order n*P + p, as in torchaudio).
    spikes = (spikes_pm[:, :T, :].transpose(2, 1, 0)
              .reshape(B, T * P).astype(jnp.float32))
    if return_resampled:
        res = res_pm[:, :T, :].transpose(2, 1, 0).reshape(B, T * P)
        return spikes, res
    return spikes


# ---------------- Pure-JAX references (for sanity check) ----------------

def _reference_resample(x, pdm_factor):
    kern, width = sinc_resample_weights(pdm_factor)
    P, K = kern.shape
    B, T = x.shape
    wt = x * 0.5 + 0.5
    padded = jnp.pad(wt, ((0, 0), (width, width + 1)))
    gidx = np.arange(T)[:, None] + np.arange(K)[None, :]   # only the T kept frames
    r = jnp.einsum("bnk,pk->bnp", padded[:, gidx], jnp.asarray(kern))
    return r.reshape(B, T * P)


def _reference_pdm(res):
    def step(err, v):
        e = err + v
        s = (e > 0.0).astype(jnp.float32)
        return e - s, s
    _, spk = lax.scan(step, jnp.zeros((res.shape[0],), jnp.float32), res.T)
    return spk.T


if __name__ == "__main__":
    key = jax.random.PRNGKey(0)
    B, T, PDM = 2, 40, 10
    waveform = jax.random.uniform(key, (B, T), jnp.float32, minval=-1.0, maxval=1.0)

    # chunk_frames=512 -> single chunk; chunk_frames=16 -> multiple chunks,
    # exercising the halo reads, cross-chunk error carry, and junk-frame padding.
    for chunk_frames in (512, 16):
        spikes, res = pdm_encode(waveform, pdm_factor=PDM,
                                 chunk_frames=chunk_frames, return_resampled=True)
        spikes = jax.block_until_ready(spikes)

        assert spikes.shape == (B, T * PDM), spikes.shape
        assert spikes.dtype == jnp.float32
        spikes_np = np.asarray(spikes)
        assert np.all((spikes_np == 0.0) | (spikes_np == 1.0))

        # Resample stage: tolerance check vs. the pure-JAX sinc reference
        # (summation order differs -> not bit-exact by design).
        res_ref = np.asarray(_reference_resample(waveform, PDM))
        np.testing.assert_allclose(np.asarray(res), res_ref, rtol=1e-5, atol=1e-5)

        # PDM stage: bit-exact vs. the reference recurrence run on the kernel's
        # own resampled values (identical f32 ops in identical order).
        spikes_ref = np.asarray(_reference_pdm(jnp.asarray(res)))
        assert np.array_equal(spikes_np, spikes_ref), "PDM spikes mismatch"

    # pdm_factor == 1 path (no resampler, affine only).
    spikes1 = jax.block_until_ready(pdm_encode(waveform, pdm_factor=1))
    assert spikes1.shape == (B, T)
    spikes1_ref = np.asarray(_reference_pdm(waveform * 0.5 + 0.5))
    assert np.array_equal(np.asarray(spikes1), spikes1_ref), "PDM (P=1) mismatch"

    print("KERNEL_OK")
</pallas_src>

<mosaic_0001>
module attributes {stable_mosaic.version = 11 : i64} {
  func.func @_resample_kernel(%arg0: i32, %arg1: memref<40x2xf32, #tpu.memory_space<vmem>>, %arg2: memref<40x2xf32, #tpu.memory_space<vmem>>, %arg3: memref<10x40x2xf32, #tpu.memory_space<vmem>>) attributes {dimension_semantics = [#tpu.dimension_semantics<parallel>], iteration_bounds = array<i64: 1>, scalar_prefetch = 0 : i64, scratch_operands = 0 : i64, tpu.core_type = #tpu.core_type<tc>, window_params = [{transform_indices = @transform_0, window_bounds = array<i64: 40, 2>}, {transform_indices = @transform_1, window_bounds = array<i64: 40, 2>}, {transform_indices = @transform_2, window_bounds = array<i64: 10, 40, 2>}]} {
    %c0 = arith.constant 0 : index
    %c0_0 = arith.constant 0 : index
    %0 = vector.load %arg1[%c0, %c0_0] : memref<40x2xf32, #tpu.memory_space<vmem>>, vector<40x2xf32>
    %c0_1 = arith.constant 0 : index
    %c0_2 = arith.constant 0 : index
    %1 = vector.load %arg2[%c0_1, %c0_2] : memref<40x2xf32, #tpu.memory_space<vmem>>, vector<40x2xf32>
    %2 = tpu.concatenate %0, %1 in 0 : vector<40x2xf32>, vector<40x2xf32> -> vector<80x2xf32>
    %cst = arith.constant 5.000000e-01 : f32
    %3 = vector.broadcast %cst : f32 to vector<80x2xf32>
    %4 = arith.mulf %2, %3 : vector<80x2xf32>
    %cst_3 = arith.constant 5.000000e-01 : f32
    %5 = vector.broadcast %cst_3 : f32 to vector<80x2xf32>
    %6 = arith.addf %4, %5 : vector<80x2xf32>
    %7 = vector.extract_strided_slice %6 {offsets = [1, 0], sizes = [40, 2], strides = [1, 1]} : vector<80x2xf32> to vector<40x2xf32>
    %8 = vector.extract_strided_slice %6 {offsets = [2, 0], sizes = [40, 2], strides = [1, 1]} : vector<80x2xf32> to vector<40x2xf32>
    %9 = vector.extract_strided_slice %6 {offsets = [3, 0], sizes = [40, 2], strides = [1, 1]} : vector<80x2xf32> to vector<40x2xf32>
    %10 = vector.extract_strided_slice %6 {offsets = [4, 0], sizes = [40, 2], strides = [1, 1]} : vector<80x2xf32> to vector<40x2xf32>
    %11 = vector.extract_strided_slice %6 {offsets = [5, 0], sizes = [40, 2], strides = [1, 1]} : vector<80x2xf32> to vector<40x2xf32>
    %12 = vector.extract_strided_slice %6 {offsets = [6, 0], sizes = [40, 2], strides = [1, 1]} : vector<80x2xf32> to vector<40x2xf32>
    %13 = vector.extract_strided_slice %6 {offsets = [7, 0], sizes = [40, 2], strides = [1, 1]} : vector<80x2xf32> to vector<40x2xf32>
    %14 = vector.extract_strided_slice %6 {offsets = [8, 0], sizes = [40, 2], strides = [1, 1]} : vector<80x2xf32> to vector<40x2xf32>
    %15 = vector.extract_strided_slice %6 {offsets = [9, 0], sizes = [40, 2], strides = [1, 1]} : vector<80x2xf32> to vector<40x2xf32>
    %16 = vector.extract_strided_slice %6 {offsets = [10, 0], sizes = [40, 2], strides = [1, 1]} : vector<80x2xf32> to vector<40x2xf32>
    %17 = vector.extract_strided_slice %6 {offsets = [11, 0], sizes = [40, 2], strides = [1, 1]} : vector<80x2xf32> to vector<40x2xf32>
    %18 = vector.extract_strided_slice %6 {offsets = [12, 0], sizes = [40, 2], strides = [1, 1]} : vector<80x2xf32> to vector<40x2xf32>
    %19 = vector.extract_strided_slice %6 {offsets = [13, 0], sizes = [40, 2], strides = [1, 1]} : vector<80x2xf32> to vector<40x2xf32>
    %cst_4 = arith.constant -2.4526139E-6 : f32
    %20 = vector.broadcast %cst_4 : f32 to vector<40x2xf32>
    %21 = arith.mulf %7, %20 : vector<40x2xf32>
    %cst_5 = arith.constant 7.33772933E-4 : f32
    %22 = vector.broadcast %cst_5 : f32 to vector<40x2xf32>
    %23 = arith.mulf %8, %22 : vector<40x2xf32>
    %24 = arith.addf %21, %23 : vector<40x2xf32>
    %cst_6 = arith.constant -0.00258441712 : f32
    %25 = vector.broadcast %cst_6 : f32 to vector<40x2xf32>
    %26 = arith.mulf %9, %25 : vector<40x2xf32>
    %27 = arith.addf %24, %26 : vector<40x2xf32>
    %cst_7 = arith.constant 0.00507102162 : f32
    %28 = vector.broadcast %cst_7 : f32 to vector<40x2xf32>
    %29 = arith.mulf %10, %28 : vector<40x2xf32>
    %30 = arith.addf %27, %29 : vector<40x2xf32>
    %cst_8 = arith.constant -0.00754024368 : f32
    %31 = vector.broadcast %cst_8 : f32 to vector<40x2xf32>
    %32 = arith.mulf %11, %31 : vector<40x2xf32>
    %33 = arith.addf %30, %32 : vector<40x2xf32>
    %cst_9 = arith.constant 0.00934162084 : f32
    %34 = vector.broadcast %cst_9 : f32 to vector<40x2xf32>
    %35 = arith.mulf %12, %34 : vector<40x2xf32>
    %36 = arith.addf %33, %35 : vector<40x2xf32>
    %cst_10 = arith.constant 9.900000e-01 : f32
    %37 = vector.broadcast %cst_10 : f32 to vector<40x2xf32>
    %38 = arith.mulf %13, %37 : vector<40x2xf32>
    %39 = arith.addf %36, %38 : vector<40x2xf32>
    %cst_11 = arith.constant 0.00934162084 : f32
    %40 = vector.broadcast %cst_11 : f32 to vector<40x2xf32>
    %41 = arith.mulf %14, %40 : vector<40x2xf32>
    %42 = arith.addf %39, %41 : vector<40x2xf32>
    %cst_12 = arith.constant -0.00754024368 : f32
    %43 = vector.broadcast %cst_12 : f32 to vector<40x2xf32>
    %44 = arith.mulf %15, %43 : vector<40x2xf32>
    %45 = arith.addf %42, %44 : vector<40x2xf32>
    %cst_13 = arith.constant 0.00507102162 : f32
    %46 = vector.broadcast %cst_13 : f32 to vector<40x2xf32>
    %47 = arith.mulf %16, %46 : vector<40x2xf32>
    %48 = arith.addf %45, %47 : vector<40x2xf32>
    %cst_14 = arith.constant -0.00258441712 : f32
    %49 = vector.broadcast %cst_14 : f32 to vector<40x2xf32>
    %50 = arith.mulf %17, %49 : vector<40x2xf32>
    %51 = arith.addf %48, %50 : vector<40x2xf32>
    %cst_15 = arith.constant 7.33772933E-4 : f32
    %52 = vector.broadcast %cst_15 : f32 to vector<40x2xf32>
    %53 = arith.mulf %18, %52 : vector<40x2xf32>
    %54 = arith.addf %51, %53 : vector<40x2xf32>
    %cst_16 = arith.constant -2.4526139E-6 : f32
    %55 = vector.broadcast %cst_16 : f32 to vector<40x2xf32>
    %56 = arith.mulf %19, %55 : vector<40x2xf32>
    %57 = arith.addf %54, %56 : vector<40x2xf32>
    %c0_17 = arith.constant 0 : index
    %c0_18 = arith.constant 0 : index
    %c0_19 = arith.constant 0 : index
    %58 = vector.load %arg3[%c0_17, %c0_18, %c0_19] : memref<10x40x2xf32, #tpu.memory_space<vmem>>, vector<1x40x2xf32>
    %59 = vector.shape_cast %58 : vector<1x40x2xf32> to vector<40x2xf32>
    %60 = vector.shape_cast %57 : vector<40x2xf32> to vector<1x40x2xf32>
    tpu.vector_store %arg3[%c0_17, %c0_18, %c0_19], %60 {strides = array<i32>} : memref<10x40x2xf32, #tpu.memory_space<vmem>>, vector<1x40x2xf32>,
    %cst_20 = arith.constant -5.81052678E-4 : f32
    %61 = vector.broadcast %cst_20 : f32 to vector<40x2xf32>
    %62 = arith.mulf %8, %61 : vector<40x2xf32>
    %cst_21 = arith.constant 0.00338733918 : f32
    %63 = vector.broadcast %cst_21 : f32 to vector<40x2xf32>
    %64 = arith.mulf %9, %63 : vector<40x2xf32>
    %65 = arith.addf %62, %64 : vector<40x2xf32>
    %cst_22 = arith.constant -0.0106432345 : f32
    %66 = vector.broadcast %cst_22 : f32 to vector<40x2xf32>
    %67 = arith.mulf %10, %66 : vector<40x2xf32>
    %68 = arith.addf %65, %67 : vector<40x2xf32>
    %cst_23 = arith.constant 0.0272508468 : f32
    %69 = vector.broadcast %cst_23 : f32 to vector<40x2xf32>
    %70 = arith.mulf %11, %69 : vector<40x2xf32>
    %71 = arith.addf %68, %70 : vector<40x2xf32>
    %cst_24 = arith.constant -0.0735418946 : f32
    %72 = vector.broadcast %cst_24 : f32 to vector<40x2xf32>
    %73 = arith.mulf %12, %72 : vector<40x2xf32>
    %74 = arith.addf %71, %73 : vector<40x2xf32>
    %cst_25 = arith.constant 0.973462045 : f32
    %75 = vector.broadcast %cst_25 : f32 to vector<40x2xf32>
    %76 = arith.mulf %13, %75 : vector<40x2xf32>
    %77 = arith.addf %74, %76 : vector<40x2xf32>
    %cst_26 = arith.constant 0.112412542 : f32
    %78 = vector.broadcast %cst_26 : f32 to vector<40x2xf32>
    %79 = arith.mulf %14, %78 : vector<40x2xf32>
    %80 = arith.addf %77, %79 : vector<40x2xf32>
    %cst_27 = arith.constant -0.0475070849 : f32
    %81 = vector.broadcast %cst_27 : f32 to vector<40x2xf32>
    %82 = arith.mulf %15, %81 : vector<40x2xf32>
    %83 = arith.addf %80, %82 : vector<40x2xf32>
    %cst_28 = arith.constant 0.0230979193 : f32
    %84 = vector.broadcast %cst_28 : f32 to vector<40x2xf32>
    %85 = arith.mulf %16, %84 : vector<40x2xf32>
    %86 = arith.addf %83, %85 : vector<40x2xf32>
    %cst_29 = arith.constant -0.00973950512 : f32
    %87 = vector.broadcast %cst_29 : f32 to vector<40x2xf32>
    %88 = arith.mulf %17, %87 : vector<40x2xf32>
    %89 = arith.addf %86, %88 : vector<40x2xf32>
    %cst_30 = arith.constant 0.00257306732 : f32
    %90 = vector.broadcast %cst_30 : f32 to vector<40x2xf32>
    %91 = arith.mulf %18, %90 : vector<40x2xf32>
    %92 = arith.addf %89, %91 : vector<40x2xf32>
    %cst_31 = arith.constant -4.47520288E-5 : f32
    %93 = vector.broadcast %cst_31 : f32 to vector<40x2xf32>
    %94 = arith.mulf %19, %93 : vector<40x2xf32>
    %95 = arith.addf %92, %94 : vector<40x2xf32>
    %c1 = arith.constant 1 : index
    %c0_32 = arith.constant 0 : index
    %c0_33 = arith.constant 0 : index
    %96 = vector.load %arg3[%c1, %c0_32, %c0_33] : memref<10x40x2xf32, #tpu.memory_space<vmem>>, vector<1x40x2xf32>
    %97 = vector.shape_cast %96 : vector<1x40x2xf32> to vector<40x2xf32>
    %98 = vector.shape_cast %95 : vector<40x2xf32> to vector<1x40x2xf32>
    tpu.vector_store %arg3[%c1, %c0_32, %c0_33], %98 {strides = array<i32>} : memref<10x40x2xf32, #tpu.memory_space<vmem>>, vector<1x40x2xf32>,
    %cst_34 = arith.constant -0.00134306843 : f32
    %99 = vector.broadcast %cst_34 : f32 to vector<40x2xf32>
    %100 = arith.mulf %8, %99 : vector<40x2xf32>
    %cst_35 = arith.constant 0.0077626789 : f32
    %101 = vector.broadcast %cst_35 : f32 to vector<40x2xf32>
    %102 = arith.mulf %9, %101 : vector<40x2xf32>
    %103 = arith.addf %100, %102 : vector<40x2xf32>
    %cst_36 = arith.constant -0.0228476524 : f32
    %104 = vector.broadcast %cst_36 : f32 to vector<40x2xf32>
    %105 = arith.mulf %10, %104 : vector<40x2xf32>
    %106 = arith.addf %103, %105 : vector<40x2xf32>
    %cst_37 = arith.constant 0.0543917678 : f32
    %107 = vector.broadcast %cst_37 : f32 to vector<40x2xf32>
    %108 = arith.mulf %11, %107 : vector<40x2xf32>
    %109 = arith.addf %106, %108 : vector<40x2xf32>
    %cst_38 = arith.constant -0.133881822 : f32
    %110 = vector.broadcast %cst_38 : f32 to vector<40x2xf32>
    %111 = arith.mulf %12, %110 : vector<40x2xf32>
    %112 = arith.addf %109, %111 : vector<40x2xf32>
    %cst_39 = arith.constant 0.924891054 : f32
    %113 = vector.broadcast %cst_39 : f32 to vector<40x2xf32>
    %114 = arith.mulf %13, %113 : vector<40x2xf32>
    %115 = arith.addf %112, %114 : vector<40x2xf32>
    %cst_40 = arith.constant 0.231636718 : f32
    %116 = vector.broadcast %cst_40 : f32 to vector<40x2xf32>
    %117 = arith.mulf %14, %116 : vector<40x2xf32>
    %118 = arith.addf %115, %117 : vector<40x2xf32>
    %cst_41 = arith.constant -0.0892321839 : f32
    %119 = vector.broadcast %cst_41 : f32 to vector<40x2xf32>
    %120 = arith.mulf %15, %119 : vector<40x2xf32>
    %121 = arith.addf %118, %120 : vector<40x2xf32>
    %cst_42 = arith.constant 0.0417658538 : f32
    %122 = vector.broadcast %cst_42 : f32 to vector<40x2xf32>
    %123 = arith.mulf %16, %122 : vector<40x2xf32>
    %124 = arith.addf %121, %123 : vector<40x2xf32>
    %cst_43 = arith.constant -0.0174150933 : f32
    %125 = vector.broadcast %cst_43 : f32 to vector<40x2xf32>
    %126 = arith.mulf %17, %125 : vector<40x2xf32>
    %127 = arith.addf %124, %126 : vector<40x2xf32>
    %cst_44 = arith.constant 0.00479960395 : f32
    %128 = vector.broadcast %cst_44 : f32 to vector<40x2xf32>
    %129 = arith.mulf %18, %128 : vector<40x2xf32>
    %130 = arith.addf %127, %129 : vector<40x2xf32>
    %cst_45 = arith.constant -1.81162555E-4 : f32
    %131 = vector.broadcast %cst_45 : f32 to vector<40x2xf32>
    %132 = arith.mulf %19, %131 : vector<40x2xf32>
    %133 = arith.addf %130, %132 : vector<40x2xf32>
    %c2 = arith.constant 2 : index
    %c0_46 = arith.constant 0 : index
    %c0_47 = arith.constant 0 : index
    %134 = vector.load %arg3[%c2, %c0_46, %c0_47] : memref<10x40x2xf32, #tpu.memory_space<vmem>>, vector<1x40x2xf32>
    %135 = vector.shape_cast %134 : vector<1x40x2xf32> to vector<40x2xf32>
    %136 = vector.shape_cast %133 : vector<40x2xf32> to vector<1x40x2xf32>
    tpu.vector_store %arg3[%c2, %c0_46, %c0_47], %136 {strides = array<i32>} : memref<10x40x2xf32, #tpu.memory_space<vmem>>, vector<1x40x2xf32>,
    %cst_48 = arith.constant -0.00161369459 : f32
    %137 = vector.broadcast %cst_48 : f32 to vector<40x2xf32>
    %138 = arith.mulf %8, %137 : vector<40x2xf32>
    %cst_49 = arith.constant 0.0103845261 : f32
    %139 = vector.broadcast %cst_49 : f32 to vector<40x2xf32>
    %140 = arith.mulf %9, %139 : vector<40x2xf32>
    %141 = arith.addf %138, %140 : vector<40x2xf32>
    %cst_50 = arith.constant -0.0308757368 : f32
    %142 = vector.broadcast %cst_50 : f32 to vector<40x2xf32>
    %143 = arith.mulf %10, %142 : vector<40x2xf32>
    %144 = arith.addf %141, %143 : vector<40x2xf32>
    %cst_51 = arith.constant 0.0724506825 : f32
    %145 = vector.broadcast %cst_51 : f32 to vector<40x2xf32>
    %146 = arith.mulf %11, %145 : vector<40x2xf32>
    %147 = arith.addf %144, %146 : vector<40x2xf32>
    %cst_52 = arith.constant -0.171059564 : f32
    %148 = vector.broadcast %cst_52 : f32 to vector<40x2xf32>
    %149 = arith.mulf %12, %148 : vector<40x2xf32>
    %150 = arith.addf %147, %149 : vector<40x2xf32>
    %cst_53 = arith.constant 0.847334325 : f32
    %151 = vector.broadcast %cst_53 : f32 to vector<40x2xf32>
    %152 = arith.mulf %13, %151 : vector<40x2xf32>
    %153 = arith.addf %150, %152 : vector<40x2xf32>
    %cst_54 = arith.constant 0.361506134 : f32
    %154 = vector.broadcast %cst_54 : f32 to vector<40x2xf32>
    %155 = arith.mulf %14, %154 : vector<40x2xf32>
    %156 = arith.addf %153, %155 : vector<40x2xf32>
    %cst_55 = arith.constant -0.128557503 : f32
    %157 = vector.broadcast %cst_55 : f32 to vector<40x2xf32>
    %158 = arith.mulf %15, %157 : vector<40x2xf32>
    %159 = arith.addf %156, %158 : vector<40x2xf32>
    %cst_56 = arith.constant 0.0590486564 : f32
    %160 = vector.broadcast %cst_56 : f32 to vector<40x2xf32>
    %161 = arith.mulf %16, %160 : vector<40x2xf32>
    %162 = arith.addf %159, %161 : vector<40x2xf32>
    %cst_57 = arith.constant -0.0247400887 : f32
    %163 = vector.broadcast %cst_57 : f32 to vector<40x2xf32>
    %164 = arith.mulf %17, %163 : vector<40x2xf32>
    %165 = arith.addf %162, %164 : vector<40x2xf32>
    %cst_58 = arith.constant 0.00716337747 : f32
    %166 = vector.broadcast %cst_58 : f32 to vector<40x2xf32>
    %167 = arith.mulf %18, %166 : vector<40x2xf32>
    %168 = arith.addf %165, %167 : vector<40x2xf32>
    %cst_59 = arith.constant -4.38126881E-4 : f32
    %169 = vector.broadcast %cst_59 : f32 to vector<40x2xf32>
    %170 = arith.mulf %19, %169 : vector<40x2xf32>
    %171 = arith.addf %168, %170 : vector<40x2xf32>
    %c3 = arith.constant 3 : index
    %c0_60 = arith.constant 0 : index
    %c0_61 = arith.constant 0 : index
    %172 = vector.load %arg3[%c3, %c0_60, %c0_61] : memref<10x40x2xf32, #tpu.memory_space<vmem>>, vector<1x40x2xf32>
    %173 = vector.shape_cast %172 : vector<1x40x2xf32> to vector<40x2xf32>
    %174 = vector.shape_cast %171 : vector<40x2xf32> to vector<1x40x2xf32>
    tpu.vector_store %arg3[%c3, %c0_60, %c0_61], %174 {strides = array<i32>} : memref<10x40x2xf32, #tpu.memory_space<vmem>>, vector<1x40x2xf32>,
    %cst_62 = arith.constant -0.00151480921 : f32
    %175 = vector.broadcast %cst_62 : f32 to vector<40x2xf32>
    %176 = arith.mulf %8, %175 : vector<40x2xf32>
    %cst_63 = arith.constant 0.0113268606 : f32
    %177 = vector.broadcast %cst_63 : f32 to vector<40x2xf32>
    %178 = arith.mulf %9, %177 : vector<40x2xf32>
    %179 = arith.addf %176, %178 : vector<40x2xf32>
    %cst_64 = arith.constant -0.0345859863 : f32
    %180 = vector.broadcast %cst_64 : f32 to vector<40x2xf32>
    %181 = arith.mulf %10, %180 : vector<40x2xf32>
    %182 = arith.addf %179, %181 : vector<40x2xf32>
    %cst_65 = arith.constant 0.0810347199 : f32
    %183 = vector.broadcast %cst_65 : f32 to vector<40x2xf32>
    %184 = arith.mulf %11, %183 : vector<40x2xf32>
    %185 = arith.addf %182, %184 : vector<40x2xf32>
    %cst_66 = arith.constant -0.186110914 : f32
    %186 = vector.broadcast %cst_66 : f32 to vector<40x2xf32>
    %187 = arith.mulf %12, %186 : vector<40x2xf32>
    %188 = arith.addf %185, %187 : vector<40x2xf32>
    %cst_67 = arith.constant 0.74560535 : f32
    %189 = vector.broadcast %cst_67 : f32 to vector<40x2xf32>
    %190 = arith.mulf %13, %189 : vector<40x2xf32>
    %191 = arith.addf %188, %190 : vector<40x2xf32>
    %cst_68 = arith.constant 0.495376021 : f32
    %192 = vector.broadcast %cst_68 : f32 to vector<40x2xf32>
    %193 = arith.mulf %14, %192 : vector<40x2xf32>
    %194 = arith.addf %191, %193 : vector<40x2xf32>
    %cst_69 = arith.constant -0.160879344 : f32
    %195 = vector.broadcast %cst_69 : f32 to vector<40x2xf32>
    %196 = arith.mulf %15, %195 : vector<40x2xf32>
    %197 = arith.addf %194, %196 : vector<40x2xf32>
    %cst_70 = arith.constant 0.0727433413 : f32
    %198 = vector.broadcast %cst_70 : f32 to vector<40x2xf32>
    %199 = arith.mulf %16, %198 : vector<40x2xf32>
    %200 = arith.addf %197, %199 : vector<40x2xf32>
    %cst_71 = arith.constant -0.0307116788 : f32
    %201 = vector.broadcast %cst_71 : f32 to vector<40x2xf32>
    %202 = arith.mulf %17, %201 : vector<40x2xf32>
    %203 = arith.addf %200, %202 : vector<40x2xf32>
    %cst_72 = arith.constant 0.00931623299 : f32
    %204 = vector.broadcast %cst_72 : f32 to vector<40x2xf32>
    %205 = arith.mulf %18, %204 : vector<40x2xf32>
    %206 = arith.addf %203, %205 : vector<40x2xf32>
    %cst_73 = arith.constant -7.98550667E-4 : f32
    %207 = vector.broadcast %cst_73 : f32 to vector<40x2xf32>
    %208 = arith.mulf %19, %207 : vector<40x2xf32>
    %209 = arith.addf %206, %208 : vector<40x2xf32>
    %c4 = arith.constant 4 : index
    %c0_74 = arith.constant 0 : index
    %c0_75 = arith.constant 0 : index
    %210 = vector.load %arg3[%c4, %c0_74, %c0_75] : memref<10x40x2xf32, #tpu.memory_space<vmem>>, vector<1x40x2xf32>
    %211 = vector.shape_cast %210 : vector<1x40x2xf32> to vector<40x2xf32>
    %212 = vector.shape_cast %209 : vector<40x2xf32> to vector<1x40x2xf32>
    tpu.vector_store %arg3[%c4, %c0_74, %c0_75], %212 {strides = array<i32>} : memref<10x40x2xf32, #tpu.memory_space<vmem>>, vector<1x40x2xf32>,
    %cst_76 = arith.constant -0.00119518931 : f32
    %213 = vector.broadcast %cst_76 : f32 to vector<40x2xf32>
    %214 = arith.mulf %8, %213 : vector<40x2xf32>
    %cst_77 = arith.constant 0.0108458297 : f32
    %215 = vector.broadcast %cst_77 : f32 to vector<40x2xf32>
    %216 = arith.mulf %9, %215 : vector<40x2xf32>
    %217 = arith.addf %214, %216 : vector<40x2xf32>
    %cst_78 = arith.constant -0.0343020633 : f32
    %218 = vector.broadcast %cst_78 : f32 to vector<40x2xf32>
    %219 = arith.mulf %10, %218 : vector<40x2xf32>
    %220 = arith.addf %217, %219 : vector<40x2xf32>
    %cst_79 = arith.constant 0.0806928947 : f32
    %221 = vector.broadcast %cst_79 : f32 to vector<40x2xf32>
    %222 = arith.mulf %11, %221 : vector<40x2xf32>
    %223 = arith.addf %220, %222 : vector<40x2xf32>
    %cst_80 = arith.constant -0.181514859 : f32
    %224 = vector.broadcast %cst_80 : f32 to vector<40x2xf32>
    %225 = arith.mulf %12, %224 : vector<40x2xf32>
    %226 = arith.addf %223, %225 : vector<40x2xf32>
    %cst_81 = arith.constant 0.625911056 : f32
    %227 = vector.broadcast %cst_81 : f32 to vector<40x2xf32>
    %228 = arith.mulf %13, %227 : vector<40x2xf32>
    %229 = arith.addf %226, %228 : vector<40x2xf32>
    %cst_82 = arith.constant 0.625911056 : f32
    %230 = vector.broadcast %cst_82 : f32 to vector<40x2xf32>
    %231 = arith.mulf %14, %230 : vector<40x2xf32>
    %232 = arith.addf %229, %231 : vector<40x2xf32>
    %cst_83 = arith.constant -0.181514859 : f32
    %233 = vector.broadcast %cst_83 : f32 to vector<40x2xf32>
    %234 = arith.mulf %15, %233 : vector<40x2xf32>
    %235 = arith.addf %232, %234 : vector<40x2xf32>
    %cst_84 = arith.constant 0.0806928947 : f32
    %236 = vector.broadcast %cst_84 : f32 to vector<40x2xf32>
    %237 = arith.mulf %16, %236 : vector<40x2xf32>
    %238 = arith.addf %235, %237 : vector<40x2xf32>
    %cst_85 = arith.constant -0.0343020633 : f32
    %239 = vector.broadcast %cst_85 : f32 to vector<40x2xf32>
    %240 = arith.mulf %17, %239 : vector<40x2xf32>
    %241 = arith.addf %238, %240 : vector<40x2xf32>
    %cst_86 = arith.constant 0.0108458297 : f32
    %242 = vector.broadcast %cst_86 : f32 to vector<40x2xf32>
    %243 = arith.mulf %18, %242 : vector<40x2xf32>
    %244 = arith.addf %241, %243 : vector<40x2xf32>
    %cst_87 = arith.constant -0.00119518931 : f32
    %245 = vector.broadcast %cst_87 : f32 to vector<40x2xf32>
    %246 = arith.mulf %19, %245 : vector<40x2xf32>
    %247 = arith.addf %244, %246 : vector<40x2xf32>
    %c5 = arith.constant 5 : index
    %c0_88 = arith.constant 0 : index
    %c0_89 = arith.constant 0 : index
    %248 = vector.load %arg3[%c5, %c0_88, %c0_89] : memref<10x40x2xf32, #tpu.memory_space<vmem>>, vector<1x40x2xf32>
    %249 = vector.shape_cast %248 : vector<1x40x2xf32> to vector<40x2xf32>
    %250 = vector.shape_cast %247 : vector<40x2xf32> to vector<1x40x2xf32>
    tpu.vector_store %arg3[%c5, %c0_88, %c0_89], %250 {strides = array<i32>} : memref<10x40x2xf32, #tpu.memory_space<vmem>>, vector<1x40x2xf32>,
    %cst_90 = arith.constant -7.98550667E-4 : f32
    %251 = vector.broadcast %cst_90 : f32 to vector<40x2xf32>
    %252 = arith.mulf %8, %251 : vector<40x2xf32>
    %cst_91 = arith.constant 0.00931623299 : f32
    %253 = vector.broadcast %cst_91 : f32 to vector<40x2xf32>
    %254 = arith.mulf %9, %253 : vector<40x2xf32>
    %255 = arith.addf %252, %254 : vector<40x2xf32>
    %cst_92 = arith.constant -0.0307116788 : f32
    %256 = vector.broadcast %cst_92 : f32 to vector<40x2xf32>
    %257 = arith.mulf %10, %256 : vector<40x2xf32>
    %258 = arith.addf %255, %257 : vector<40x2xf32>
    %cst_93 = arith.constant 0.0727433413 : f32
    %259 = vector.broadcast %cst_93 : f32 to vector<40x2xf32>
    %260 = arith.mulf %11, %259 : vector<40x2xf32>
    %261 = arith.addf %258, %260 : vector<40x2xf32>
    %cst_94 = arith.constant -0.160879344 : f32
    %262 = vector.broadcast %cst_94 : f32 to vector<40x2xf32>
    %263 = arith.mulf %12, %262 : vector<40x2xf32>
    %264 = arith.addf %261, %263 : vector<40x2xf32>
    %cst_95 = arith.constant 0.495376021 : f32
    %265 = vector.broadcast %cst_95 : f32 to vector<40x2xf32>
    %266 = arith.mulf %13, %265 : vector<40x2xf32>
    %267 = arith.addf %264, %266 : vector<40x2xf32>
    %cst_96 = arith.constant 0.74560535 : f32
    %268 = vector.broadcast %cst_96 : f32 to vector<40x2xf32>
    %269 = arith.mulf %14, %268 : vector<40x2xf32>
    %270 = arith.addf %267, %269 : vector<40x2xf32>
    %cst_97 = arith.constant -0.186110914 : f32
    %271 = vector.broadcast %cst_97 : f32 to vector<40x2xf32>
    %272 = arith.mulf %15, %271 : vector<40x2xf32>
    %273 = arith.addf %270, %272 : vector<40x2xf32>
    %cst_98 = arith.constant 0.0810347199 : f32
    %274 = vector.broadcast %cst_98 : f32 to vector<40x2xf32>
    %275 = arith.mulf %16, %274 : vector<40x2xf32>
    %276 = arith.addf %273, %275 : vector<40x2xf32>
    %cst_99 = arith.constant -0.0345859863 : f32
    %277 = vector.broadcast %cst_99 : f32 to vector<40x2xf32>
    %278 = arith.mulf %17, %277 : vector<40x2xf32>
    %279 = arith.addf %276, %278 : vector<40x2xf32>
    %cst_100 = arith.constant 0.0113268606 : f32
    %280 = vector.broadcast %cst_100 : f32 to vector<40x2xf32>
    %281 = arith.mulf %18, %280 : vector<40x2xf32>
    %282 = arith.addf %279, %281 : vector<40x2xf32>
    %cst_101 = arith.constant -0.00151480921 : f32
    %283 = vector.broadcast %cst_101 : f32 to vector<40x2xf32>
    %284 = arith.mulf %19, %283 : vector<40x2xf32>
    %285 = arith.addf %282, %284 : vector<40x2xf32>
    %c6 = arith.constant 6 : index
    %c0_102 = arith.constant 0 : index
    %c0_103 = arith.constant 0 : index
    %286 = vector.load %arg3[%c6, %c0_102, %c0_103] : memref<10x40x2xf32, #tpu.memory_space<vmem>>, vector<1x40x2xf32>
    %287 = vector.shape_cast %286 : vector<1x40x2xf32> to vector<40x2xf32>
    %288 = vector.shape_cast %285 : vector<40x2xf32> to vector<1x40x2xf32>
    tpu.vector_store %arg3[%c6, %c0_102, %c0_103], %288 {strides = array<i32>} : memref<10x40x2xf32, #tpu.memory_space<vmem>>, vector<1x40x2xf32>,
    %cst_104 = arith.constant -4.38126881E-4 : f32
    %289 = vector.broadcast %cst_104 : f32 to vector<40x2xf32>
    %290 = arith.mulf %8, %289 : vector<40x2xf32>
    %cst_105 = arith.constant 0.00716337747 : f32
    %291 = vector.broadcast %cst_105 : f32 to vector<40x2xf32>
    %292 = arith.mulf %9, %291 : vector<40x2xf32>
    %293 = arith.addf %290, %292 : vector<40x2xf32>
    %cst_106 = arith.constant -0.0247400887 : f32
    %294 = vector.broadcast %cst_106 : f32 to vector<40x2xf32>
    %295 = arith.mulf %10, %294 : vector<40x2xf32>
    %296 = arith.addf %293, %295 : vector<40x2xf32>
    %cst_107 = arith.constant 0.0590486564 : f32
    %297 = vector.broadcast %cst_107 : f32 to vector<40x2xf32>
    %298 = arith.mulf %11, %297 : vector<40x2xf32>
    %299 = arith.addf %296, %298 : vector<40x2xf32>
    %cst_108 = arith.constant -0.128557503 : f32
    %300 = vector.broadcast %cst_108 : f32 to vector<40x2xf32>
    %301 = arith.mulf %12, %300 : vector<40x2xf32>
    %302 = arith.addf %299, %301 : vector<40x2xf32>
    %cst_109 = arith.constant 0.361506134 : f32
    %303 = vector.broadcast %cst_109 : f32 to vector<40x2xf32>
    %304 = arith.mulf %13, %303 : vector<40x2xf32>
    %305 = arith.addf %302, %304 : vector<40x2xf32>
    %cst_110 = arith.constant 0.847334325 : f32
    %306 = vector.broadcast %cst_110 : f32 to vector<40x2xf32>
    %307 = arith.mulf %14, %306 : vector<40x2xf32>
    %308 = arith.addf %305, %307 : vector<40x2xf32>
    %cst_111 = arith.constant -0.171059564 : f32
    %309 = vector.broadcast %cst_111 : f32 to vector<40x2xf32>
    %310 = arith.mulf %15, %309 : vector<40x2xf32>
    %311 = arith.addf %308, %310 : vector<40x2xf32>
    %cst_112 = arith.constant 0.0724506825 : f32
    %312 = vector.broadcast %cst_112 : f32 to vector<40x2xf32>
    %313 = arith.mulf %16, %312 : vector<40x2xf32>
    %314 = arith.addf %311, %313 : vector<40x2xf32>
    %cst_113 = arith.constant -0.0308757368 : f32
    %315 = vector.broadcast %cst_113 : f32 to vector<40x2xf32>
    %316 = arith.mulf %17, %315 : vector<40x2xf32>
    %317 = arith.addf %314, %316 : vector<40x2xf32>
    %cst_114 = arith.constant 0.0103845261 : f32
    %318 = vector.broadcast %cst_114 : f32 to vector<40x2xf32>
    %319 = arith.mulf %18, %318 : vector<40x2xf32>
    %320 = arith.addf %317, %319 : vector<40x2xf32>
    %cst_115 = arith.constant -0.00161369459 : f32
    %321 = vector.broadcast %cst_115 : f32 to vector<40x2xf32>
    %322 = arith.mulf %19, %321 : vector<40x2xf32>
    %323 = arith.addf %320, %322 : vector<40x2xf32>
    %c7 = arith.constant 7 : index
    %c0_116 = arith.constant 0 : index
    %c0_117 = arith.constant 0 : index
    %324 = vector.load %arg3[%c7, %c0_116, %c0_117] : memref<10x40x2xf32, #tpu.memory_space<vmem>>, vector<1x40x2xf32>
    %325 = vector.shape_cast %324 : vector<1x40x2xf32> to vector<40x2xf32>
    %326 = vector.shape_cast %323 : vector<40x2xf32> to vector<1x40x2xf32>
    tpu.vector_store %arg3[%c7, %c0_116, %c0_117], %326 {strides = array<i32>} : memref<10x40x2xf32, #tpu.memory_space<vmem>>, vector<1x40x2xf32>,
    %cst_118 = arith.constant -1.81162555E-4 : f32
    %327 = vector.broadcast %cst_118 : f32 to vector<40x2xf32>
    %328 = arith.mulf %8, %327 : vector<40x2xf32>
    %cst_119 = arith.constant 0.00479960395 : f32
    %329 = vector.broadcast %cst_119 : f32 to vector<40x2xf32>
    %330 = arith.mulf %9, %329 : vector<40x2xf32>
    %331 = arith.addf %328, %330 : vector<40x2xf32>
    %cst_120 = arith.constant -0.0174150933 : f32
    %332 = vector.broadcast %cst_120 : f32 to vector<40x2xf32>
    %333 = arith.mulf %10, %332 : vector<40x2xf32>
    %334 = arith.addf %331, %333 : vector<40x2xf32>
    %cst_121 = arith.constant 0.0417658538 : f32
    %335 = vector.broadcast %cst_121 : f32 to vector<40x2xf32>
    %336 = arith.mulf %11, %335 : vector<40x2xf32>
    %337 = arith.addf %334, %336 : vector<40x2xf32>
    %cst_122 = arith.constant -0.0892321839 : f32
    %338 = vector.broadcast %cst_122 : f32 to vector<40x2xf32>
    %339 = arith.mulf %12, %338 : vector<40x2xf32>
    %340 = arith.addf %337, %339 : vector<40x2xf32>
    %cst_123 = arith.constant 0.231636718 : f32
    %341 = vector.broadcast %cst_123 : f32 to vector<40x2xf32>
    %342 = arith.mulf %13, %341 : vector<40x2xf32>
    %343 = arith.addf %340, %342 : vector<40x2xf32>
    %cst_124 = arith.constant 0.924891054 : f32
    %344 = vector.broadcast %cst_124 : f32 to vector<40x2xf32>
    %345 = arith.mulf %14, %344 : vector<40x2xf32>
    %346 = arith.addf %343, %345 : vector<40x2xf32>
    %cst_125 = arith.constant -0.133881822 : f32
    %347 = vector.broadcast %cst_125 : f32 to vector<40x2xf32>
    %348 = arith.mulf %15, %347 : vector<40x2xf32>
    %349 = arith.addf %346, %348 : vector<40x2xf32>
    %cst_126 = arith.constant 0.0543917678 : f32
    %350 = vector.broadcast %cst_126 : f32 to vector<40x2xf32>
    %351 = arith.mulf %16, %350 : vector<40x2xf32>
    %352 = arith.addf %349, %351 : vector<40x2xf32>
    %cst_127 = arith.constant -0.0228476524 : f32
    %353 = vector.broadcast %cst_127 : f32 to vector<40x2xf32>
    %354 = arith.mulf %17, %353 : vector<40x2xf32>
    %355 = arith.addf %352, %354 : vector<40x2xf32>
    %cst_128 = arith.constant 0.0077626789 : f32
    %356 = vector.broadcast %cst_128 : f32 to vector<40x2xf32>
    %357 = arith.mulf %18, %356 : vector<40x2xf32>
    %358 = arith.addf %355, %357 : vector<40x2xf32>
    %cst_129 = arith.constant -0.00134306843 : f32
    %359 = vector.broadcast %cst_129 : f32 to vector<40x2xf32>
    %360 = arith.mulf %19, %359 : vector<40x2xf32>
    %361 = arith.addf %358, %360 : vector<40x2xf32>
    %c8 = arith.constant 8 : index
    %c0_130 = arith.constant 0 : index
    %c0_131 = arith.constant 0 : index
    %362 = vector.load %arg3[%c8, %c0_130, %c0_131] : memref<10x40x2xf32, #tpu.memory_space<vmem>>, vector<1x40x2xf32>
    %363 = vector.shape_cast %362 : vector<1x40x2xf32> to vector<40x2xf32>
    %364 = vector.shape_cast %361 : vector<40x2xf32> to vector<1x40x2xf32>
    tpu.vector_store %arg3[%c8, %c0_130, %c0_131], %364 {strides = array<i32>} : memref<10x40x2xf32, #tpu.memory_space<vmem>>, vector<1x40x2xf32>,
    %cst_132 = arith.constant -4.47520288E-5 : f32
    %365 = vector.broadcast %cst_132 : f32 to vector<40x2xf32>
    %366 = arith.mulf %8, %365 : vector<40x2xf32>
    %cst_133 = arith.constant 0.00257306732 : f32
    %367 = vector.broadcast %cst_133 : f32 to vector<40x2xf32>
    %368 = arith.mulf %9, %367 : vector<40x2xf32>
    %369 = arith.addf %366, %368 : vector<40x2xf32>
    %cst_134 = arith.constant -0.00973950512 : f32
    %370 = vector.broadcast %cst_134 : f32 to vector<40x2xf32>
    %371 = arith.mulf %10, %370 : vector<40x2xf32>
    %372 = arith.addf %369, %371 : vector<40x2xf32>
    %cst_135 = arith.constant 0.0230979193 : f32
    %373 = vector.broadcast %cst_135 : f32 to vector<40x2xf32>
    %374 = arith.mulf %11, %373 : vector<40x2xf32>
    %375 = arith.addf %372, %374 : vector<40x2xf32>
    %cst_136 = arith.constant -0.0475070849 : f32
    %376 = vector.broadcast %cst_136 : f32 to vector<40x2xf32>
    %377 = arith.mulf %12, %376 : vector<40x2xf32>
    %378 = arith.addf %375, %377 : vector<40x2xf32>
    %cst_137 = arith.constant 0.112412542 : f32
    %379 = vector.broadcast %cst_137 : f32 to vector<40x2xf32>
    %380 = arith.mulf %13, %379 : vector<40x2xf32>
    %381 = arith.addf %378, %380 : vector<40x2xf32>
    %cst_138 = arith.constant 0.973462045 : f32
    %382 = vector.broadcast %cst_138 : f32 to vector<40x2xf32>
    %383 = arith.mulf %14, %382 : vector<40x2xf32>
    %384 = arith.addf %381, %383 : vector<40x2xf32>
    %cst_139 = arith.constant -0.0735418946 : f32
    %385 = vector.broadcast %cst_139 : f32 to vector<40x2xf32>
    %386 = arith.mulf %15, %385 : vector<40x2xf32>
    %387 = arith.addf %384, %386 : vector<40x2xf32>
    %cst_140 = arith.constant 0.0272508468 : f32
    %388 = vector.broadcast %cst_140 : f32 to vector<40x2xf32>
    %389 = arith.mulf %16, %388 : vector<40x2xf32>
    %390 = arith.addf %387, %389 : vector<40x2xf32>
    %cst_141 = arith.constant -0.0106432345 : f32
    %391 = vector.broadcast %cst_141 : f32 to vector<40x2xf32>
    %392 = arith.mulf %17, %391 : vector<40x2xf32>
    %393 = arith.addf %390, %392 : vector<40x2xf32>
    %cst_142 = arith.constant 0.00338733918 : f32
    %394 = vector.broadcast %cst_142 : f32 to vector<40x2xf32>
    %395 = arith.mulf %18, %394 : vector<40x2xf32>
    %396 = arith.addf %393, %395 : vector<40x2xf32>
    %cst_143 = arith.constant -5.81052678E-4 : f32
    %397 = vector.broadcast %cst_143 : f32 to vector<40x2xf32>
    %398 = arith.mulf %19, %397 : vector<40x2xf32>
    %399 = arith.addf %396, %398 : vector<40x2xf32>
    %c9 = arith.constant 9 : index
    %c0_144 = arith.constant 0 : index
    %c0_145 = arith.constant 0 : index
    %400 = vector.load %arg3[%c9, %c0_144, %c0_145] : memref<10x40x2xf32, #tpu.memory_space<vmem>>, vector<1x40x2xf32>
    %401 = vector.shape_cast %400 : vector<1x40x2xf32> to vector<40x2xf32>
    %402 = vector.shape_cast %399 : vector<40x2xf32> to vector<1x40x2xf32>
    tpu.vector_store %arg3[%c9, %c0_144, %c0_145], %402 {strides = array<i32>} : memref<10x40x2xf32, #tpu.memory_space<vmem>>, vector<1x40x2xf32>,
    return
  }
  func.func @transform_0(%arg0: i32) -> (i32, i32) {
    %c0_i32 = arith.constant 0 : i32
    %c0_i32_0 = arith.constant 0 : i32
    return %arg0, %c0_i32 : i32, i32
  }
  func.func @transform_1(%arg0: i32) -> (i32, i32) {
    %c1_i32 = arith.constant 1 : i32
    %0 = arith.addi %arg0, %c1_i32 : i32
    %c0_i32 = arith.constant 0 : i32
    %c0_i32_0 = arith.constant 0 : i32
    return %0, %c0_i32 : i32, i32
  }
  func.func @transform_2(%arg0: i32) -> (i32, i32, i32) {
    %c0_i32 = arith.constant 0 : i32
    %c0_i32_0 = arith.constant 0 : i32
    %c0_i32_1 = arith.constant 0 : i32
    return %c0_i32, %arg0, %c0_i32_0 : i32, i32, i32
  }
}

</mosaic_0001>

<bundles_post_ra>
// kernel: tpu_custom_call.1
= control target key start
LH: loop header
LB: loop body
LE: loop exit
PB: predicated region body
PF: predicated region fallthrough
CT: control target
= control target key end

     0   :  { %vm72_vm0 = vcmask 1046528   ;;  %vm108_vm1 = vcmask 1045504   ;;  %vm144_vm2 = vcmask 1044480   ;;  %vm180_vm3 = vcmask 1043456   ;;  %s6441_s0 = inlined_call_operand.vmem [shape: f32[80,2], index: 0, kind: input, shape index: {}]   ;;  %s6442_s1 = inlined_call_operand.vmem [shape: f32[80,2], index: 1, kind: input, shape index: {}]   ;;  %s6443_s2 = inlined_call_operand.vmem [shape: f32[10,40,2], index: 2, kind: output, shape index: {}]  }
   0x1   :  { %v33_v0 = vld [vmem:[%s6441_s0] sm:$0xff]  ;;  %v34_v1 = vld [vmem:[%s6441_s0 + $0x8] sm:$0xff]  ;;  %v35_v2 = vld [vmem:[%s6441_s0 + $0x10] sm:$0xff]  ;;  %vm216_vm4 = vcmask 1042432   ;;  %vm252_vm5 = vcmask 1041408   ;;  %vm276_vm6 = vcmask 1040384  }
   0x2   :  { %v40_v3 = vmul.f32 0.5, %v33_v0  ;;  %v41_v4 = vmul.f32 0.5, %v34_v1  ;;  %v42_v5 = vmul.f32 0.5, %v35_v2  ;;  %v36_v6 = vld [vmem:[%s6441_s0 + $0x18] sm:$0xff]  ;;  %v37_v7 = vld [vmem:[%s6441_s0 + $0x20] sm:$0xff]  ;;  %v3307_v9 = vld [vmem:[%s6442_s1 + $0x28] sm:$0xff] }
   0x3   :  { %v43_v8 = vmul.f32 0.5, %v36_v6  ;;  %v3404_v14 = vmul.f32 0.5, %v37_v7  ;;  %v3406_v15 = vmul.f32 0.5, %v3307_v9  ;;  %vm397_vm7 = vcmask 15361  }
   0x4   :  { %v3396_v10 = vadd.f32 0.5, %v40_v3  ;;  %v3398_v11 = vadd.f32 0.5, %v41_v4  ;;  %v3400_v12 = vadd.f32 0.5, %v42_v5  ;;  %v3308_v5 = vld [vmem:[%s6442_s1 + $0x30] sm:$0xff]  ;;  %vm399_vm8 = vcmask 15360  }
   0x5   :  { %v3402_v13 = vadd.f32 0.5, %v43_v8  ;;  %vm404_vm9 = vcmask 8192   ;;  %vm771_vm10 = vcmask 15362   ;;  %vm777_vm11 = vcmask 9216  }
   0x6   :  { %v54_v16 = vmul.f32 -2.452614e-06, %v3396_v10  ;;  %v3410_v17 = vmul.f32 -2.452614e-06, %v3398_v11  ;;  %v3413_v18 = vmul.f32 -2.452614e-06, %v3400_v12 }
   0x7   :  { %v60_v19 = vmul.f32 0.00073377293, %v3396_v10  ;;  %v3417_v20 = vmul.f32 0.00073377293, %v3398_v11  ;;  %v3420_v21 = vmul.f32 0.00073377293, %v3400_v12 }
   0x8   :  { %v96_v22 = vmul.f32 -0.0025844171, %v3396_v10  ;;  %v97_v23 = vmul.f32 -0.0025844171, %v3398_v11  ;;  %v3425_v24 = vmul.f32 -0.0025844171, %v3400_v12 }
   0x9   :  { %v73_v25 = vrot.slane %v60_v19, 1  ;;  %v74_v26 = vrot.slane %v3417_v20, 1  ;;  %v76_v27 = vrot.slane %v3420_v21, 1  ;;  %v132_v28 = vmul.f32 0.0050710216, %v3396_v10 }
   0xa   :  { %v109_v29 = vrot.slane %v96_v22, 2  ;;  %v110_v30 = vrot.slane %v97_v23, 2  ;;  %v112_v31 = vrot.slane %v3425_v24, 2  ;;  %v133_v32 = vmul.f32 0.0050710216, %v3398_v11 }
   0xb   :  { %v75_v33 = vsel %vm72_vm0, %v73_v25, %v74_v26  ;;  %v77_v34 = vsel %vm72_vm0, %v74_v26, %v76_v27  ;;  %v3437_v35 = vmul.f32 0.0050710216, %v3400_v12  ;;  %v145_v36 = vrot.slane %v132_v28, 3 }
   0xc   :  { %v90_v37 = vadd.f32 %v75_v33, %v54_v16  ;;  %v91_v38 = vadd.f32 %v77_v34, %v3410_v17  ;;  %v111_v39 = vsel %vm108_vm1, %v109_v29, %v110_v30  ;;  %v3444_v40 = vsel %vm108_vm1, %v110_v30, %v112_v31 }
   0xd   :  { %v146_v41 = vrot.slane %v133_v32, 3  ;;  %v148_v42 = vrot.slane %v3437_v35, 3  ;;  %v168_v43 = vmul.f32 -0.0075402437, %v3396_v10  ;;  %v169_v44 = vmul.f32 -0.0075402437, %v3398_v11 }
   0xe   :  { %v126_v45 = vadd.f32 %v111_v39, %v90_v37  ;;  %v127_v46 = vadd.f32 %v3444_v40, %v91_v38  ;;  %v3451_v47 = vmul.f32 -0.0075402437, %v3400_v12  ;;  %v204_v48 = vmul.f32 0.009341621, %v3396_v10 }
   0xf   :  { %v147_v49 = vsel %vm144_vm2, %v145_v36, %v146_v41  ;;  %v149_v50 = vsel %vm144_vm2, %v146_v41, %v148_v42  ;;  %v181_v51 = vrot.slane %v168_v43, 4  ;;  %v182_v52 = vrot.slane %v169_v44, 4 }
  0x10   :  { %v162_v53 = vadd.f32 %v147_v49, %v126_v45  ;;  %v163_v54 = vadd.f32 %v149_v50, %v127_v46  ;;  %v184_v55 = vrot.slane %v3451_v47, 4  ;;  %v205_v56 = vmul.f32 0.009341621, %v3398_v11 }
  0x11   :  { %v183_v57 = vsel %vm180_vm3, %v181_v51, %v182_v52  ;;  %v3462_v58 = vmul.f32 0.009341621, %v3400_v12  ;;  %v217_v59 = vrot.slane %v204_v48, 5  ;;  %v240_v60 = vmul.f32 0.99, %v3396_v10 }
  0x12   :  { %v185_v61 = vsel %vm180_vm3, %v182_v52, %v184_v55  ;;  %v198_v62 = vadd.f32 %v183_v57, %v162_v53  ;;  %v218_v63 = vrot.slane %v205_v56, 5  ;;  %v241_v0 = vmul.f32 0.99, %v3398_v11 }
  0x13   :  { %v199_v1 = vadd.f32 %v185_v61, %v163_v54  ;;  %v220_v2 = vrot.slane %v3462_v58, 5  ;;  %v253_v3 = vrot.slane %v240_v60, 6  ;;  %v277_v4 = vrot.slane %v205_v56, 7 }
  0x14   :  { %v219_v6 = vsel %vm216_vm4, %v217_v59, %v218_v63  ;;  %v254_v7 = vrot.slane %v241_v0, 6  ;;  %v307_v8 = vrot.slane %v133_v32, 1  ;;  %v308_v9 = vrot.slane %v3437_v35, 1 }
  0x15   :  { %v221_v16 = vsel %vm216_vm4, %v218_v63, %v220_v2  ;;  %v234_v19 = vadd.f32 %v219_v6, %v198_v62  ;;  %v344_v22 = vrot.slane %v3417_v20, 3  ;;  %v345_v23 = vrot.slane %v3420_v21, 3 }
  0x16   :  { %v235_v25 = vadd.f32 %v221_v16, %v199_v1  ;;  %v255_v26 = vsel %vm252_vm5, %v253_v3, %v254_v7  ;;  %v3478_v28 = vadd.f32 0.5, %v3404_v14  ;;  %v3480_v29 = vmul.f32 0.5, %v3308_v5 }
  0x17   :  { %v270_v30 = vadd.f32 %v255_v26, %v234_v19  ;;  %v309_v32 = vsel %vm72_vm0, %v307_v8, %v308_v9  ;;  %v374_v33 = vrot.slane %v3410_v17, 4  ;;  %v375_v34 = vrot.slane %v3413_v18, 4 }
  0x18   :  { %v346_v36 = vsel %vm144_vm2, %v344_v22, %v345_v23  ;;  %v3487_v20 = vmul.f32 0.00073377293, %v3402_v13  ;;  %v99_v37 = vmul.f32 -0.0025844171, %v3402_v13  ;;  %v3491_v38 = vmul.f32 0.0050710216, %v3402_v13 }
  0x19   :  { %v292_v14 = vadd.f32 %v277_v4, %v270_v30  ;;  %v3494_v39 = vmul.f32 -2.452614e-06, %v3402_v13  ;;  %v3497_v41 = vmul.f32 -0.0075402437, %v3402_v13  ;;  %v3500_v17 = vmul.f32 0.009341621, %v3402_v13 }
  0x1a   :  { %v78_v43 = vrot.slane %v3487_v20, 1  ;;  %v114_v45 = vrot.slane %v99_v37, 2  ;;  %v150_v46 = vrot.slane %v3491_v38, 3  ;;  %v3505_v48 = vmul.f32 0.99, %v3400_v12 }
  0x1b   :  { %v299_v49 = vadd.f32 %v292_v14, %v169_v44  ;;  %v186_v50 = vrot.slane %v3497_v41, 4  ;;  %v222_v51 = vrot.slane %v3500_v17, 5  ;;  %v278_v52 = vrot.slane %v3462_v58, 7 }
  0x1c   :  { %v376_v53 = vsel %vm180_vm3, %v374_v33, %v375_v34  ;;  %v79_v54 = vsel %vm72_vm0, %v76_v27, %v78_v43  ;;  %v115_v56 = vsel %vm108_vm1, %v112_v31, %v114_v45  ;;  %v256_v57 = vrot.slane %v3505_v48, 6 }
  0x1d   :  { %v324_v59 = vadd.f32 %v309_v32, %v299_v49  ;;  %v92_v44 = vadd.f32 %v79_v54, %v3413_v18  ;;  %v151_v60 = vsel %vm144_vm2, %v148_v42, %v150_v46  ;;  %v187_v58 = vsel %vm180_vm3, %v184_v55, %v186_v50 }
  0x1e   :  { %v257_v61 = vsel %vm252_vm5, %v254_v7, %v256_v57  ;;  %v279_v21 = vsel %vm276_vm6, %v277_v4, %v278_v52  ;;  %v310_v27 = vrot.slane %v3491_v38, 1  ;;  %v347_v24 = vrot.slane %v3487_v20, 3 }
  0x1f   :  { %v336_v31 = vadd.f32 %v324_v59, %v3444_v40  ;;  %v128_v62 = vadd.f32 %v115_v56, %v92_v44  ;;  %v223_v63 = vsel %vm216_vm4, %v220_v2, %v222_v51  ;;  %v271_v18 = vadd.f32 %v257_v61, %v235_v25 }
  0x20   :  { %v311_v35 = vsel %vm72_vm0, %v308_v9, %v310_v27  ;;  %v348_v42 = vsel %vm144_vm2, %v345_v23, %v347_v24  ;;  %v377_v55 = vrot.slane %v3494_v39, 4  ;;  %v3533_v0 = vmul.f32 0.00073377293, %v3478_v28 }
  0x21   :  { %v361_v1 = vadd.f32 %v346_v36, %v336_v31  ;;  %v164_v3 = vadd.f32 %v151_v60, %v128_v62  ;;  %v293_v4 = vadd.f32 %v279_v21, %v271_v18  ;;  %v3536_v5 = vmul.f32 -2.452614e-06, %v3478_v28 }
  0x22   :  { %v80_v40 = vrot.slane %v3533_v0, 1  ;;  %v100_v2 = vmul.f32 -0.0025844171, %v3478_v28  ;;  %v3541_v6 = vmul.f32 0.0050710216, %v3478_v28  ;;  %v280_v7 = vrot.slane %v3500_v17, 7 }
  0x23   :  { %v391_v8 = vadd.f32 %v376_v53, %v361_v1  ;;  %v200_v9 = vadd.f32 %v187_v58, %v164_v3  ;;  %v300_v16 = vadd.f32 %v293_v4, %v3451_v47  ;;  %v3546_v19 = vmul.f32 -0.0075402437, %v3478_v28 }
  0x24   :  { %v81_v22 = vsel %vm72_vm0, %v78_v43, %v80_v40  ;;  %v116_v23 = vrot.slane %v100_v2, 2  ;;  %v152_v25 = vrot.slane %v3541_v6, 3  ;;  %v3551_v26 = vmul.f32 0.009341621, %v3478_v28 }
  0x25   :  { %398 = vst.msk [vmem:[%s6443_s2 - $0x1] sm:$0xfe] %vm397_vm7, %v391_v8  ;;  %v325_v30 = vadd.f32 %v311_v35, %v300_v16  ;;  %v378_v32 = vsel %vm180_vm3, %v375_v34, %v377_v55  ;;  %v93_v47 = vadd.f32 %v81_v22, %v3494_v39  ;;  %v188_v33 = vrot.slane %v3546_v19, 4 }
  0x26   :  { %v117_v36 = vsel %vm108_vm1, %v114_v45, %v116_v23  ;;  %v153_v20 = vsel %vm144_vm2, %v150_v46, %v152_v25  ;;  %v224_v37 = vrot.slane %v3551_v26, 5  ;;  %v243_v38 = vmul.f32 0.99, %v3402_v13 }
  0x27   :  { %v236_v14 = vadd.f32 %v223_v63, %v200_v9  ;;  %v337_v43 = vadd.f32 %v325_v30, %v115_v56  ;;  %v129_v48 = vadd.f32 %v117_v36, %v93_v47  ;;  %v189_v49 = vsel %vm180_vm3, %v186_v50, %v188_v33 }
  0x28   :  { %v258_v53 = vrot.slane %v243_v38, 6  ;;  %v281_v34 = vsel %vm276_vm6, %v278_v52, %v280_v7  ;;  %v312_v39 = vrot.slane %v3541_v6, 1  ;;  %v349_v45 = vrot.slane %v3533_v0, 3 }
  0x29   :  { %v362_v54 = vadd.f32 %v348_v42, %v337_v43  ;;  %v165_v46 = vadd.f32 %v153_v20, %v129_v48  ;;  %v379_v59 = vrot.slane %v3536_v5, 4  ;;  %v3572_v44 = vadd.f32 0.5, %v3406_v15 }
  0x2a   :  { %v225_v56 = vsel %vm216_vm4, %v222_v51, %v224_v37  ;;  %v259_v50 = vsel %vm252_vm5, %v256_v57, %v258_v53  ;;  %v313_v60 = vsel %vm72_vm0, %v310_v27, %v312_v39  ;;  %v3578_v58 = vmul.f32 0.99, %v3478_v28 }
  0x2b   :  { %v392_v52 = vadd.f32 %v378_v32, %v362_v54  ;;  %v201_v61 = vadd.f32 %v189_v49, %v165_v46  ;;  %v272_v21 = vadd.f32 %v259_v50, %v236_v14  ;;  %v350_v31 = vsel %vm144_vm2, %v347_v24, %v349_v45 }
  0x2c   :  { %v380_v62 = vsel %vm180_vm3, %v377_v55, %v379_v59  ;;  %v3583_v63 = vmul.f32 -2.452614e-06, %v3572_v44  ;;  %v3586_v15 = vmul.f32 0.00073377293, %v3572_v44  ;;  %v101_v51 = vmul.f32 -0.0025844171, %v3572_v44 }
  0x2d   :  { %400 = vst.msk [vmem:[%s6443_s2 + $0x7] sm:$0xff] %vm399_vm8, %v392_v52  ;;  %v237_v57 = vadd.f32 %v225_v56, %v201_v61  ;;  %v294_v27 = vadd.f32 %v281_v34, %v272_v21  ;;  %v137_v18 = vmul.f32 0.0050710216, %v3572_v44  ;;  %v3595_v24 = vmul.f32 -0.0075402437, %v3572_v44 }
  0x2e   :  { %v82_v35 = vrot.slane %v3586_v15, 1  ;;  %v118_v42 = vrot.slane %v101_v51, 2  ;;  %v3599_v55 = vmul.f32 0.009341621, %v3572_v44  ;;  %v260_v0 = vrot.slane %v3578_v58, 6 }
  0x2f   :  { %v301_v1 = vadd.f32 %v294_v27, %v3497_v41  ;;  %v154_v3 = vrot.slane %v137_v18, 3  ;;  %v190_v4 = vrot.slane %v3595_v24, 4  ;;  %v282_v2 = vrot.slane %v3551_v26, 7 }
  0x30   :  { %v83_v6 = vsel %vm72_vm0, %v80_v40, %v82_v35  ;;  %v95_v8 = vadd.f32 %v82_v35, %v3583_v63  ;;  %v119_v9 = vsel %vm108_vm1, %v116_v23, %v118_v42  ;;  %v226_v16 = vrot.slane %v3599_v55, 5 }
  0x31   :  { %v326_v22 = vadd.f32 %v313_v60, %v301_v1  ;;  %v94_v30 = vadd.f32 %v83_v6, %v3536_v5  ;;  %v155_v32 = vsel %vm144_vm2, %v152_v25, %v154_v3  ;;  %v191_v41 = vsel %vm180_vm3, %v188_v33, %v190_v4 }
  0x32   :  { %v131_v47 = vadd.f32 %v118_v42, %v95_v8  ;;  %v227_v20 = vsel %vm216_vm4, %v224_v37, %v226_v16  ;;  %v261_v26 = vsel %vm252_vm5, %v258_v53, %v260_v0  ;;  %v283_v40 = vsel %vm276_vm6, %v280_v7, %v282_v2 }
  0x33   :  { %v338_v38 = vadd.f32 %v326_v22, %v117_v36  ;;  %v130_v23 = vadd.f32 %v119_v9, %v94_v30  ;;  %v273_v14 = vadd.f32 %v261_v26, %v237_v57  ;;  %v314_v43 = vrot.slane %v137_v18, 1 }
  0x34   :  { %v167_v48 = vadd.f32 %v154_v3, %v131_v47  ;;  %v351_v5 = vrot.slane %v3586_v15, 3  ;;  %v381_v25 = vrot.slane %v3583_v63, 4  ;;  %v3620_v33 = vadd.f32 0.5, %v3480_v29 }
  0x35   :  { %v363_v49 = vadd.f32 %v350_v31, %v338_v38  ;;  %v166_v37 = vadd.f32 %v155_v32, %v130_v23  ;;  %v295_v34 = vadd.f32 %v283_v40, %v273_v14  ;;  %v315_v53 = vsel %vm72_vm0, %v312_v39, %v314_v43 }
  0x36   :  { %v203_v17 = vadd.f32 %v190_v4, %v167_v48  ;;  %v352_v7 = vsel %vm144_vm2, %v349_v45, %v351_v5  ;;  %v382_v36 = vsel %vm180_vm3, %v379_v59, %v381_v25  ;;  %v245_v54 = vmul.f32 0.99, %v3572_v44 }
  0x37   :  { %v393_v46 = vadd.f32 %v380_v62, %v363_v49  ;;  %v202_v56 = vadd.f32 %v191_v41, %v166_v37  ;;  %v302_v50 = vadd.f32 %v295_v34, %v3546_v19  ;;  %v284_v60 = vrot.slane %v3599_v55, 7 }
  0x38   :  { %v262_v29 = vrot.slane %v245_v54, 6  ;;  %v305_v58 = vmul.f32 0.0050710216, %v3620_v33  ;;  %v330_v52 = vmul.f32 -0.0025844171, %v3620_v33  ;;  %v239_v61 = vadd.f32 %v226_v16, %v203_v17 }
  0x39   :  { %401 = vst.msk [vmem:[%s6443_s2 + $0xf] sm:$0xff] %vm399_vm8, %v393_v46  ;;  %v238_v39 = vadd.f32 %v227_v20, %v202_v56  ;;  %v327_v45 = vadd.f32 %v315_v53, %v302_v50  ;;  %v285_v59 = vsel %vm276_vm6, %v282_v2, %v284_v60  ;;  %v342_v21 = vmul.f32 0.00073377293, %v3620_v33 }
  0x3a   :  { %v263_v19 = vsel %vm252_vm5, %v260_v0, %v262_v29  ;;  %v316_v31 = vrot.slane %v305_v58, 1  ;;  %v332_v62 = vrot.slane %v330_v52, 2  ;;  %v367_v63 = vmul.f32 -2.452614e-06, %v3620_v33 }
  0x3b   :  { %v339_v15 = vadd.f32 %v327_v45, %v119_v9  ;;  %v274_v51 = vadd.f32 %v263_v19, %v238_v39  ;;  %v353_v57 = vrot.slane %v342_v21, 3  ;;  %v275_v27 = vadd.f32 %v262_v29, %v239_v61 }
  0x3c   :  { %v317_v18 = vsel %vm72_vm0, %v314_v43, %v316_v31  ;;  %v333_v35 = vsel %vm108_vm1, %v118_v42, %v332_v62  ;;  %v383_v55 = vrot.slane %v367_v63, 4  ;;  %v298_v1 = vmul.f32 -0.0075402437, %v3620_v33 }
  0x3d   :  { %v364_v3 = vadd.f32 %v352_v7, %v339_v15  ;;  %v296_v4 = vadd.f32 %v285_v59, %v274_v51  ;;  %v354_v2 = vsel %vm144_vm2, %v351_v5, %v353_v57  ;;  %v297_v0 = vadd.f32 %v284_v60, %v275_v27 }
  0x3e   :  { %v384_v6 = vsel %vm180_vm3, %v381_v25, %v383_v55  ;;  %v406_v8 = vmul.f32 -0.0005810527, %v3396_v10  ;;  %v412_v9 = vmul.f32 0.0033873392, %v3396_v10  ;;  %v3646_v16 = vmul.f32 0.0033873392, %v3398_v11 }
  0x3f   :  { %v394_v22 = vadd.f32 %v382_v36, %v364_v3  ;;  %v303_v42 = vadd.f32 %v296_v4, %v3595_v24  ;;  %v304_v30 = vadd.f32 %v298_v1, %v297_v0  ;;  %v447_v32 = vmul.f32 -0.0106432345, %v3396_v10 }
  0x40   :  { %6676 = vst [vmem:[#allocation2_spill] sm:$0xff] %v3646_v16  ;;  %v424_v41 = vrot.slane %v412_v9, 1  ;;  %v425_v47 = vrot.slane %v3646_v16, 1  ;;  %v3652_v20 = vmul.f32 -0.0106432345, %v3398_v11 }
  0x41   :  { %v482_v26 = vmul.f32 0.027250847, %v3396_v10  ;;  %402 = vst.msk [vmem:[%s6443_s2 + $0x17] sm:$0xff] %vm399_vm8, %v394_v22  ;;  %v328_v40 = vadd.f32 %v317_v18, %v303_v42  ;;  %v329_v38 = vadd.f32 %v316_v31, %v304_v30  ;;  %v459_v23 = vrot.slane %v447_v32, 2 }
  0x42   :  { %6677 = vst [vmem:[#allocation3_spill] sm:$0xff] %v3652_v20  ;;  %v3660_v24 = vmul.f32 0.027250847, %v3398_v11  ;;  %v426_v14 = vsel %vm72_vm0, %v424_v41, %v425_v47  ;;  %v460_v43 = vrot.slane %v3652_v20, 2  ;;  %v517_v5 = vmul.f32 -0.073541895, %v3396_v10 }
  0x43   :  { %v494_v48 = vrot.slane %v482_v26, 3  ;;  %v340_v25 = vadd.f32 %v333_v35, %v328_v40  ;;  %v341_v49 = vadd.f32 %v332_v62, %v329_v38  ;;  %v441_v37 = vadd.f32 %v426_v14, %v406_v8 }
  0x44   :  { %6678 = vst [vmem:[#allocation4_spill] sm:$0xff] %v3660_v24  ;;  %v495_v34 = vrot.slane %v3660_v24, 3  ;;  %v461_v53 = vsel %vm108_vm1, %v459_v23, %v460_v43  ;;  %v3672_v17 = vmul.f32 -0.073541895, %v3398_v11  ;;  %v529_v7 = vrot.slane %v517_v5, 4 }
  0x45   :  { %v552_v36 = vmul.f32 0.97346205, %v3396_v10  ;;  %v365_v54 = vadd.f32 %v354_v2, %v340_v25  ;;  %v366_v46 = vadd.f32 %v353_v57, %v341_v49  ;;  %v476_v56 = vadd.f32 %v461_v53, %v441_v37 }
  0x46   :  { %6679 = vst [vmem:[#allocation5_spill] sm:$0xff] %v3672_v17  ;;  %v496_v50 = vsel %vm144_vm2, %v494_v48, %v495_v34  ;;  %v530_v60 = vrot.slane %v3672_v17, 4  ;;  %v3680_v29 = vmul.f32 0.97346205, %v3398_v11  ;;  %v3683_v52 = vmul.f32 0.11241254, %v3398_v11 }
  0x47   :  { %v564_v58 = vrot.slane %v552_v36, 5  ;;  %v395_v61 = vadd.f32 %v384_v6, %v365_v54  ;;  %v396_v39 = vadd.f32 %v383_v55, %v366_v46  ;;  %v511_v45 = vadd.f32 %v496_v50, %v476_v56 }
  0x48   :  { %6680 = vst [vmem:[#allocation6_spill] sm:$0xff] %v3680_v29  ;;  %6681 = vst [vmem:[#allocation7_spill] sm:$0xff] %v3683_v52  ;;  %v531_v59 = vsel %vm180_vm3, %v529_v7, %v530_v60  ;;  %v565_v21 = vrot.slane %v3680_v29, 5  ;;  %v597_v19 = vrot.slane %v3683_v52, 6  ;;  %v3691_v31 = vmul.f32 -0.047507085, %v3398_v11 }
  0x49   :  { %403 = vst.msk [vmem:[%s6443_s2 + $0x1f] sm:$0xff] %vm399_vm8, %v395_v61  ;;  %v546_v62 = vadd.f32 %v531_v59, %v511_v45  ;;  %v3702_v63 = vmul.f32 0.02309792, %v3398_v11  ;;  %v665_v15 = vmul.f32 -0.009739505, %v3398_v11 }
  0x4a   :  { %6682 = vst [vmem:[#allocation8_spill] sm:$0xff] %v3691_v31  ;;  %405 = vst.msk [vmem:[%s6443_s2 + $0x27] sm:$0x1] %vm404_vm9, %v396_v39  ;;  %v3706_v51 = vmul.f32 -0.009739505, %v3400_v12  ;;  %v566_v57 = vsel %vm216_vm4, %v564_v58, %v565_v21  ;;  %v630_v27 = vrot.slane %v3691_v31, 7 }
  0x4b   :  { %v700_v18 = vmul.f32 0.0025730673, %v3398_v11  ;;  %v3714_v35 = vmul.f32 0.0025730673, %v3400_v12  ;;  %v581_v55 = vadd.f32 %v566_v57, %v546_v62  ;;  %v677_v1 = vrot.slane %v665_v15, 1 }
  0x4c   :  { %v6447_v3 = vrot.slane %v3706_v51, 1  ;;  %v3718_v4 = vmul.f32 0.0025730673, %v3402_v13  ;;  %v3721_v2 = vmul.f32 -0.009739505, %v3402_v13  ;;  %v3055_v49 = vrot.slane %v665_v15, 2 }
  0x4d   :  { %v712_v0 = vrot.slane %v700_v18, 2  ;;  %v6446_v6 = vrot.slane %v3714_v35, 2  ;;  %v735_v8 = vmul.f32 -4.475203e-05, %v3398_v11  ;;  %v612_v9 = vadd.f32 %v597_v19, %v581_v55 }
  0x4e   :  { %v679_v22 = vsel %vm72_vm0, %v677_v1, %v6447_v3  ;;  %v3731_v42 = vmul.f32 -4.475203e-05, %v3400_v12  ;;  %v3027_v30 = vmul.f32 0.0025730673, %v3396_v10  ;;  %v3026_v26 = vmul.f32 -4.475203e-05, %v3396_v10 }
  0x4f   :  { %v714_v32 = vsel %vm108_vm1, %v712_v0, %v6446_v6  ;;  %v747_v41 = vrot.slane %v735_v8, 3  ;;  %v3030_v40 = vrot.slane %v700_v18, 1  ;;  %v647_v38 = vadd.f32 %v630_v27, %v612_v9 }
  0x50   :  { %v3029_v23 = vrot.slane %v3027_v30, 1  ;;  %v3032_v14 = vrot.slane %v3714_v35, 1  ;;  %v3034_v48 = vrot.slane %v3718_v4, 1  ;;  %v6445_v5 = vrot.slane %v3731_v42, 3 }
  0x51   :  { %v3052_v25 = vmul.f32 -0.009739505, %v3396_v10  ;;  %v3057_v37 = vrot.slane %v3706_v51, 2  ;;  %v659_v53 = vadd.f32 %v3702_v63, %v647_v38  ;;  %v3059_v45 = vrot.slane %v3721_v2, 2 }
  0x52   :  { %v3031_v7 = vsel %vm72_vm0, %v3029_v23, %v3030_v40  ;;  %v3033_v36 = vsel %vm72_vm0, %v3030_v40, %v3032_v14  ;;  %v3035_v54 = vsel %vm72_vm0, %v3032_v14, %v3034_v48  ;;  %v3077_v59 = vmul.f32 0.02309792, %v3396_v10 }
  0x53   :  { %v3046_v46 = vadd.f32 %v3031_v7, %v3026_v26  ;;  %v3047_v56 = vadd.f32 %v3033_v36, %v735_v8  ;;  %v3048_v50 = vadd.f32 %v3035_v54, %v3731_v42  ;;  %v3054_v58 = vrot.slane %v3052_v25, 2 }
  0x54   :  { %v694_v61 = vadd.f32 %v679_v22, %v659_v53  ;;  %v3058_v39 = vsel %vm108_vm1, %v3055_v49, %v3057_v37  ;;  %v749_v62 = vsel %vm144_vm2, %v747_v41, %v6445_v5  ;;  %v3085_v18 = vrot.slane %v3702_v63, 3 }
  0x55   :  { %v3056_v15 = vsel %vm108_vm1, %v3054_v58, %v3055_v49  ;;  %v3072_v57 = vadd.f32 %v3058_v39, %v3047_v56  ;;  %v3060_v1 = vsel %vm108_vm1, %v3057_v37, %v3059_v45  ;;  %v3084_v8 = vrot.slane %v3077_v59, 3 }
  0x56   :  { %v729_v55 = vadd.f32 %v714_v32, %v694_v61  ;;  %v3071_v0 = vadd.f32 %v3056_v15, %v3046_v46  ;;  %v3761_v9 = vadd.f32 %v3060_v1, %v3048_v50  ;;  %v3764_v22 = vmul.f32 -0.0005810527, %v3398_v11 }
  0x57   :  { %v3767_v30 = vmul.f32 0.0033873392, %v3400_v12  ;;  %v3086_v26 = vsel %vm144_vm2, %v3084_v8, %v3085_v18  ;;  %v3771_v40 = vmul.f32 -0.0106432345, %v3400_v12  ;;  %v3774_v63 = vmul.f32 0.027250847, %v3400_v12 }
  0x58   :  { %6683 = vst [vmem:[#allocation9_spill] sm:$0xff] %v3764_v22  ;;  %v764_v41 = vadd.f32 %v749_v62, %v729_v55  ;;  %v3776_v32 = vadd.f32 %v3086_v26, %v3071_v0  ;;  %v3780_v23 = vmul.f32 -0.073541895, %v3400_v12  ;;  %v3783_v14 = vmul.f32 0.97346205, %v3400_v12 }
  0x59   :  { %6684 = vst [vmem:[#allocation10_spill] sm:$0xff] %v3767_v30  ;;  %6685 = vst [vmem:[#allocation11_spill] sm:$0xff] %v3771_v40  ;;  %v427_v38 = vrot.slane %v3767_v30, 1  ;;  %v462_v25 = vrot.slane %v3771_v40, 2  ;;  %v497_v49 = vrot.slane %v3774_v63, 3 }
  0x5a   :  { %6686 = vst [vmem:[#allocation12_spill] sm:$0xff] %v3774_v63  ;;  %6687 = vst [vmem:[#allocation13_spill] sm:$0xff] %v3776_v32  ;;  %v6444_v53 = vrot.slane %v3780_v23, 4  ;;  %v3796_v7 = vmul.f32 0.11241254, %v3400_v12  ;;  %v567_v56 = vrot.slane %v3783_v14, 5 }
  0x5b   :  { %6688 = vst [vmem:[#allocation14_spill] sm:$0xff] %v3780_v23  ;;  %6689 = vst [vmem:[#allocation15_spill] sm:$0xff] %v3783_v14  ;;  %v428_v37 = vsel %vm72_vm0, %v425_v47, %v427_v38  ;;  %v3799_v36 = vmul.f32 -0.047507085, %v3400_v12  ;;  %v463_v46 = vsel %vm108_vm1, %v460_v43, %v462_v25  ;;  %v3807_v50 = vmul.f32 0.02309792, %v3400_v12 }
  0x5c   :  { %3309 = vst.msk [vmem:[%s6443_s2 + $0x26] sm:$0xfc] %vm771_vm10, %v764_v41  ;;  %6690 = vst [vmem:[#allocation16_spill] sm:$0xff] %v3796_v7  ;;  %v442_v54 = vadd.f32 %v428_v37, %v3764_v22  ;;  %v498_v47 = vsel %vm144_vm2, %v495_v34, %v497_v49  ;;  %v598_v58 = vrot.slane %v3796_v7, 6  ;;  %v3815_v39 = vmul.f32 -0.009739505, %v3478_v28 }
  0x5d   :  { %6691 = vst [vmem:[#allocation17_spill] sm:$0xff] %v3799_v36  ;;  %v631_v61 = vrot.slane %v3799_v36, 7  ;;  %v3818_v62 = vmul.f32 0.0025730673, %v3478_v28  ;;  %v533_v15 = vsel %vm180_vm3, %v530_v60, %v6444_v53  ;;  %v3827_v34 = vmul.f32 -4.475203e-05, %v3402_v13 }
  0x5e   :  { %v477_v59 = vadd.f32 %v463_v46, %v442_v54  ;;  %v3061_v55 = vrot.slane %v3815_v39, 2  ;;  %v568_v0 = vsel %vm216_vm4, %v565_v21, %v567_v56  ;;  %v3087_v41 = vrot.slane %v3807_v50, 3 }
  0x5f   :  { %v3036_v8 = vrot.slane %v3818_v62, 1  ;;  %v599_v26 = vsel %vm252_vm5, %v597_v19, %v598_v58  ;;  %v632_v60 = vsel %vm276_vm6, %v630_v27, %v631_v61  ;;  %v6450_v37 = vrot.slane %v3721_v2, 1 }
  0x60   :  { %v512_v1 = vadd.f32 %v498_v47, %v477_v59  ;;  %v3062_v54 = vsel %vm108_vm1, %v3059_v45, %v3061_v55  ;;  %v3088_v59 = vsel %vm144_vm2, %v3085_v18, %v3087_v41  ;;  %v3852_v53 = vmul.f32 -0.0005810527, %v3400_v12 }
  0x61   :  { %v3037_v21 = vsel %vm72_vm0, %v3034_v48, %v3036_v8  ;;  %v3849_v19 = vadd.f32 %v3088_v59, %v3072_v57  ;;  %v3855_v27 = vmul.f32 0.0033873392, %v3402_v13  ;;  %v3864_v48 = vmul.f32 -0.073541895, %v3402_v13 }
  0x62   :  { %v547_v46 = vadd.f32 %v533_v15, %v512_v1  ;;  %v3049_v43 = vadd.f32 %v3037_v21, %v3827_v34  ;;  %6693 = vst [vmem:[#allocation19_spill] sm:$0xff] %v3852_v53  ;;  %v3858_v15 = vmul.f32 -0.0106432345, %v3402_v13  ;;  %v3861_v1 = vmul.f32 0.027250847, %v3402_v13 }
  0x63   :  { %6692 = vst [vmem:[#allocation18_spill] sm:$0xff] %v3849_v19  ;;  %6694 = vst [vmem:[#allocation20_spill] sm:$0xff] %v3855_v27  ;;  %v6449_v21 = vrot.slane %v3855_v27, 1  ;;  %v3871_v59 = vmul.f32 0.97346205, %v3402_v13 }
  0x64   :  { %v582_v45 = vadd.f32 %v568_v0, %v547_v46  ;;  %6695 = vst [vmem:[#allocation21_spill] sm:$0xff] %v3858_v15  ;;  %6696 = vst [vmem:[#allocation22_spill] sm:$0xff] %v3861_v1  ;;  %v3867_v57 = vadd.f32 %v3062_v54, %v3049_v43  ;;  %v464_v0 = vrot.slane %v3858_v15, 2  ;;  %v3876_v6 = vmul.f32 0.11241254, %v3402_v13 }
  0x65   :  { %6697 = vst [vmem:[#allocation23_spill] sm:$0xff] %v3864_v48  ;;  %6698 = vst [vmem:[#allocation24_spill] sm:$0xff] %v3871_v59  ;;  %v430_v47 = vsel %vm72_vm0, %v427_v38, %v6449_v21  ;;  %v3884_v18 = vmul.f32 -0.047507085, %v3402_v13  ;;  %v6702_v38 = vrot.slane %v3718_v4, 2  ;;  %v6703_v21 = vrot.slane %v3714_v35, 2 }
  0x66   :  { %v613_v5 = vadd.f32 %v599_v26, %v582_v45  ;;  %6699 = vst [vmem:[#allocation25_spill] sm:$0xff] %v3876_v6  ;;  %v6701_v26 = vrot.slane %v3706_v51, 1  ;;  %v443_v46 = vadd.f32 %v430_v47, %v3852_v53  ;;  %v465_v63 = vsel %vm108_vm1, %v462_v25, %v464_v0 }
  0x67   :  { %6700 = vst [vmem:[#allocation26_spill] sm:$0xff] %v3884_v18  ;;  %v716_v54 = vsel %vm108_vm1, %v6703_v21, %v6702_v38  ;;  %v6704_v43 = vrot.slane %v3861_v1, 3  ;;  %v3905_v47 = vmul.f32 0.02309792, %v3402_v13  ;;  %v3908_v25 = vmul.f32 -0.009739505, %v3572_v44 }
  0x68   :  { %v648_v3 = vadd.f32 %v632_v60, %v613_v5  ;;  %v681_v45 = vsel %vm72_vm0, %v6701_v26, %v6450_v37  ;;  %v478_v37 = vadd.f32 %v465_v63, %v443_v46  ;;  %v6705_v35 = vrot.slane %v3827_v34, 3 }
  0x69   :  { %v500_v5 = vsel %vm144_vm2, %v497_v49, %v6704_v43  ;;  %v6706_v21 = vrot.slane %v3731_v42, 3  ;;  %v6707_v49 = vrot.slane %v3864_v48, 4  ;;  %v6708_v43 = vrot.slane %v3780_v23, 4 }
  0x6a   :  { %v660_v26 = vadd.f32 %v3807_v50, %v648_v3  ;;  %v6709_v3 = vrot.slane %v3871_v59, 5  ;;  %v3924_v50 = vmul.f32 0.0025730673, %v3572_v44  ;;  %v513_v60 = vadd.f32 %v500_v5, %v478_v37 }
  0x6b   :  { %v751_v38 = vsel %vm144_vm2, %v6706_v21, %v6705_v35  ;;  %v535_v51 = vsel %vm180_vm3, %v6708_v43, %v6707_v49  ;;  %v3927_v24 = vmul.f32 -4.475203e-05, %v3478_v28  ;;  %v6455_v42 = vrot.slane %v3908_v25, 2 }
  0x6c   :  { %v570_v63 = vsel %vm216_vm4, %v567_v56, %v6709_v3  ;;  %v695_v46 = vadd.f32 %v681_v45, %v660_v26  ;;  %v6710_v35 = vrot.slane %v3876_v6, 6  ;;  %v6711_v49 = vrot.slane %v3884_v18, 7 }
  0x6d   :  { %v3038_v56 = vrot.slane %v3924_v50, 1  ;;  %v3089_v3 = vrot.slane %v3905_v47, 3  ;;  %v548_v45 = vadd.f32 %v535_v51, %v513_v60  ;;  %v682_v37 = vrot.slane %v3815_v39, 1 }
  0x6e   :  { %v601_v21 = vsel %vm252_vm5, %v598_v58, %v6710_v35  ;;  %v634_v43 = vsel %vm276_vm6, %v631_v61, %v6711_v49  ;;  %v730_v15 = vadd.f32 %v716_v54, %v695_v46  ;;  %v3064_v5 = vsel %vm108_vm1, %v3061_v55, %v6455_v42 }
  0x6f   :  { %v3039_v35 = vsel %vm72_vm0, %v3036_v8, %v3038_v56  ;;  %v3090_v61 = vsel %vm144_vm2, %v3087_v41, %v3089_v3  ;;  %v583_v23 = vadd.f32 %v570_v63, %v548_v45  ;;  %v3948_v54 = vmul.f32 -0.0005810527, %v3402_v13 }
  0x70   :  { %v765_v49 = vadd.f32 %v751_v38, %v730_v15  ;;  %v3050_v53 = vadd.f32 %v3039_v35, %v3927_v24  ;;  %v3951_v39 = vadd.f32 %v3090_v61, %v3761_v9  ;;  %v3954_v55 = vmul.f32 0.0033873392, %v3478_v28 }
  0x71   :  { %6712 = vst [vmem:[#allocation27_spill] sm:$0xff] %v3948_v54  ;;  %v3957_v60 = vmul.f32 -0.0106432345, %v3478_v28  ;;  %v3960_v8 = vmul.f32 0.027250847, %v3478_v28  ;;  %v614_v41 = vadd.f32 %v601_v21, %v583_v23  ;;  %v6720_v23 = vrot.slane %v3721_v2, 1 }
  0x72   :  { %6713 = vst [vmem:[#allocation28_spill] sm:$0xff] %v3951_v39  ;;  %6714 = vst [vmem:[#allocation29_spill] sm:$0xff] %v3954_v55  ;;  %v3966_v15 = vadd.f32 %v3064_v5, %v3050_v53  ;;  %v3969_v9 = vmul.f32 -0.073541895, %v3478_v28  ;;  %v3972_v51 = vmul.f32 0.97346205, %v3478_v28 }
  0x73   :  { %6715 = vst [vmem:[#allocation30_spill] sm:$0xff] %v3957_v60  ;;  %6716 = vst [vmem:[#allocation31_spill] sm:$0xff] %v3960_v8  ;;  %v431_v38 = vrot.slane %v3954_v55, 1  ;;  %v466_v63 = vrot.slane %v3957_v60, 2  ;;  %v501_v46 = vrot.slane %v3960_v8, 3  ;;  %v649_v35 = vadd.f32 %v634_v43, %v614_v41 }
  0x74   :  { %3310 = vst.msk [vmem:[%s6443_s2 + $0x2e] sm:$0xff] %vm399_vm8, %v765_v49  ;;  %6717 = vst [vmem:[#allocation32_spill] sm:$0xff] %v3969_v9  ;;  %v3978_v45 = vmul.f32 0.11241254, %v3478_v28  ;;  %v683_v53 = vsel %vm72_vm0, %v6720_v23, %v682_v37  ;;  %v536_v21 = vrot.slane %v3969_v9, 4  ;;  %v571_v5 = vrot.slane %v3972_v51, 5 }
  0x75   :  { %6718 = vst [vmem:[#allocation33_spill] sm:$0xff] %v3972_v51  ;;  %v6721_v61 = vrot.slane %v3855_v27, 1  ;;  %v467_v42 = vsel %vm108_vm1, %v464_v0, %v466_v63  ;;  %v3991_v26 = vmul.f32 -0.047507085, %v3478_v28  ;;  %v661_v43 = vadd.f32 %v3905_v47, %v649_v35 }
  0x76   :  { %6719 = vst [vmem:[#allocation34_spill] sm:$0xff] %v3978_v45  ;;  %v6723_v2 = vrot.slane %v3818_v62, 2  ;;  %v6724_v41 = vrot.slane %v3718_v4, 2  ;;  %v6725_v8 = vrot.slane %v3927_v24, 3  ;;  %v6726_v9 = vrot.slane %v3827_v34, 3 }
  0x77   :  { %v432_v49 = vsel %vm72_vm0, %v6721_v61, %v431_v38  ;;  %6722 = vst [vmem:[#allocation35_spill] sm:$0xff] %v3991_v26  ;;  %v6727_v58 = vrot.slane %v3861_v1, 3  ;;  %v4010_v35 = vmul.f32 0.02309792, %v3478_v28  ;;  %v6728_v55 = vrot.slane %v3864_v48, 4 }
  0x78   :  { %v718_v23 = vsel %vm108_vm1, %v6724_v41, %v6723_v2  ;;  %v753_v61 = vsel %vm144_vm2, %v6726_v9, %v6725_v8  ;;  %v444_v0 = vadd.f32 %v432_v49, %v3948_v54  ;;  %v696_v2 = vadd.f32 %v683_v53, %v661_v43 }
  0x79   :  { %v502_v51 = vsel %vm144_vm2, %v6727_v58, %v501_v46  ;;  %v537_v34 = vsel %vm180_vm3, %v6728_v55, %v536_v21  ;;  %v4017_v8 = vmul.f32 -4.475203e-05, %v3572_v44  ;;  %v6729_v9 = vrot.slane %v3871_v59, 5 }
  0x7a   :  { %v479_v41 = vadd.f32 %v467_v42, %v444_v0  ;;  %v6730_v49 = vrot.slane %v3978_v45, 6  ;;  %v6731_v47 = vrot.slane %v3876_v6, 6  ;;  %v3091_v42 = vrot.slane %v4010_v35, 3 }
  0x7b   :  { %v572_v58 = vsel %vm216_vm4, %v6729_v9, %v571_v5  ;;  %v731_v43 = vadd.f32 %v718_v23, %v696_v2  ;;  %v6732_v55 = vrot.slane %v3991_v26, 7  ;;  %v6733_v4 = vrot.slane %v3884_v18, 7 }
  0x7c   :  { %v603_v1 = vsel %vm252_vm5, %v6731_v47, %v6730_v49  ;;  %v514_v0 = vadd.f32 %v502_v51, %v479_v41  ;;  %v6734_v9 = vrot.slane %v3908_v25, 1  ;;  %v754_v59 = vrot.slane %v4017_v8, 3 }
  0x7d   :  { %v636_v60 = vsel %vm276_vm6, %v6733_v4, %v6732_v55  ;;  %v3051_v47 = vadd.f32 %v3038_v56, %v4017_v8  ;;  %v3092_v49 = vsel %vm144_vm2, %v3089_v3, %v3091_v42  ;;  %v4041_v53 = vmul.f32 0.0033873392, %v3572_v44 }
  0x7e   :  { %v685_v48 = vsel %vm72_vm0, %v682_v37, %v6734_v9  ;;  %v766_v51 = vadd.f32 %v753_v61, %v731_v43  ;;  %v549_v23 = vadd.f32 %v537_v34, %v514_v0  ;;  %v4044_v2 = vadd.f32 %v3092_v49, %v3867_v57 }
  0x7f   :  { %6735 = vst [vmem:[#allocation36_spill] sm:$0xff] %v4041_v53  ;;  %v4047_v4 = vmul.f32 -0.0005810527, %v3478_v28  ;;  %v6738_v41 = vrot.slane %v3908_v25, 2  ;;  %v433_v55 = vrot.slane %v4041_v53, 1  ;;  %v6746_v53 = vrot.slane %v3818_v62, 2 }
  0x80   :  { %6736 = vst [vmem:[#allocation37_spill] sm:$0xff] %v4044_v2  ;;  %v4053_v56 = vmul.f32 -0.0106432345, %v3572_v44  ;;  %v4056_v3 = vmul.f32 0.027250847, %v3572_v44  ;;  %3311 = vst.msk [vmem:[%s6443_s2 + $0x36] sm:$0xff] %vm399_vm8, %v766_v51  ;;  %v584_v57 = vadd.f32 %v572_v58, %v549_v23 }
  0x81   :  { %6737 = vst [vmem:[#allocation38_spill] sm:$0xff] %v4047_v4  ;;  %v3076_v37 = vadd.f32 %v6738_v41, %v3051_v47  ;;  %v4063_v61 = vmul.f32 -0.073541895, %v3572_v44  ;;  %v4066_v34 = vmul.f32 0.97346205, %v3572_v44  ;;  %v434_v43 = vsel %vm72_vm0, %v431_v38, %v433_v55 }
  0x82   :  { %6739 = vst [vmem:[#allocation39_spill] sm:$0xff] %v4053_v56  ;;  %6740 = vst [vmem:[#allocation40_spill] sm:$0xff] %v4056_v3  ;;  %v4069_v8 = vmul.f32 0.11241254, %v3572_v44  ;;  %v468_v0 = vrot.slane %v4053_v56, 2  ;;  %v503_v9 = vrot.slane %v4056_v3, 3  ;;  %v615_v49 = vadd.f32 %v603_v1, %v584_v57 }
  0x83   :  { %6741 = vst [vmem:[#allocation41_spill] sm:$0xff] %v4063_v61  ;;  %6742 = vst [vmem:[#allocation42_spill] sm:$0xff] %v4066_v34  ;;  %v4075_v47 = vmul.f32 -0.047507085, %v3572_v44  ;;  %v445_v58 = vadd.f32 %v434_v43, %v4047_v4  ;;  %v538_v51 = vrot.slane %v4063_v61, 4  ;;  %v573_v23 = vrot.slane %v4066_v34, 5 }
  0x84   :  { %6743 = vst [vmem:[#allocation43_spill] sm:$0xff] %v4069_v8  ;;  %v6745_v41 = vrot.slane %v3924_v50, 2  ;;  %v469_v56 = vsel %vm108_vm1, %v466_v63, %v468_v0  ;;  %v504_v3 = vsel %vm144_vm2, %v501_v46, %v503_v9  ;;  %v604_v2 = vrot.slane %v4069_v8, 6 }
  0x85   :  { %6744 = vst [vmem:[#allocation44_spill] sm:$0xff] %v4075_v47  ;;  %v650_v6 = vadd.f32 %v636_v60, %v615_v49  ;;  %v6747_v1 = vrot.slane %v3927_v24, 3  ;;  %v480_v43 = vadd.f32 %v469_v56, %v445_v58  ;;  %v637_v61 = vrot.slane %v4075_v47, 7 }
  0x86   :  { %v720_v38 = vsel %vm108_vm1, %v6746_v53, %v6745_v41  ;;  %v539_v34 = vsel %vm180_vm3, %v536_v21, %v538_v51  ;;  %v574_v62 = vsel %vm216_vm4, %v571_v5, %v573_v23  ;;  %v657_v53 = vmul.f32 0.02309792, %v3572_v44 }
  0x87   :  { %v755_v57 = vsel %vm144_vm2, %v6747_v1, %v754_v59  ;;  %v4096_v63 = vmul.f32 -0.009739505, %v3620_v33  ;;  %v662_v46 = vadd.f32 %v4010_v35, %v650_v6  ;;  %v515_v41 = vadd.f32 %v504_v3, %v480_v43 }
  0x88   :  { %v4100_v60 = vmul.f32 0.0025730673, %v3620_v33  ;;  %v4103_v24 = vmul.f32 -4.475203e-05, %v3620_v33  ;;  %v6748_v56 = vrot.slane %v3978_v45, 6  ;;  %v3093_v49 = vrot.slane %v657_v53, 3 }
  0x89   :  { %v4110_v58 = vmul.f32 -0.0005810527, %v3572_v44  ;;  %v697_v1 = vadd.f32 %v685_v48, %v662_v46  ;;  %v550_v8 = vadd.f32 %v539_v34, %v515_v41  ;;  %v6750_v3 = vrot.slane %v3991_v26, 7 }
  0x8a   :  { %v605_v21 = vsel %vm252_vm5, %v6748_v56, %v604_v2  ;;  %v721_v6 = vrot.slane %v4100_v60, 2  ;;  %v756_v35 = vrot.slane %v4103_v24, 3  ;;  %v3094_v45 = vsel %vm144_vm2, %v3091_v42, %v3093_v49 }
  0x8b   :  { %6749 = vst [vmem:[#allocation45_spill] sm:$0xff] %v4110_v58  ;;  %v638_v43 = vsel %vm276_vm6, %v6750_v3, %v637_v61  ;;  %v4118_v4 = vadd.f32 %v3093_v49, %v3076_v37  ;;  %v446_v56 = vadd.f32 %v433_v55, %v4110_v58  ;;  %v732_v5 = vadd.f32 %v720_v38, %v697_v1 }
  0x8c   :  { %v585_v39 = vadd.f32 %v574_v62, %v550_v8  ;;  %v6752_v54 = vrot.slane %v4096_v63, 1  ;;  %v6753_v48 = vrot.slane %v3908_v25, 1  ;;  %v6754_v46 = vrot.slane %v3924_v50, 2 }
  0x8d   :  { %6751 = vst [vmem:[#allocation46_spill] sm:$0xff] %v4118_v4  ;;  %v757_v42 = vsel %vm144_vm2, %v754_v59, %v756_v35  ;;  %v4135_v37 = vadd.f32 %v3094_v45, %v3966_v15  ;;  %v481_v55 = vadd.f32 %v468_v0, %v446_v56  ;;  %v623_v8 = vmul.f32 -0.047507085, %v3620_v33 }
  0x8e   :  { %v687_v34 = vsel %vm72_vm0, %v6753_v48, %v6752_v54  ;;  %v722_v41 = vsel %vm108_vm1, %v6754_v46, %v721_v6  ;;  %v767_v38 = vadd.f32 %v755_v57, %v732_v5  ;;  %v616_v25 = vadd.f32 %v605_v21, %v585_v39 }
  0x8f   :  { %6755 = vst [vmem:[#allocation47_spill] sm:$0xff] %v4135_v37  ;;  %v658_v54 = vmul.f32 0.02309792, %v3620_v33  ;;  %v779_v62 = vmul.f32 -0.0013430684, %v3396_v10  ;;  %v516_v49 = vadd.f32 %v503_v9, %v481_v55  ;;  %v639_v50 = vrot.slane %v623_v8, 7 }
  0x90   :  { %v785_v1 = vmul.f32 0.007762679, %v3396_v10  ;;  %v4142_v3 = vmul.f32 0.007762679, %v3398_v11  ;;  %3312 = vst.msk [vmem:[%s6443_s2 + $0x3e] sm:$0xff] %vm399_vm8, %v767_v38  ;;  %v651_v59 = vadd.f32 %v638_v43, %v616_v25 }
  0x91   :  { %v820_v15 = vmul.f32 -0.022847652, %v3396_v10  ;;  %v4150_v39 = vmul.f32 -0.022847652, %v3398_v11  ;;  %v855_v45 = vmul.f32 0.054391768, %v3396_v10  ;;  %v551_v0 = vadd.f32 %v538_v51, %v516_v49 }
  0x92   :  { %6756 = vst [vmem:[#allocation48_spill] sm:$0xff] %v4142_v3  ;;  %v640_v9 = vsel %vm276_vm6, %v637_v61, %v639_v50  ;;  %v797_v57 = vrot.slane %v785_v1, 1  ;;  %v6482_v21 = vrot.slane %v4142_v3, 1  ;;  %v663_v5 = vadd.f32 %v657_v53, %v651_v59 }
  0x93   :  { %6757 = vst [vmem:[#allocation49_spill] sm:$0xff] %v4150_v39  ;;  %v832_v56 = vrot.slane %v820_v15, 2  ;;  %v6481_v48 = vrot.slane %v4150_v39, 2  ;;  %v4157_v46 = vmul.f32 0.054391768, %v3398_v11  ;;  %v586_v43 = vadd.f32 %v573_v23, %v551_v0 }
  0x94   :  { %v799_v55 = vsel %vm72_vm0, %v797_v57, %v6482_v21  ;;  %v867_v8 = vrot.slane %v855_v45, 3  ;;  %v890_v51 = vmul.f32 -0.13388182, %v3396_v10  ;;  %v698_v38 = vadd.f32 %v687_v34, %v663_v5 }
  0x95   :  { %6758 = vst [vmem:[#allocation50_spill] sm:$0xff] %v4157_v46  ;;  %v814_v61 = vadd.f32 %v799_v55, %v779_v62  ;;  %v834_v53 = vsel %vm108_vm1, %v832_v56, %v6481_v48  ;;  %v6477_v25 = vrot.slane %v4157_v46, 3  ;;  %v617_v49 = vadd.f32 %v604_v2, %v586_v43 }
  0x96   :  { %v4168_v50 = vmul.f32 -0.13388182, %v3398_v11  ;;  %v902_v23 = vrot.slane %v890_v51, 4  ;;  %v925_v1 = vmul.f32 0.92489105, %v3396_v10  ;;  %v733_v59 = vadd.f32 %v722_v41, %v698_v38 }
  0x97   :  { %v849_v15 = vadd.f32 %v834_v53, %v814_v61  ;;  %v869_v34 = vsel %vm144_vm2, %v867_v8, %v6477_v25  ;;  %v4175_v62 = vmul.f32 0.92489105, %v3398_v11  ;;  %v652_v45 = vadd.f32 %v640_v9, %v617_v49 }
  0x98   :  { %6759 = vst [vmem:[#allocation51_spill] sm:$0xff] %v4168_v50  ;;  %v6476_v0 = vrot.slane %v4168_v50, 4  ;;  %v937_v2 = vrot.slane %v925_v1, 5  ;;  %v4179_v57 = vmul.f32 0.23163672, %v3398_v11  ;;  %v768_v5 = vadd.f32 %v757_v42, %v733_v59 }
  0x99   :  { %6760 = vst [vmem:[#allocation52_spill] sm:$0xff] %v4175_v62  ;;  %v884_v56 = vadd.f32 %v869_v34, %v849_v15  ;;  %v6474_v41 = vrot.slane %v4175_v62, 5  ;;  %v4183_v43 = vmul.f32 -0.089232184, %v3398_v11  ;;  %v664_v55 = vadd.f32 %v658_v54, %v652_v45 }
  0x9a   :  { %6761 = vst [vmem:[#allocation53_spill] sm:$0xff] %v4179_v57  ;;  %v904_v8 = vsel %vm180_vm3, %v902_v23, %v6476_v0  ;;  %v6475_v9 = vrot.slane %v4179_v57, 6  ;;  %v4190_v51 = vmul.f32 0.041765854, %v3398_v11  ;;  %3313 = vst.msk [vmem:[%s6443_s2 + $0x46] sm:$0xff] %vm399_vm8, %v768_v5  ;;  %v6763_v53 = vrot.slane %v4096_v63, 1 }
  0x9b   :  { %6762 = vst [vmem:[#allocation54_spill] sm:$0xff] %v4183_v43  ;;  %v919_v42 = vadd.f32 %v904_v8, %v884_v56  ;;  %v939_v38 = vsel %vm216_vm4, %v937_v2, %v6474_v41  ;;  %v6480_v54 = vrot.slane %v4183_v43, 7  ;;  %v1038_v61 = vmul.f32 -0.017415093, %v3398_v11 }
  0x9c   :  { %v699_v49 = vadd.f32 %v6763_v53, %v664_v55  ;;  %v4204_v23 = vmul.f32 -0.017415093, %v3400_v12  ;;  %v4207_v1 = vmul.f32 -0.017415093, %v3402_v13  ;;  %v1073_v59 = vmul.f32 0.004799604, %v3398_v11 }
  0x9d   :  { %v954_v15 = vadd.f32 %v939_v38, %v919_v42  ;;  %v1050_v34 = vrot.slane %v1038_v61, 1  ;;  %v4211_v45 = vmul.f32 0.004799604, %v3400_v12  ;;  %v4214_v2 = vmul.f32 0.004799604, %v3402_v13 }
  0x9e   :  { %v734_v63 = vadd.f32 %v721_v6, %v699_v49  ;;  %v6479_v5 = vrot.slane %v4204_v23, 1  ;;  %v1085_v56 = vrot.slane %v1073_v59, 2  ;;  %v1108_v55 = vmul.f32 -0.00018116256, %v3398_v11 }
  0x9f   :  { %v985_v8 = vadd.f32 %v6475_v9, %v954_v15  ;;  %v6478_v42 = vrot.slane %v4211_v45, 2  ;;  %v4224_v38 = vmul.f32 -0.00018116256, %v3400_v12  ;;  %v2755_v53 = vmul.f32 -0.00018116256, %v3396_v10 }
  0xa0   :  { %v769_v41 = vadd.f32 %v756_v35, %v734_v63  ;;  %v1052_v60 = vsel %vm72_vm0, %v1050_v34, %v6479_v5  ;;  %v1120_v6 = vrot.slane %v1108_v55, 3  ;;  %v2756_v49 = vmul.f32 0.004799604, %v3396_v10 }
  0xa1   :  { %v1020_v15 = vadd.f32 %v6480_v54, %v985_v8  ;;  %v1087_v9 = vsel %vm108_vm1, %v1085_v56, %v6478_v42  ;;  %v6484_v0 = vrot.slane %v4224_v38, 3  ;;  %v2759_v25 = vrot.slane %v1073_v59, 1 }
  0xa2   :  { %3314 = vst.msk [vmem:[%s6443_s2 + $0x4e] sm:$0x3] %vm777_vm11, %v769_v41  ;;  %v2758_v24 = vrot.slane %v2756_v49, 1  ;;  %v2761_v35 = vrot.slane %v4211_v45, 1  ;;  %v6486_v34 = vrot.slane %v4214_v2, 1  ;;  %v2784_v42 = vrot.slane %v1038_v61, 2 }
  0xa3   :  { %v2781_v63 = vmul.f32 -0.017415093, %v3396_v10  ;;  %v1032_v8 = vadd.f32 %v4190_v51, %v1020_v15  ;;  %v1122_v56 = vsel %vm144_vm2, %v1120_v6, %v6484_v0  ;;  %v2786_v59 = vrot.slane %v4204_v23, 2 }
  0xa4   :  { %v2760_v5 = vsel %vm72_vm0, %v2758_v24, %v2759_v25  ;;  %v2762_v41 = vsel %vm72_vm0, %v2759_v25, %v2761_v35  ;;  %v2764_v49 = vsel %vm72_vm0, %v2761_v35, %v6486_v34  ;;  %v2788_v6 = vrot.slane %v4207_v1, 2 }
  0xa5   :  { %v2783_v54 = vrot.slane %v2781_v63, 2  ;;  %v1067_v48 = vadd.f32 %v1052_v60, %v1032_v8  ;;  %v2775_v21 = vadd.f32 %v2760_v5, %v2755_v53  ;;  %v2776_v4 = vadd.f32 %v2762_v41, %v1108_v55 }
  0xa6   :  { %v2777_v15 = vadd.f32 %v2764_v49, %v4224_v38  ;;  %v2787_v61 = vsel %vm108_vm1, %v2784_v42, %v2786_v59  ;;  %v2806_v24 = vmul.f32 0.041765854, %v3396_v10  ;;  %v2814_v27 = vrot.slane %v4190_v51, 3 }
  0xa7   :  { %v2785_v58 = vsel %vm108_vm1, %v2783_v54, %v2784_v42  ;;  %v1102_v0 = vadd.f32 %v1087_v9, %v1067_v48  ;;  %v2801_v37 = vadd.f32 %v2787_v61, %v2776_v4  ;;  %v2789_v55 = vsel %vm108_vm1, %v2786_v59, %v2788_v6 }
  0xa8   :  { %v2800_v25 = vadd.f32 %v2785_v58, %v2775_v21  ;;  %v2813_v53 = vrot.slane %v2806_v24, 3  ;;  %v4265_v54 = vadd.f32 %v2789_v55, %v2777_v15  ;;  %v4268_v42 = vmul.f32 -0.0013430684, %v3398_v11 }
  0xa9   :  { %v1137_v60 = vadd.f32 %v1122_v56, %v1102_v0  ;;  %v4271_v63 = vmul.f32 0.007762679, %v3400_v12  ;;  %v4275_v58 = vmul.f32 -0.022847652, %v3400_v12  ;;  %v4278_v21 = vmul.f32 0.054391768, %v3400_v12 }
  0xaa   :  { %6764 = vst [vmem:[#allocation55_spill] sm:$0xff] %v4268_v42  ;;  %v2815_v4 = vsel %vm144_vm2, %v2813_v53, %v2814_v27  ;;  %v4281_v48 = vmul.f32 -0.13388182, %v3400_v12  ;;  %v4292_v8 = vmul.f32 0.92489105, %v3400_v12  ;;  %v6772_v15 = vrot.slane %v4142_v3, 1 }
  0xab   :  { %6765 = vst [vmem:[#allocation56_spill] sm:$0xff] %v4271_v63  ;;  %6766 = vst [vmem:[#allocation57_spill] sm:$0xff] %v4275_v58  ;;  %v4288_v9 = vadd.f32 %v2815_v4, %v2800_v25  ;;  %v800_v51 = vrot.slane %v4271_v63, 1  ;;  %v835_v56 = vrot.slane %v4275_v58, 2  ;;  %v870_v59 = vrot.slane %v4278_v21, 3 }
  0xac   :  { %6767 = vst [vmem:[#allocation58_spill] sm:$0xff] %v4278_v21  ;;  %6768 = vst [vmem:[#allocation59_spill] sm:$0xff] %v4281_v48  ;;  %v4298_v49 = vmul.f32 0.23163672, %v3400_v12  ;;  %v4305_v25 = vmul.f32 -0.089232184, %v3400_v12 }
  0xad   :  { %3315 = vst.msk [vmem:[%s6443_s2 + $0x4e] sm:$0xfc] %vm771_vm10, %v1137_v60  ;;  %6769 = vst [vmem:[#allocation60_spill] sm:$0xff] %v4288_v9  ;;  %v801_v61 = vsel %vm72_vm0, %v6772_v15, %v800_v51  ;;  %v4308_v55 = vmul.f32 0.041765854, %v3400_v12  ;;  %v6774_v4 = vrot.slane %v4150_v39, 2 }
  0xae   :  { %6770 = vst [vmem:[#allocation61_spill] sm:$0xff] %v4292_v8  ;;  %6771 = vst [vmem:[#allocation62_spill] sm:$0xff] %v4298_v49  ;;  %v815_v60 = vadd.f32 %v801_v61, %v4268_v42  ;;  %v971_v5 = vrot.slane %v4298_v49, 6  ;;  %v6775_v35 = vrot.slane %v4157_v46, 3  ;;  %v4322_v41 = vmul.f32 -0.017415093, %v3478_v28 }
  0xaf   :  { %6773 = vst [vmem:[#allocation63_spill] sm:$0xff] %v4305_v25  ;;  %v836_v0 = vsel %vm108_vm1, %v6774_v4, %v835_v56  ;;  %v6776_v26 = vrot.slane %v4281_v48, 4  ;;  %v6777_v4 = vrot.slane %v4168_v50, 4  ;;  %v4331_v15 = vmul.f32 0.004799604, %v3478_v28 }
  0xb0   :  { %v871_v34 = vsel %vm144_vm2, %v6775_v35, %v870_v59  ;;  %v850_v61 = vadd.f32 %v836_v0, %v815_v60  ;;  %v6778_v19 = vrot.slane %v4292_v8, 5  ;;  %v6779_v35 = vrot.slane %v4175_v62, 5 }
  0xb1   :  { %v906_v18 = vsel %vm180_vm3, %v6777_v4, %v6776_v26  ;;  %v4339_v14 = vmul.f32 -0.00018116256, %v3402_v13  ;;  %v2790_v0 = vrot.slane %v4322_v41, 2  ;;  %v6502_v60 = vrot.slane %v4308_v55, 3 }
  0xb2   :  { %v941_v24 = vsel %vm216_vm4, %v6779_v35, %v6778_v19  ;;  %v885_v53 = vadd.f32 %v871_v34, %v850_v61  ;;  %v6780_v7 = vrot.slane %v4179_v57, 6  ;;  %v2765_v36 = vrot.slane %v4331_v15, 1 }
  0xb3   :  { %v6781_v22 = vrot.slane %v4305_v25, 7  ;;  %v6782_v19 = vrot.slane %v4183_v43, 7  ;;  %v2791_v30 = vsel %vm108_vm1, %v2788_v6, %v2790_v0  ;;  %v2817_v34 = vsel %vm144_vm2, %v2814_v27, %v6502_v60 }
  0xb4   :  { %v972_v26 = vsel %vm252_vm5, %v6780_v7, %v971_v5  ;;  %v920_v61 = vadd.f32 %v906_v18, %v885_v53  ;;  %v6783_v4 = vrot.slane %v4214_v2, 1  ;;  %v4362_v52 = vadd.f32 %v2817_v34, %v2801_v37 }
  0xb5   :  { %v1005_v35 = vsel %vm276_vm6, %v6782_v19, %v6781_v22  ;;  %v4366_v22 = vmul.f32 -0.0013430684, %v3400_v12  ;;  %v4369_v6 = vmul.f32 0.007762679, %v3402_v13  ;;  %v4372_v19 = vmul.f32 -0.022847652, %v3402_v13 }
  0xb6   :  { %v2766_v16 = vsel %vm72_vm0, %v6783_v4, %v2765_v36  ;;  %6784 = vst [vmem:[#allocation64_spill] sm:$0xff] %v4362_v52  ;;  %v955_v27 = vadd.f32 %v941_v24, %v920_v61  ;;  %v4375_v18 = vmul.f32 0.054391768, %v3402_v13  ;;  %v4378_v53 = vmul.f32 -0.13388182, %v3402_v13 }
  0xb7   :  { %v2778_v31 = vadd.f32 %v2766_v16, %v4339_v14  ;;  %6785 = vst [vmem:[#allocation65_spill] sm:$0xff] %v4366_v22  ;;  %6786 = vst [vmem:[#allocation66_spill] sm:$0xff] %v4369_v6  ;;  %v4381_v37 = vmul.f32 0.92489105, %v3402_v13  ;;  %v6505_v4 = vrot.slane %v4369_v6, 1  ;;  %v6506_v34 = vrot.slane %v4372_v19, 2 }
  0xb8   :  { %6787 = vst [vmem:[#allocation67_spill] sm:$0xff] %v4372_v19  ;;  %6788 = vst [vmem:[#allocation68_spill] sm:$0xff] %v4375_v18  ;;  %v4388_v60 = vmul.f32 0.23163672, %v3402_v13  ;;  %v986_v7 = vadd.f32 %v972_v26, %v955_v27  ;;  %v4401_v29 = vmul.f32 -0.089232184, %v3402_v13 }
  0xb9   :  { %6789 = vst [vmem:[#allocation69_spill] sm:$0xff] %v4378_v53  ;;  %6790 = vst [vmem:[#allocation70_spill] sm:$0xff] %v4381_v37  ;;  %v4383_v16 = vadd.f32 %v2791_v30, %v2778_v31  ;;  %v803_v17 = vsel %vm72_vm0, %v800_v51, %v6505_v4  ;;  %v838_v31 = vsel %vm108_vm1, %v835_v56, %v6506_v34  ;;  %v6793_v27 = vrot.slane %v4207_v1, 1 }
  0xba   :  { %6791 = vst [vmem:[#allocation71_spill] sm:$0xff] %v4388_v60  ;;  %6792 = vst [vmem:[#allocation72_spill] sm:$0xff] %v4401_v29  ;;  %v1021_v26 = vadd.f32 %v1005_v35, %v986_v7  ;;  %v6794_v61 = vrot.slane %v4204_v23, 1  ;;  %v6795_v24 = vrot.slane %v4214_v2, 2  ;;  %v6796_v51 = vrot.slane %v4211_v45, 2 }
  0xbb   :  { %v816_v56 = vadd.f32 %v803_v17, %v4366_v22  ;;  %v6797_v30 = vrot.slane %v4375_v18, 3  ;;  %v4420_v23 = vmul.f32 0.041765854, %v3402_v13  ;;  %v6799_v45 = vrot.slane %v4224_v38, 3 }
  0xbc   :  { %v1054_v32 = vsel %vm72_vm0, %v6794_v61, %v6793_v27  ;;  %v1089_v4 = vsel %vm108_vm1, %v6796_v51, %v6795_v24  ;;  %v1033_v61 = vadd.f32 %v4308_v55, %v1021_v26  ;;  %v6798_v27 = vrot.slane %v4339_v14, 3 }
  0xbd   :  { %v873_v35 = vsel %vm144_vm2, %v870_v59, %v6797_v30  ;;  %v851_v17 = vadd.f32 %v838_v31, %v816_v56  ;;  %v4429_v51 = vmul.f32 -0.017415093, %v3572_v44  ;;  %v6800_v34 = vrot.slane %v4378_v53, 4 }
  0xbe   :  { %v1124_v24 = vsel %vm144_vm2, %v6799_v45, %v6798_v27  ;;  %v6801_v59 = vrot.slane %v4281_v48, 4  ;;  %v6802_v7 = vrot.slane %v4381_v37, 5  ;;  %v6803_v26 = vrot.slane %v4292_v8, 5 }
  0xbf   :  { %v6804_v38 = vrot.slane %v4388_v60, 6  ;;  %v4445_v31 = vmul.f32 0.004799604, %v3572_v44  ;;  %v1068_v56 = vadd.f32 %v1054_v32, %v1033_v61  ;;  %v886_v45 = vadd.f32 %v873_v35, %v851_v17 }
  0xc0   :  { %v908_v30 = vsel %vm180_vm3, %v6801_v59, %v6800_v34  ;;  %v943_v40 = vsel %vm216_vm4, %v6803_v26, %v6802_v7  ;;  %v4448_v20 = vmul.f32 -0.00018116256, %v3478_v28  ;;  %v6514_v34 = vrot.slane %v4429_v51, 2 }
  0xc1   :  { %v974_v27 = vsel %vm252_vm5, %v971_v5, %v6804_v38  ;;  %v6805_v59 = vrot.slane %v4401_v29, 7  ;;  %v6806_v47 = vrot.slane %v4305_v25, 7  ;;  %v1055_v26 = vrot.slane %v4322_v41, 1 }
  0xc2   :  { %v2767_v5 = vrot.slane %v4445_v31, 1  ;;  %v2818_v38 = vrot.slane %v4420_v23, 3  ;;  %v1103_v21 = vadd.f32 %v1089_v4, %v1068_v56  ;;  %v921_v32 = vadd.f32 %v908_v30, %v886_v45 }
  0xc3   :  { %v1007_v7 = vsel %vm276_vm6, %v6806_v47, %v6805_v59  ;;  %v1090_v35 = vrot.slane %v4331_v15, 2  ;;  %v2793_v61 = vsel %vm108_vm1, %v2790_v0, %v6514_v34  ;;  %v6807_v47 = vrot.slane %v4308_v55, 3 }
  0xc4   :  { %v2768_v46 = vsel %vm72_vm0, %v2765_v36, %v2767_v5  ;;  %v4469_v59 = vmul.f32 -0.0013430684, %v3402_v13  ;;  %v1138_v48 = vadd.f32 %v1124_v24, %v1103_v21  ;;  %v956_v4 = vadd.f32 %v943_v40, %v921_v32 }
  0xc5   :  { %v2819_v41 = vsel %vm144_vm2, %v6807_v47, %v2818_v38  ;;  %v2779_v30 = vadd.f32 %v2768_v46, %v4448_v20  ;;  %v6810_v0 = vrot.slane %v4207_v1, 1  ;;  %v4479_v36 = vmul.f32 0.007762679, %v3478_v28 }
  0xc6   :  { %6808 = vst [vmem:[#allocation73_spill] sm:$0xff] %v4469_v59  ;;  %v4473_v15 = vadd.f32 %v2819_v41, %v4265_v54  ;;  %v4482_v55 = vmul.f32 -0.022847652, %v3478_v28  ;;  %v4485_v45 = vmul.f32 0.054391768, %v3478_v28  ;;  %3316 = vst.msk [vmem:[%s6443_s2 + $0x56] sm:$0xff] %vm399_vm8, %v1138_v48  ;;  %v987_v40 = vadd.f32 %v974_v27, %v956_v4 }
  0xc7   :  { %v1056_v56 = vsel %vm72_vm0, %v6810_v0, %v1055_v26  ;;  %6811 = vst [vmem:[#allocation75_spill] sm:$0xff] %v4479_v36  ;;  %v4491_v46 = vadd.f32 %v2793_v61, %v2779_v30  ;;  %v4494_v1 = vmul.f32 -0.13388182, %v3478_v28  ;;  %v4497_v54 = vmul.f32 0.92489105, %v3478_v28 }
  0xc8   :  { %6809 = vst [vmem:[#allocation74_spill] sm:$0xff] %v4473_v15  ;;  %6812 = vst [vmem:[#allocation76_spill] sm:$0xff] %v4482_v55  ;;  %v804_v21 = vrot.slane %v4479_v36, 1  ;;  %v839_v24 = vrot.slane %v4482_v55, 2  ;;  %v874_v32 = vrot.slane %v4485_v45, 3  ;;  %v1022_v41 = vadd.f32 %v1007_v7, %v987_v40 }
  0xc9   :  { %6813 = vst [vmem:[#allocation77_spill] sm:$0xff] %v4485_v45  ;;  %6814 = vst [vmem:[#allocation78_spill] sm:$0xff] %v4494_v1  ;;  %v4503_v47 = vmul.f32 0.23163672, %v3478_v28  ;;  %v6817_v48 = vrot.slane %v4214_v2, 2  ;;  %v909_v61 = vrot.slane %v4494_v1, 4 }
  0xca   :  { %6815 = vst [vmem:[#allocation79_spill] sm:$0xff] %v4497_v54  ;;  %v944_v4 = vrot.slane %v4497_v54, 5  ;;  %v6818_v30 = vrot.slane %v4369_v6, 1  ;;  %v6819_v34 = vrot.slane %v4372_v19, 2  ;;  %v4518_v7 = vmul.f32 -0.089232184, %v3478_v28 }
  0xcb   :  { %6816 = vst [vmem:[#allocation80_spill] sm:$0xff] %v4503_v47  ;;  %v1091_v27 = vsel %vm108_vm1, %v6817_v48, %v1090_v35  ;;  %v975_v45 = vrot.slane %v4503_v47, 6  ;;  %v1034_v2 = vadd.f32 %v4420_v23, %v1022_v41  ;;  %v6821_v40 = vrot.slane %v4448_v20, 3 }
  0xcc   :  { %v805_v0 = vsel %vm72_vm0, %v6818_v30, %v804_v21  ;;  %v840_v17 = vsel %vm108_vm1, %v6819_v34, %v839_v24  ;;  %6820 = vst [vmem:[#allocation81_spill] sm:$0xff] %v4518_v7  ;;  %v6822_v48 = vrot.slane %v4339_v14, 3  ;;  %v6823_v30 = vrot.slane %v4375_v18, 3 }
  0xcd   :  { %v817_v54 = vadd.f32 %v805_v0, %v4469_v59  ;;  %v6824_v34 = vrot.slane %v4378_v53, 4  ;;  %v1008_v55 = vrot.slane %v4518_v7, 7  ;;  %v4535_v23 = vmul.f32 0.041765854, %v3478_v28 }
  0xce   :  { %v1126_v1 = vsel %vm144_vm2, %v6822_v48, %v6821_v40  ;;  %v875_v36 = vsel %vm144_vm2, %v6823_v30, %v874_v32  ;;  %v6528_v41 = vrot.slane %v4429_v51, 1  ;;  %v1069_v14 = vadd.f32 %v1056_v56, %v1034_v2 }
  0xcf   :  { %v910_v47 = vsel %vm180_vm3, %v6824_v34, %v909_v61  ;;  %v852_v15 = vadd.f32 %v840_v17, %v817_v54  ;;  %v6527_v40 = vrot.slane %v4445_v31, 2  ;;  %v4540_v0 = vmul.f32 -0.00018116256, %v3572_v44 }
  0xd0   :  { %v6825_v48 = vrot.slane %v4381_v37, 5  ;;  %v6826_v34 = vrot.slane %v4388_v60, 6  ;;  %v6827_v53 = vrot.slane %v4401_v29, 7  ;;  %v2820_v56 = vrot.slane %v4535_v23, 3 }
  0xd1   :  { %v1104_v17 = vadd.f32 %v1091_v27, %v1069_v14  ;;  %v887_v54 = vadd.f32 %v875_v36, %v852_v15  ;;  %v1058_v2 = vsel %vm72_vm0, %v1055_v26, %v6528_v41  ;;  %v1127_v37 = vrot.slane %v4540_v0, 3 }
  0xd2   :  { %v945_v30 = vsel %vm216_vm4, %v6825_v48, %v944_v4  ;;  %v976_v18 = vsel %vm252_vm5, %v6826_v34, %v975_v45  ;;  %v1009_v59 = vsel %vm276_vm6, %v6827_v53, %v1008_v55  ;;  %v1093_v48 = vsel %vm108_vm1, %v1090_v35, %v6527_v40 }
  0xd3   :  { %v2780_v34 = vadd.f32 %v2767_v5, %v4540_v0  ;;  %v2821_v60 = vsel %vm144_vm2, %v2818_v38, %v2820_v56  ;;  %v4562_v53 = vmul.f32 0.007762679, %v3572_v44  ;;  %v1139_v6 = vadd.f32 %v1126_v1, %v1104_v17 }
  0xd4   :  { %v922_v27 = vadd.f32 %v910_v47, %v887_v54  ;;  %v4565_v15 = vadd.f32 %v2821_v60, %v4383_v16  ;;  %v4568_v26 = vmul.f32 -0.0013430684, %v3478_v28  ;;  %v6831_v36 = vrot.slane %v4429_v51, 2 }
  0xd5   :  { %6828 = vst [vmem:[#allocation82_spill] sm:$0xff] %v4562_v53  ;;  %v806_v14 = vrot.slane %v4562_v53, 1  ;;  %v4574_v5 = vmul.f32 -0.022847652, %v3572_v44  ;;  %v4577_v38 = vmul.f32 0.054391768, %v3572_v44 }
  0xd6   :  { %6829 = vst [vmem:[#allocation83_spill] sm:$0xff] %v4565_v15  ;;  %6830 = vst [vmem:[#allocation84_spill] sm:$0xff] %v4568_v26  ;;  %v2805_v35 = vadd.f32 %v6831_v36, %v2780_v34  ;;  %v957_v60 = vadd.f32 %v945_v30, %v922_v27  ;;  %v4584_v16 = vmul.f32 -0.13388182, %v3572_v44  ;;  %v4587_v1 = vmul.f32 0.92489105, %v3572_v44 }
  0xd7   :  { %6832 = vst [vmem:[#allocation85_spill] sm:$0xff] %v4574_v5  ;;  %6833 = vst [vmem:[#allocation86_spill] sm:$0xff] %v4577_v38  ;;  %v4590_v47 = vmul.f32 0.23163672, %v3572_v44  ;;  %v807_v0 = vsel %vm72_vm0, %v804_v21, %v806_v14  ;;  %v841_v17 = vrot.slane %v4574_v5, 2  ;;  %v876_v54 = vrot.slane %v4577_v38, 3 }
  0xd8   :  { %3317 = vst.msk [vmem:[%s6443_s2 + $0x5e] sm:$0xff] %vm399_vm8, %v1139_v6  ;;  %6834 = vst [vmem:[#allocation87_spill] sm:$0xff] %v4584_v16  ;;  %v4596_v34 = vmul.f32 -0.089232184, %v3572_v44  ;;  %v988_v6 = vadd.f32 %v976_v18, %v957_v60  ;;  %v818_v30 = vadd.f32 %v807_v0, %v4568_v26  ;;  %v911_v27 = vrot.slane %v4584_v16, 4 }
  0xd9   :  { %6835 = vst [vmem:[#allocation88_spill] sm:$0xff] %v4587_v1  ;;  %6836 = vst [vmem:[#allocation89_spill] sm:$0xff] %v4590_v47  ;;  %v946_v36 = vrot.slane %v4587_v1, 5  ;;  %v842_v40 = vsel %vm108_vm1, %v839_v24, %v841_v17  ;;  %v877_v41 = vsel %vm144_vm2, %v874_v32, %v876_v54  ;;  %v6533_v21 = vrot.slane %v4590_v47, 6 }
  0xda   :  { %6837 = vst [vmem:[#allocation90_spill] sm:$0xff] %v4596_v34  ;;  %v1010_v53 = vrot.slane %v4596_v34, 7  ;;  %v1023_v5 = vadd.f32 %v1009_v59, %v988_v6  ;;  %v6838_v38 = vrot.slane %v4448_v20, 3  ;;  %v853_v18 = vadd.f32 %v842_v40, %v818_v30 }
  0xdb   :  { %v912_v60 = vsel %vm180_vm3, %v909_v61, %v911_v27  ;;  %v947_v0 = vsel %vm216_vm4, %v944_v4, %v946_v36  ;;  %v978_v24 = vsel %vm252_vm5, %v975_v45, %v6533_v21  ;;  %v1030_v32 = vmul.f32 0.041765854, %v3572_v44 }
  0xdc   :  { %v1128_v15 = vsel %vm144_vm2, %v6838_v38, %v1127_v37  ;;  %v4615_v16 = vmul.f32 -0.017415093, %v3620_v33  ;;  %v1035_v59 = vadd.f32 %v4535_v23, %v1023_v5  ;;  %v888_v6 = vadd.f32 %v877_v41, %v853_v18 }
  0xdd   :  { %v4619_v20 = vmul.f32 0.004799604, %v3620_v33  ;;  %v4622_v40 = vmul.f32 -0.00018116256, %v3620_v33  ;;  %v1011_v61 = vsel %vm276_vm6, %v1008_v55, %v1010_v53  ;;  %v2822_v38 = vrot.slane %v1030_v32, 3 }
  0xde   :  { %v1059_v4 = vrot.slane %v4615_v16, 1  ;;  %v4627_v45 = vmul.f32 -0.0013430684, %v3572_v44  ;;  %v1070_v30 = vadd.f32 %v1058_v2, %v1035_v59  ;;  %v923_v21 = vadd.f32 %v912_v60, %v888_v6 }
  0xdf   :  { %v1094_v1 = vrot.slane %v4619_v20, 2  ;;  %v1129_v23 = vrot.slane %v4622_v40, 3  ;;  %v6840_v41 = vrot.slane %v4429_v51, 1  ;;  %v2823_v55 = vsel %vm144_vm2, %v2820_v56, %v2822_v38 }
  0xe0   :  { %6839 = vst [vmem:[#allocation91_spill] sm:$0xff] %v4627_v45  ;;  %v4637_v18 = vadd.f32 %v2822_v38, %v2805_v35  ;;  %v819_v26 = vadd.f32 %v806_v14, %v4627_v45  ;;  %v1105_v19 = vadd.f32 %v1093_v48, %v1070_v30  ;;  %v958_v8 = vadd.f32 %v947_v0, %v923_v21 }
  0xe1   :  { %v1060_v5 = vsel %vm72_vm0, %v6840_v41, %v1059_v4  ;;  %v6842_v2 = vrot.slane %v4445_v31, 2  ;;  %v1130_v51 = vsel %vm144_vm2, %v1127_v37, %v1129_v23  ;;  %v4649_v59 = vadd.f32 %v2823_v55, %v4491_v46 }
  0xe2   :  { %6841 = vst [vmem:[#allocation92_spill] sm:$0xff] %v4637_v18  ;;  %v854_v56 = vadd.f32 %v841_v17, %v819_v26  ;;  %v996_v35 = vmul.f32 -0.089232184, %v3620_v33  ;;  %v1031_v14 = vmul.f32 0.041765854, %v3620_v33  ;;  %v1140_v48 = vadd.f32 %v1128_v15, %v1105_v19 }
  0xe3   :  { %v1095_v60 = vsel %vm108_vm1, %v6842_v2, %v1094_v1  ;;  %6843 = vst [vmem:[#allocation93_spill] sm:$0xff] %v4649_v59  ;;  %v989_v21 = vadd.f32 %v978_v24, %v958_v8  ;;  %v1150_v0 = vmul.f32 -0.0016136946, %v3396_v10  ;;  %v1156_v31 = vmul.f32 0.010384526, %v3396_v10 }
  0xe4   :  { %v889_v6 = vadd.f32 %v876_v54, %v854_v56  ;;  %v1012_v38 = vrot.slane %v996_v35, 7  ;;  %v4656_v30 = vmul.f32 0.010384526, %v3398_v11  ;;  %v1191_v37 = vmul.f32 -0.030875737, %v3396_v10  ;;  %3318 = vst.msk [vmem:[%s6443_s2 + $0x66] sm:$0xff] %vm399_vm8, %v1140_v48 }
  0xe5   :  { %v1024_v46 = vadd.f32 %v1011_v61, %v989_v21  ;;  %v1168_v26 = vrot.slane %v1156_v31, 1  ;;  %v4664_v8 = vmul.f32 -0.030875737, %v3398_v11  ;;  %v1226_v19 = vmul.f32 0.07245068, %v3396_v10 }
  0xe6   :  { %6844 = vst [vmem:[#allocation94_spill] sm:$0xff] %v4656_v30  ;;  %v924_v15 = vadd.f32 %v911_v27, %v889_v6  ;;  %v1013_v17 = vsel %vm276_vm6, %v1010_v53, %v1012_v38  ;;  %v6547_v54 = vrot.slane %v4656_v30, 1  ;;  %v1203_v24 = vrot.slane %v1191_v37, 2 }
  0xe7   :  { %6845 = vst [vmem:[#allocation95_spill] sm:$0xff] %v4664_v8  ;;  %v1036_v41 = vadd.f32 %v1030_v32, %v1024_v46  ;;  %v6545_v55 = vrot.slane %v4664_v8, 2  ;;  %v4671_v2 = vmul.f32 0.07245068, %v3398_v11  ;;  %v1238_v56 = vrot.slane %v1226_v19, 3 }
  0xe8   :  { %v959_v61 = vadd.f32 %v946_v36, %v924_v15  ;;  %v1170_v35 = vsel %vm72_vm0, %v1168_v26, %v6547_v54  ;;  %v1261_v48 = vmul.f32 -0.17105956, %v3396_v10  ;;  %v4678_v27 = vmul.f32 -0.17105956, %v3398_v11 }
  0xe9   :  { %6846 = vst [vmem:[#allocation96_spill] sm:$0xff] %v4671_v2  ;;  %v1071_v53 = vadd.f32 %v1060_v5, %v1036_v41  ;;  %v1185_v21 = vadd.f32 %v1170_v35, %v1150_v0  ;;  %v1205_v32 = vsel %vm108_vm1, %v1203_v24, %v6545_v55  ;;  %v6540_v31 = vrot.slane %v4671_v2, 3 }
  0xea   :  { %6847 = vst [vmem:[#allocation97_spill] sm:$0xff] %v4678_v27  ;;  %v6848_v6 = vrot.slane %v4590_v47, 6  ;;  %v1273_v38 = vrot.slane %v1261_v48, 4  ;;  %v6539_v37 = vrot.slane %v4678_v27, 4  ;;  %v1296_v46 = vmul.f32 0.8473343, %v3396_v10 }
  0xeb   :  { %v1106_v26 = vadd.f32 %v1095_v60, %v1071_v53  ;;  %v1220_v19 = vadd.f32 %v1205_v32, %v1185_v21  ;;  %v1240_v5 = vsel %vm144_vm2, %v1238_v56, %v6540_v31  ;;  %v4692_v0 = vmul.f32 0.8473343, %v3398_v11 }
  0xec   :  { %v990_v36 = vadd.f32 %v6848_v6, %v959_v61  ;;  %v1275_v24 = vsel %vm180_vm3, %v1273_v38, %v6539_v37  ;;  %v1308_v41 = vrot.slane %v1296_v46, 5  ;;  %v4698_v61 = vmul.f32 0.36150613, %v3398_v11 }
  0xed   :  { %6849 = vst [vmem:[#allocation98_spill] sm:$0xff] %v4692_v0  ;;  %v1141_v35 = vadd.f32 %v1130_v51, %v1106_v26  ;;  %v1255_v48 = vadd.f32 %v1240_v5, %v1220_v19  ;;  %v6538_v60 = vrot.slane %v4692_v0, 5  ;;  %v4702_v53 = vmul.f32 -0.1285575, %v3398_v11 }
  0xee   :  { %v1025_v15 = vadd.f32 %v1013_v17, %v990_v36  ;;  %6850 = vst [vmem:[#allocation99_spill] sm:$0xff] %v4698_v61  ;;  %v6544_v21 = vrot.slane %v4698_v61, 6  ;;  %v4706_v17 = vmul.f32 0.059048656, %v3398_v11  ;;  %v1409_v32 = vmul.f32 -0.024740089, %v3398_v11 }
  0xef   :  { %6851 = vst [vmem:[#allocation100_spill] sm:$0xff] %v4702_v53  ;;  %3319 = vst.msk [vmem:[%s6443_s2 + $0x6e] sm:$0xff] %vm399_vm8, %v1141_v35  ;;  %v1290_v51 = vadd.f32 %v1275_v24, %v1255_v48  ;;  %v1310_v6 = vsel %vm216_vm4, %v1308_v41, %v6538_v60  ;;  %v6542_v36 = vrot.slane %v4702_v53, 7  ;;  %v4723_v46 = vmul.f32 -0.024740089, %v3402_v13 }
  0xf0   :  { %v1037_v56 = vadd.f32 %v1031_v14, %v1025_v15  ;;  %v4718_v14 = vmul.f32 -0.024740089, %v3400_v12  ;;  %v1421_v26 = vrot.slane %v1409_v32, 1  ;;  %v1444_v19 = vmul.f32 0.0071633775, %v3398_v11 }
  0xf1   :  { %v1325_v5 = vadd.f32 %v1310_v6, %v1290_v51  ;;  %v4728_v24 = vmul.f32 0.0071633775, %v3400_v12  ;;  %v4731_v41 = vmul.f32 0.0071633775, %v3402_v13  ;;  %v4737_v48 = vmul.f32 -0.00043812688, %v3400_v12 }
  0xf2   :  { %v1072_v38 = vadd.f32 %v1059_v4, %v1037_v56  ;;  %v6541_v15 = vrot.slane %v4718_v14, 1  ;;  %v1456_v16 = vrot.slane %v1444_v19, 2  ;;  %v1479_v4 = vmul.f32 -0.00043812688, %v3398_v11 }
  0xf3   :  { %v1356_v56 = vadd.f32 %v6544_v21, %v1325_v5  ;;  %v6543_v6 = vrot.slane %v4728_v24, 2  ;;  %v2484_v60 = vmul.f32 -0.00043812688, %v3396_v10  ;;  %v2485_v37 = vmul.f32 0.0071633775, %v3396_v10 }
  0xf4   :  { %v1107_v35 = vadd.f32 %v1094_v1, %v1072_v38  ;;  %v1423_v51 = vsel %vm72_vm0, %v1421_v26, %v6541_v15  ;;  %v1491_v20 = vrot.slane %v1479_v4, 3  ;;  %v6546_v38 = vrot.slane %v4737_v48, 3 }
  0xf5   :  { %v1391_v31 = vadd.f32 %v6542_v36, %v1356_v56  ;;  %v1458_v5 = vsel %vm108_vm1, %v1456_v16, %v6543_v6  ;;  %v2488_v26 = vrot.slane %v1444_v19, 1  ;;  %v2490_v15 = vrot.slane %v4728_v24, 1 }
  0xf6   :  { %v1142_v1 = vadd.f32 %v1129_v23, %v1107_v35  ;;  %v1493_v40 = vsel %vm144_vm2, %v1491_v20, %v6546_v38  ;;  %v2487_v23 = vrot.slane %v2485_v37, 1  ;;  %v6550_v35 = vrot.slane %v4731_v41, 1 }
  0xf7   :  { %v2510_v56 = vmul.f32 -0.024740089, %v3396_v10  ;;  %v1403_v36 = vadd.f32 %v4706_v17, %v1391_v31  ;;  %v2491_v19 = vsel %vm72_vm0, %v2488_v26, %v2490_v15  ;;  %v2513_v16 = vrot.slane %v1409_v32, 2 }
  0xf8   :  { %3320 = vst.msk [vmem:[%s6443_s2 + $0x76] sm:$0x3] %vm777_vm11, %v1142_v1  ;;  %v2515_v6 = vrot.slane %v4718_v14, 2  ;;  %v2489_v21 = vsel %vm72_vm0, %v2487_v23, %v2488_v26  ;;  %v2493_v1 = vsel %vm72_vm0, %v2490_v15, %v6550_v35  ;;  %v2505_v55 = vadd.f32 %v2491_v19, %v1479_v4 }
  0xf9   :  { %v2512_v20 = vrot.slane %v2510_v56, 2  ;;  %v1438_v37 = vadd.f32 %v1423_v51, %v1403_v36  ;;  %v2504_v38 = vadd.f32 %v2489_v21, %v2484_v60  ;;  %v2506_v54 = vadd.f32 %v2493_v1, %v4737_v48 }
  0xfa   :  { %v2516_v18 = vsel %vm108_vm1, %v2513_v16, %v2515_v6  ;;  %v2517_v32 = vrot.slane %v4723_v46, 2  ;;  %v2535_v59 = vmul.f32 0.059048656, %v3396_v10  ;;  %v2543_v15 = vrot.slane %v4706_v17, 3 }
  0xfb   :  { %v2514_v31 = vsel %vm108_vm1, %v2512_v20, %v2513_v16  ;;  %v2530_v47 = vadd.f32 %v2516_v18, %v2505_v55  ;;  %v1473_v23 = vadd.f32 %v1458_v5, %v1438_v37  ;;  %v4782_v4 = vmul.f32 -0.0016136946, %v3398_v11 }
  0xfc   :  { %v2529_v45 = vadd.f32 %v2514_v31, %v2504_v38  ;;  %v2518_v60 = vsel %vm108_vm1, %v2515_v6, %v2517_v32  ;;  %v2542_v21 = vrot.slane %v2535_v59, 3  ;;  %v4787_v18 = vmul.f32 0.010384526, %v3400_v12 }
  0xfd   :  { %6852 = vst [vmem:[#allocation101_spill] sm:$0xff] %v4782_v4  ;;  %v1508_v51 = vadd.f32 %v1493_v40, %v1473_v23  ;;  %v4784_v56 = vadd.f32 %v2518_v60, %v2506_v54  ;;  %v4790_v55 = vmul.f32 -0.030875737, %v3400_v12  ;;  %v4794_v17 = vmul.f32 0.07245068, %v3400_v12 }
  0xfe   :  { %6853 = vst [vmem:[#allocation102_spill] sm:$0xff] %v4787_v18  ;;  %v2544_v38 = vsel %vm144_vm2, %v2542_v21, %v2543_v15  ;;  %v4797_v6 = vmul.f32 -0.17105956, %v3400_v12  ;;  %v4800_v59 = vmul.f32 0.8473343, %v3400_v12  ;;  %v1171_v40 = vrot.slane %v4787_v18, 1 }
  0xff   :  { %6854 = vst [vmem:[#allocation103_spill] sm:$0xff] %v4790_v55  ;;  %6855 = vst [vmem:[#allocation104_spill] sm:$0xff] %v4794_v17  ;;  %v4807_v5 = vadd.f32 %v2544_v38, %v2529_v45  ;;  %v1206_v19 = vrot.slane %v4790_v55, 2  ;;  %v1241_v16 = vrot.slane %v4794_v17, 3  ;;  %v4815_v37 = vmul.f32 0.36150613, %v3400_v12 }
 0x100   :  { %6856 = vst [vmem:[#allocation105_spill] sm:$0xff] %v4797_v6  ;;  %6857 = vst [vmem:[#allocation106_spill] sm:$0xff] %v4800_v59  ;;  %v6860_v31 = vrot.slane %v4656_v30, 1  ;;  %v6861_v45 = vrot.slane %v4664_v8, 2  ;;  %v4824_v21 = vmul.f32 -0.1285575, %v3400_v12 }
 0x101   :  { %3321 = vst.msk [vmem:[%s6443_s2 + $0x76] sm:$0xfc] %vm771_vm10, %v1508_v51  ;;  %6858 = vst [vmem:[#allocation107_spill] sm:$0xff] %v4807_v5  ;;  %v4827_v51 = vmul.f32 0.059048656, %v3400_v12  ;;  %v6864_v38 = vrot.slane %v4797_v6, 4 }
 0x102   :  { %6859 = vst [vmem:[#allocation108_spill] sm:$0xff] %v4815_v37  ;;  %v1172_v23 = vsel %vm72_vm0, %v6860_v31, %v1171_v40  ;;  %v1207_v60 = vsel %vm108_vm1, %v6861_v45, %v1206_v19  ;;  %6862 = vst [vmem:[#allocation109_spill] sm:$0xff] %v4824_v21  ;;  %v6863_v31 = vrot.slane %v4671_v2, 3  ;;  %v4838_v20 = vmul.f32 -0.024740089, %v3478_v28 }
 0x103   :  { %v1186_v36 = vadd.f32 %v1172_v23, %v4782_v4  ;;  %v6865_v54 = vrot.slane %v4678_v27, 4  ;;  %v4847_v26 = vmul.f32 0.0071633775, %v3478_v28  ;;  %v6867_v45 = vrot.slane %v4692_v0, 5 }
 0x104   :  { %v1242_v35 = vsel %vm144_vm2, %v6863_v31, %v1241_v16  ;;  %v6866_v31 = vrot.slane %v4800_v59, 5  ;;  %v4856_v1 = vmul.f32 -0.00043812688, %v3402_v13  ;;  %v6870_v52 = vrot.slane %v4824_v21, 7 }
 0x105   :  { %v1221_v34 = vadd.f32 %v1207_v60, %v1186_v36  ;;  %v1277_v23 = vsel %vm180_vm3, %v6865_v54, %v6864_v38  ;;  %v2519_v36 = vrot.slane %v4838_v20, 2  ;;  %v6868_v54 = vrot.slane %v4815_v37, 6 }
 0x106   :  { %v1312_v29 = vsel %vm216_vm4, %v6867_v45, %v6866_v31  ;;  %v6869_v38 = vrot.slane %v4698_v61, 6  ;;  %v6871_v25 = vrot.slane %v4702_v53, 7  ;;  %v2494_v31 = vrot.slane %v4847_v26, 1 }
 0x107   :  { %v1256_v49 = vadd.f32 %v1242_v35, %v1221_v34  ;;  %v6872_v22 = vrot.slane %v4723_v46, 1  ;;  %v6873_v42 = vrot.slane %v4718_v14, 1  ;;  %v6874_v35 = vrot.slane %v4731_v41, 2 }
 0x108   :  { %v1343_v7 = vsel %vm252_vm5, %v6869_v38, %v6868_v54  ;;  %v1376_v45 = vsel %vm276_vm6, %v6871_v25, %v6870_v52  ;;  %v6875_v60 = vrot.slane %v4728_v24, 2  ;;  %v2520_v38 = vsel %vm108_vm1, %v2517_v32, %v2519_v36 }
 0x109   :  { %v1425_v34 = vsel %vm72_vm0, %v6873_v42, %v6872_v22  ;;  %v6876_v63 = vrot.slane %v4827_v51, 3  ;;  %v1291_v25 = vadd.f32 %v1277_v23, %v1256_v49  ;;  %v6877_v57 = vrot.slane %v4731_v41, 1 }
 0x10a   :  { %v1460_v54 = vsel %vm108_vm1, %v6875_v60, %v6874_v35  ;;  %v4893_v24 = vmul.f32 0.010384526, %v3402_v13  ;;  %v4896_v32 = vmul.f32 -0.030875737, %v3402_v13  ;;  %v4899_v60 = vmul.f32 0.07245068, %v3402_v13 }
 0x10b   :  { %v2546_v52 = vsel %vm144_vm2, %v2543_v15, %v6876_v63  ;;  %v2495_v14 = vsel %vm72_vm0, %v6877_v57, %v2494_v31  ;;  %v1326_v63 = vadd.f32 %v1312_v29, %v1291_v25  ;;  %v4902_v49 = vmul.f32 -0.0016136946, %v3400_v12 }
 0x10c   :  { %v4889_v42 = vadd.f32 %v2546_v52, %v2530_v47  ;;  %v2507_v22 = vadd.f32 %v2495_v14, %v4856_v1  ;;  %6879 = vst [vmem:[#allocation111_spill] sm:$0xff] %v4893_v24  ;;  %6880 = vst [vmem:[#allocation112_spill] sm:$0xff] %v4896_v32  ;;  %v4905_v15 = vmul.f32 -0.17105956, %v3402_v13  ;;  %v4908_v57 = vmul.f32 0.8473343, %v3402_v13 }
 0x10d   :  { %6881 = vst [vmem:[#allocation113_spill] sm:$0xff] %v4899_v60  ;;  %6882 = vst [vmem:[#allocation114_spill] sm:$0xff] %v4902_v49  ;;  %v1173_v23 = vrot.slane %v4893_v24, 1  ;;  %v6568_v35 = vrot.slane %v4896_v32, 2  ;;  %v1357_v14 = vadd.f32 %v1343_v7, %v1326_v63  ;;  %v4918_v50 = vmul.f32 0.36150613, %v3402_v13 }
 0x10e   :  { %6878 = vst [vmem:[#allocation110_spill] sm:$0xff] %v4889_v42  ;;  %6883 = vst [vmem:[#allocation115_spill] sm:$0xff] %v4905_v15  ;;  %v4910_v47 = vadd.f32 %v2520_v38, %v2507_v22  ;;  %v4926_v3 = vmul.f32 -0.1285575, %v3402_v13  ;;  %v6887_v7 = vrot.slane %v4856_v1, 3  ;;  %v6888_v63 = vrot.slane %v4737_v48, 3 }
 0x10f   :  { %6884 = vst [vmem:[#allocation116_spill] sm:$0xff] %v4908_v57  ;;  %6885 = vst [vmem:[#allocation117_spill] sm:$0xff] %v4918_v50  ;;  %v1174_v9 = vsel %vm72_vm0, %v1171_v40, %v1173_v23  ;;  %v1209_v38 = vsel %vm108_vm1, %v1206_v19, %v6568_v35  ;;  %v1392_v52 = vadd.f32 %v1376_v45, %v1357_v14  ;;  %v6889_v58 = vrot.slane %v4899_v60, 3 }
 0x110   :  { %6886 = vst [vmem:[#allocation118_spill] sm:$0xff] %v4926_v3  ;;  %v1495_v29 = vsel %vm144_vm2, %v6888_v63, %v6887_v7  ;;  %v1187_v25 = vadd.f32 %v1174_v9, %v4902_v49  ;;  %v4940_v22 = vmul.f32 0.059048656, %v3402_v13  ;;  %v4943_v45 = vmul.f32 -0.024740089, %v3572_v44 }
 0x111   :  { %v1244_v19 = vsel %vm144_vm2, %v1241_v16, %v6889_v58  ;;  %v1404_v48 = vadd.f32 %v4827_v51, %v1392_v52  ;;  %v4948_v9 = vmul.f32 0.0071633775, %v3572_v44  ;;  %v6890_v63 = vrot.slane %v4905_v15, 4 }
 0x112   :  { %v1222_v14 = vadd.f32 %v1209_v38, %v1187_v25  ;;  %v6891_v58 = vrot.slane %v4797_v6, 4  ;;  %v6892_v35 = vrot.slane %v4908_v57, 5  ;;  %v6893_v40 = vrot.slane %v4800_v59, 5 }
 0x113   :  { %v4961_v52 = vmul.f32 -0.00043812688, %v3478_v28  ;;  %v6577_v25 = vrot.slane %v4943_v45, 2  ;;  %v1439_v38 = vadd.f32 %v1425_v34, %v1404_v48  ;;  %v6894_v43 = vrot.slane %v4918_v50, 6 }
 0x114   :  { %v1279_v16 = vsel %vm180_vm3, %v6891_v58, %v6890_v63  ;;  %v1314_v39 = vsel %vm216_vm4, %v6893_v40, %v6892_v35  ;;  %v1257_v7 = vadd.f32 %v1244_v19, %v1222_v14  ;;  %v6895_v62 = vrot.slane %v4815_v37, 6 }
 0x115   :  { %v2496_v63 = vrot.slane %v4948_v9, 1  ;;  %v6896_v58 = vrot.slane %v4926_v3, 7  ;;  %v6897_v2 = vrot.slane %v4824_v21, 7  ;;  %v2522_v34 = vsel %vm108_vm1, %v2519_v36, %v6577_v25 }
 0x116   :  { %v1345_v17 = vsel %vm252_vm5, %v6895_v62, %v6894_v43  ;;  %v2547_v19 = vrot.slane %v4940_v22, 3  ;;  %v1474_v48 = vadd.f32 %v1460_v54, %v1439_v38  ;;  %v1292_v14 = vadd.f32 %v1279_v16, %v1257_v7 }
 0x117   :  { %v1378_v35 = vsel %vm276_vm6, %v6897_v2, %v6896_v58  ;;  %v6898_v62 = vrot.slane %v4838_v20, 1  ;;  %v6899_v43 = vrot.slane %v4723_v46, 1  ;;  %v2497_v6 = vsel %vm72_vm0, %v2494_v31, %v2496_v63 }
 0x118   :  { %v2508_v58 = vadd.f32 %v2497_v6, %v4961_v52  ;;  %v6900_v40 = vrot.slane %v4827_v51, 3  ;;  %v4992_v25 = vmul.f32 -0.0016136946, %v3402_v13  ;;  %v1509_v54 = vadd.f32 %v1495_v29, %v1474_v48 }
 0x119   :  { %v1427_v24 = vsel %vm72_vm0, %v6899_v43, %v6898_v62  ;;  %v1327_v7 = vadd.f32 %v1314_v39, %v1292_v14  ;;  %v4998_v46 = vmul.f32 0.010384526, %v3478_v28  ;;  %v5003_v38 = vmul.f32 -0.030875737, %v3478_v28 }
 0x11a   :  { %v2548_v36 = vsel %vm144_vm2, %v6900_v40, %v2547_v19  ;;  %6901 = vst [vmem:[#allocation119_spill] sm:$0xff] %v4992_v25  ;;  %v5000_v31 = vadd.f32 %v2522_v34, %v2508_v58  ;;  %v5006_v6 = vmul.f32 0.07245068, %v3478_v28  ;;  %v5009_v51 = vmul.f32 -0.17105956, %v3478_v28  ;;  %3322 = vst.msk [vmem:[%s6443_s2 + $0x7e] sm:$0xff] %vm399_vm8, %v1509_v54 }
 0x11b   :  { %v4995_v16 = vadd.f32 %v2548_v36, %v4784_v56  ;;  %6903 = vst [vmem:[#allocation121_spill] sm:$0xff] %v4998_v46  ;;  %6904 = vst [vmem:[#allocation122_spill] sm:$0xff] %v5003_v38  ;;  %v1358_v39 = vadd.f32 %v1345_v17, %v1327_v7  ;;  %v1175_v56 = vrot.slane %v4998_v46, 1  ;;  %v5017_v29 = vmul.f32 0.8473343, %v3478_v28 }
 0x11c   :  { %6905 = vst [vmem:[#allocation123_spill] sm:$0xff] %v5006_v6  ;;  %6906 = vst [vmem:[#allocation124_spill] sm:$0xff] %v5009_v51  ;;  %v5020_v40 = vmul.f32 0.36150613, %v3478_v28  ;;  %v1210_v34 = vrot.slane %v5003_v38, 2  ;;  %v1245_v48 = vrot.slane %v5006_v6, 3 }
 0x11d   :  { %6902 = vst [vmem:[#allocation120_spill] sm:$0xff] %v4995_v16  ;;  %6907 = vst [vmem:[#allocation125_spill] sm:$0xff] %v5017_v29  ;;  %v5026_v62 = vmul.f32 -0.1285575, %v3478_v28  ;;  %v1393_v43 = vadd.f32 %v1378_v35, %v1358_v39  ;;  %v1176_v17 = vsel %vm72_vm0, %v1173_v23, %v1175_v56  ;;  %v6910_v54 = vrot.slane %v4847_v26, 2 }
 0x11e   :  { %6908 = vst [vmem:[#allocation126_spill] sm:$0xff] %v5020_v40  ;;  %v6911_v7 = vrot.slane %v4731_v41, 2  ;;  %v1188_v14 = vadd.f32 %v1176_v17, %v4992_v25  ;;  %v6912_v46 = vrot.slane %v4896_v32, 2  ;;  %v6913_v39 = vrot.slane %v4961_v52, 3 }
 0x11f   :  { %6909 = vst [vmem:[#allocation127_spill] sm:$0xff] %v5026_v62  ;;  %v1405_v23 = vadd.f32 %v4940_v22, %v1393_v43  ;;  %v6914_v36 = vrot.slane %v4856_v1, 3  ;;  %v6915_v41 = vrot.slane %v4899_v60, 3  ;;  %v6916_v17 = vrot.slane %v5009_v51, 4 }
 0x120   :  { %v1462_v2 = vsel %vm108_vm1, %v6911_v7, %v6910_v54  ;;  %v1211_v35 = vsel %vm108_vm1, %v6912_v46, %v1210_v34  ;;  %v6917_v38 = vrot.slane %v4905_v15, 4  ;;  %v6918_v22 = vrot.slane %v5017_v29, 5 }
 0x121   :  { %v1497_v58 = vsel %vm144_vm2, %v6914_v36, %v6913_v39  ;;  %v1246_v54 = vsel %vm144_vm2, %v6915_v41, %v1245_v48  ;;  %v1223_v6 = vadd.f32 %v1211_v35, %v1188_v14  ;;  %v6919_v43 = vrot.slane %v4908_v57, 5 }
 0x122   :  { %v1281_v46 = vsel %vm180_vm3, %v6917_v38, %v6916_v17  ;;  %v1400_v36 = vmul.f32 0.059048656, %v3478_v28  ;;  %v1440_v39 = vadd.f32 %v1427_v24, %v1405_v23  ;;  %v6920_v41 = vrot.slane %v5020_v40, 6 }
 0x123   :  { %v1316_v1 = vsel %vm216_vm4, %v6919_v43, %v6918_v22  ;;  %v6921_v7 = vrot.slane %v4918_v50, 6  ;;  %v1428_v35 = vrot.slane %v4943_v45, 1  ;;  %v5069_v60 = vmul.f32 -0.00043812688, %v3572_v44 }
 0x124   :  { %v1258_v38 = vadd.f32 %v1246_v54, %v1223_v6  ;;  %v6922_v17 = vrot.slane %v5026_v62, 7  ;;  %v6923_v15 = vrot.slane %v4926_v3, 7  ;;  %v1463_v24 = vrot.slane %v4948_v9, 2 }
 0x125   :  { %v1347_v14 = vsel %vm252_vm5, %v6921_v7, %v6920_v41  ;;  %v2549_v23 = vrot.slane %v1400_v36, 3  ;;  %v1475_v43 = vadd.f32 %v1462_v2, %v1440_v39  ;;  %v2509_v7 = vadd.f32 %v2496_v63, %v5069_v60 }
 0x126   :  { %v1380_v22 = vsel %vm276_vm6, %v6923_v15, %v6922_v17  ;;  %v1293_v50 = vadd.f32 %v1281_v46, %v1258_v38  ;;  %v5082_v6 = vmul.f32 0.010384526, %v3572_v44  ;;  %v5085_v54 = vmul.f32 -0.030875737, %v3572_v44 }
 0x127   :  { %v2550_v16 = vsel %vm144_vm2, %v2547_v19, %v2549_v23  ;;  %v1510_v15 = vadd.f32 %v1497_v58, %v1475_v43  ;;  %v6926_v9 = vrot.slane %v4943_v45, 2  ;;  %v5093_v63 = vmul.f32 -0.0016136946, %v3478_v28 }
 0x128   :  { %6924 = vst [vmem:[#allocation128_spill] sm:$0xff] %v5082_v6  ;;  %6925 = vst [vmem:[#allocation129_spill] sm:$0xff] %v5085_v54  ;;  %v5090_v2 = vadd.f32 %v2550_v16, %v4910_v47  ;;  %v1328_v39 = vadd.f32 %v1316_v1, %v1293_v50  ;;  %v1177_v46 = vrot.slane %v5082_v6, 1  ;;  %v1212_v19 = vrot.slane %v5085_v54, 2 }
 0x129   :  { %v2534_v17 = vadd.f32 %v6926_v9, %v2509_v7  ;;  %6928 = vst [vmem:[#allocation131_spill] sm:$0xff] %v5093_v63  ;;  %v5098_v38 = vmul.f32 0.07245068, %v3572_v44  ;;  %3323 = vst.msk [vmem:[%s6443_s2 + $0x86] sm:$0xff] %vm399_vm8, %v1510_v15  ;;  %v6930_v45 = vrot.slane %v4838_v20, 1 }
 0x12a   :  { %6927 = vst [vmem:[#allocation130_spill] sm:$0xff] %v5090_v2  ;;  %v5108_v16 = vmul.f32 -0.17105956, %v3572_v44  ;;  %v5111_v50 = vmul.f32 0.8473343, %v3572_v44  ;;  %v1359_v1 = vadd.f32 %v1347_v14, %v1328_v39  ;;  %v1178_v43 = vsel %vm72_vm0, %v1175_v56, %v1177_v46 }
 0x12b   :  { %6929 = vst [vmem:[#allocation132_spill] sm:$0xff] %v5098_v38  ;;  %v1429_v47 = vsel %vm72_vm0, %v6930_v45, %v1428_v35  ;;  %v5114_v58 = vmul.f32 0.36150613, %v3572_v44  ;;  %v1213_v7 = vsel %vm108_vm1, %v1210_v34, %v1212_v19  ;;  %v1247_v15 = vrot.slane %v5098_v38, 3 }
 0x12c   :  { %6931 = vst [vmem:[#allocation133_spill] sm:$0xff] %v5108_v16  ;;  %6932 = vst [vmem:[#allocation134_spill] sm:$0xff] %v5111_v50  ;;  %v1189_v20 = vadd.f32 %v1178_v43, %v5093_v63  ;;  %v1394_v57 = vadd.f32 %v1380_v22, %v1359_v1  ;;  %v5125_v54 = vmul.f32 -0.1285575, %v3572_v44  ;;  %v1401_v56 = vmul.f32 0.059048656, %v3572_v44 }
 0x12d   :  { %6933 = vst [vmem:[#allocation135_spill] sm:$0xff] %v5114_v58  ;;  %v1248_v6 = vsel %vm144_vm2, %v1245_v48, %v1247_v15  ;;  %v6935_v34 = vrot.slane %v4847_v26, 2  ;;  %v6936_v39 = vrot.slane %v5069_v60, 3  ;;  %v6937_v43 = vrot.slane %v4961_v52, 3 }
 0x12e   :  { %6934 = vst [vmem:[#allocation136_spill] sm:$0xff] %v5125_v54  ;;  %v1224_v9 = vadd.f32 %v1213_v7, %v1189_v20  ;;  %v6938_v22 = vrot.slane %v5108_v16, 4  ;;  %v6939_v48 = vrot.slane %v5009_v51, 4  ;;  %v1406_v41 = vadd.f32 %v1400_v36, %v1394_v57 }
 0x12f   :  { %v1464_v14 = vsel %vm108_vm1, %v6935_v34, %v1463_v24  ;;  %v1499_v45 = vsel %vm144_vm2, %v6937_v43, %v6936_v39  ;;  %v1381_v38 = vrot.slane %v5125_v54, 7  ;;  %v5143_v26 = vmul.f32 -0.024740089, %v3620_v33 }
 0x130   :  { %v1283_v1 = vsel %vm180_vm3, %v6939_v48, %v6938_v22  ;;  %v5146_v34 = vmul.f32 0.0071633775, %v3620_v33  ;;  %v1259_v2 = vadd.f32 %v1248_v6, %v1224_v9  ;;  %v6940_v52 = vrot.slane %v5111_v50, 5 }
 0x131   :  { %v6941_v7 = vrot.slane %v5017_v29, 5  ;;  %v5154_v39 = vmul.f32 -0.00043812688, %v3620_v33  ;;  %v2551_v43 = vrot.slane %v1401_v56, 3  ;;  %v1441_v57 = vadd.f32 %v1429_v47, %v1406_v41 }
 0x132   :  { %v6942_v36 = vrot.slane %v5114_v58, 6  ;;  %v6943_v22 = vrot.slane %v5020_v40, 6  ;;  %v6591_v51 = vrot.slane %v5143_v26, 1  ;;  %v1294_v9 = vadd.f32 %v1283_v1, %v1259_v2 }
 0x133   :  { %v1318_v20 = vsel %vm216_vm4, %v6941_v7, %v6940_v52  ;;  %v6944_v29 = vrot.slane %v5026_v62, 7  ;;  %v2552_v7 = vsel %vm144_vm2, %v2549_v23, %v2551_v43  ;;  %v5167_v63 = vadd.f32 %v2551_v43, %v2534_v17 }
 0x134   :  { %v1349_v48 = vsel %vm252_vm5, %v6943_v22, %v6942_v36  ;;  %v1476_v41 = vadd.f32 %v1464_v14, %v1441_v57  ;;  %v1431_v47 = vsel %vm72_vm0, %v1428_v35, %v6591_v51  ;;  %v6592_v36 = vrot.slane %v5154_v39, 3 }
 0x135   :  { %v1382_v52 = vsel %vm276_vm6, %v6944_v29, %v1381_v38  ;;  %6945 = vst [vmem:[#allocation137_spill] sm:$0xff] %v5167_v63  ;;  %v5174_v22 = vadd.f32 %v2552_v7, %v5000_v31  ;;  %v1329_v6 = vadd.f32 %v1318_v20, %v1294_v9  ;;  %v6947_v2 = vrot.slane %v5146_v34, 2 }
 0x136   :  { %v5180_v29 = vmul.f32 -0.0016136946, %v3572_v44  ;;  %v1367_v23 = vmul.f32 -0.1285575, %v3620_v33  ;;  %v1511_v17 = vadd.f32 %v1499_v45, %v1476_v41  ;;  %v1402_v14 = vmul.f32 0.059048656, %v3620_v33 }
 0x137   :  { %6946 = vst [vmem:[#allocation138_spill] sm:$0xff] %v5174_v22  ;;  %v1466_v1 = vsel %vm108_vm1, %v1463_v24, %v6947_v2  ;;  %v1521_v35 = vmul.f32 -0.0015148092, %v3396_v10  ;;  %v1527_v43 = vmul.f32 0.011326861, %v3396_v10  ;;  %v1360_v57 = vadd.f32 %v1349_v48, %v1329_v6 }
 0x138   :  { %6948 = vst [vmem:[#allocation139_spill] sm:$0xff] %v5180_v29  ;;  %v1190_v31 = vadd.f32 %v1177_v46, %v5180_v29  ;;  %v1383_v20 = vrot.slane %v1367_v23, 7  ;;  %v5188_v9 = vmul.f32 0.011326861, %v3398_v11  ;;  %3324 = vst.msk [vmem:[%s6443_s2 + $0x8e] sm:$0xff] %vm399_vm8, %v1511_v17  ;;  %v6949_v24 = vrot.slane %v5069_v60, 3 }
 0x139   :  { %v1539_v7 = vrot.slane %v1527_v43, 1  ;;  %v1562_v48 = vmul.f32 -0.034585986, %v3396_v10  ;;  %v5201_v46 = vmul.f32 -0.034585986, %v3398_v11  ;;  %v1395_v6 = vadd.f32 %v1382_v52, %v1360_v57 }
 0x13a   :  { %v1501_v45 = vsel %vm144_vm2, %v6949_v24, %v6592_v36  ;;  %v1225_v41 = vadd.f32 %v1212_v19, %v1190_v31  ;;  %v1384_v2 = vsel %vm276_vm6, %v1381_v38, %v1383_v20  ;;  %v6598_v23 = vrot.slane %v5188_v9, 1 }
 0x13b   :  { %v1574_v51 = vrot.slane %v1562_v48, 2  ;;  %v6597_v17 = vrot.slane %v5201_v46, 2  ;;  %v1597_v63 = vmul.f32 0.08103472, %v3396_v10  ;;  %v5208_v60 = vmul.f32 0.08103472, %v3398_v11 }
 0x13c   :  { %v1407_v43 = vadd.f32 %v1401_v56, %v1395_v6  ;;  %v1260_v24 = vadd.f32 %v1247_v15, %v1225_v41  ;;  %v1541_v36 = vsel %vm72_vm0, %v1539_v7, %v6598_v23  ;;  %v1632_v19 = vmul.f32 -0.18611091, %v3396_v10 }
 0x13d   :  { %6950 = vst [vmem:[#allocation140_spill] sm:$0xff] %v5208_v60  ;;  %v1556_v52 = vadd.f32 %v1541_v36, %v1521_v35  ;;  %v1576_v38 = vsel %vm108_vm1, %v1574_v51, %v6597_v17  ;;  %v1609_v57 = vrot.slane %v1597_v63, 3  ;;  %v6594_v31 = vrot.slane %v5208_v60, 3 }
 0x13e   :  { %v1442_v20 = vadd.f32 %v1431_v47, %v1407_v43  ;;  %v6951_v48 = vrot.slane %v5108_v16, 4  ;;  %v5221_v15 = vmul.f32 -0.18611091, %v3398_v11  ;;  %v1644_v56 = vrot.slane %v1632_v19, 4 }
 0x13f   :  { %v1591_v6 = vadd.f32 %v1576_v38, %v1556_v52  ;;  %v1611_v36 = vsel %vm144_vm2, %v1609_v57, %v6594_v31  ;;  %v1667_v35 = vmul.f32 0.74560535, %v3396_v10  ;;  %v5228_v51 = vmul.f32 0.74560535, %v3398_v11 }
 0x140   :  { %v1295_v29 = vadd.f32 %v6951_v48, %v1260_v24  ;;  %v1477_v63 = vadd.f32 %v1466_v1, %v1442_v20  ;;  %v6952_v47 = vrot.slane %v5111_v50, 5  ;;  %v6596_v41 = vrot.slane %v5221_v15, 4 }
 0x141   :  { %v5234_v43 = vmul.f32 0.49537602, %v3398_v11  ;;  %v1626_v24 = vadd.f32 %v1611_v36, %v1591_v6  ;;  %v1679_v19 = vrot.slane %v1667_v35, 5  ;;  %v6595_v52 = vrot.slane %v5228_v51, 5 }
 0x142   :  { %v1330_v7 = vadd.f32 %v6952_v47, %v1295_v29  ;;  %v5238_v38 = vmul.f32 -0.16087934, %v3398_v11  ;;  %v1512_v57 = vadd.f32 %v1501_v45, %v1477_v63  ;;  %v6953_v48 = vrot.slane %v5114_v58, 6 }
 0x143   :  { %v1646_v1 = vsel %vm180_vm3, %v1644_v56, %v6596_v41  ;;  %v6601_v29 = vrot.slane %v5234_v43, 6  ;;  %v1681_v6 = vsel %vm216_vm4, %v1679_v19, %v6595_v52  ;;  %v5251_v35 = vmul.f32 0.07274334, %v3398_v11 }
 0x144   :  { %v1361_v31 = vadd.f32 %v6953_v48, %v1330_v7  ;;  %v1661_v20 = vadd.f32 %v1646_v1, %v1626_v24  ;;  %3325 = vst.msk [vmem:[%s6443_s2 + $0x96] sm:$0xff] %vm399_vm8, %v1512_v57  ;;  %v1780_v56 = vmul.f32 -0.030711679, %v3398_v11  ;;  %v5259_v63 = vmul.f32 -0.030711679, %v3400_v12 }
 0x145   :  { %v5262_v47 = vmul.f32 -0.030711679, %v3402_v13  ;;  %v1815_v24 = vmul.f32 0.009316233, %v3398_v11  ;;  %v5266_v19 = vmul.f32 0.009316233, %v3400_v12 }
 0x146   :  { %v1396_v45 = vadd.f32 %v1384_v2, %v1361_v31  ;;  %v1696_v7 = vadd.f32 %v1681_v6, %v1661_v20  ;;  %v5269_v48 = vmul.f32 0.009316233, %v3402_v13  ;;  %v1792_v57 = vrot.slane %v1780_v56, 1 }
 0x147   :  { %v6602_v2 = vrot.slane %v5259_v63, 1  ;;  %v1850_v31 = vmul.f32 -0.00079855067, %v3398_v11  ;;  %v1827_v41 = vrot.slane %v1815_v24, 2  ;;  %v6604_v20 = vrot.slane %v5266_v19, 2 }
 0x148   :  { %v1408_v1 = vadd.f32 %v1402_v14, %v1396_v45  ;;  %v1727_v52 = vadd.f32 %v6601_v29, %v1696_v7  ;;  %v5277_v6 = vmul.f32 -0.00079855067, %v3400_v12  ;;  %v6954_v17 = vrot.slane %v5143_v26, 1 }
 0x149   :  { %v1794_v14 = vsel %vm72_vm0, %v1792_v57, %v6602_v2  ;;  %v1862_v45 = vrot.slane %v1850_v31, 3  ;;  %v2213_v36 = vmul.f32 -0.00079855067, %v3396_v10  ;;  %v6955_v16 = vrot.slane %v5238_v38, 7 }
 0x14a   :  { %v1443_v23 = vadd.f32 %v6954_v17, %v1408_v1  ;;  %v1829_v7 = vsel %vm108_vm1, %v1827_v41, %v6604_v20  ;;  %v6610_v29 = vrot.slane %v5277_v6, 3  ;;  %v2214_v22 = vmul.f32 0.009316233, %v3396_v10 }
 0x14b   :  { %v1762_v50 = vadd.f32 %v6955_v16, %v1727_v52  ;;  %v6956_v26 = vrot.slane %v5146_v34, 2  ;;  %v2217_v1 = vrot.slane %v1815_v24, 1  ;;  %v2219_v57 = vrot.slane %v5266_v19, 1 }
 0x14c   :  { %v6611_v2 = vrot.slane %v5269_v48, 1  ;;  %v1864_v16 = vsel %vm144_vm2, %v1862_v45, %v6610_v29  ;;  %v2216_v52 = vrot.slane %v2214_v22, 1  ;;  %v2239_v41 = vmul.f32 -0.030711679, %v3396_v10 }
 0x14d   :  { %v1478_v17 = vadd.f32 %v6956_v26, %v1443_v23  ;;  %v1774_v58 = vadd.f32 %v5251_v35, %v1762_v50  ;;  %v6957_v20 = vrot.slane %v5154_v39, 3  ;;  %v2220_v34 = vsel %vm72_vm0, %v2217_v1, %v2219_v57 }
 0x14e   :  { %v2222_v23 = vsel %vm72_vm0, %v2219_v57, %v6611_v2  ;;  %v2242_v24 = vrot.slane %v1780_v56, 2  ;;  %v2218_v50 = vsel %vm72_vm0, %v2216_v52, %v2217_v1  ;;  %v2234_v62 = vadd.f32 %v2220_v34, %v1850_v31 }
 0x14f   :  { %v1513_v40 = vadd.f32 %v6957_v20, %v1478_v17  ;;  %v1809_v26 = vadd.f32 %v1794_v14, %v1774_v58  ;;  %v2235_v3 = vadd.f32 %v2222_v23, %v5277_v6  ;;  %v2233_v39 = vadd.f32 %v2218_v50, %v2213_v36 }
 0x150   :  { %v2241_v22 = vrot.slane %v2239_v41, 2  ;;  %v2244_v20 = vrot.slane %v5259_v63, 2  ;;  %v2246_v45 = vrot.slane %v5262_v47, 2  ;;  %v2264_v58 = vmul.f32 0.07274334, %v3396_v10 }
 0x151   :  { %3326 = vst.msk [vmem:[%s6443_s2 + $0x9e] sm:$0x3] %vm777_vm11, %v1513_v40  ;;  %v1844_v56 = vadd.f32 %v1829_v7, %v1809_v26  ;;  %v2272_v31 = vrot.slane %v5251_v35, 3  ;;  %v5325_v7 = vmul.f32 -0.0015148092, %v3398_v11  ;;  %v6962_v40 = vrot.slane %v5201_v46, 2 }
 0x152   :  { %v2243_v14 = vsel %vm108_vm1, %v2241_v22, %v2242_v24  ;;  %v2245_v1 = vsel %vm108_vm1, %v2242_v24, %v2244_v20  ;;  %v2247_v57 = vsel %vm108_vm1, %v2244_v20, %v2246_v45  ;;  %v2271_v23 = vrot.slane %v2264_v58, 3 }
 0x153   :  { %v1879_v36 = vadd.f32 %v1864_v16, %v1844_v56  ;;  %v2258_v52 = vadd.f32 %v2243_v14, %v2233_v39  ;;  %v2259_v41 = vadd.f32 %v2245_v1, %v2234_v62  ;;  %v5322_v34 = vadd.f32 %v2247_v57, %v2235_v3 }
 0x154   :  { %v5328_v26 = vmul.f32 0.011326861, %v3400_v12  ;;  %v5336_v16 = vmul.f32 -0.034585986, %v3400_v12  ;;  %v5339_v3 = vmul.f32 0.08103472, %v3400_v12  ;;  %v2273_v24 = vsel %vm144_vm2, %v2271_v23, %v2272_v31 }
 0x155   :  { %3327 = vst.msk [vmem:[%s6443_s2 + $0x9e] sm:$0xfc] %vm771_vm10, %v1879_v36  ;;  %v5342_v62 = vmul.f32 -0.18611091, %v3400_v12  ;;  %v5347_v39 = vmul.f32 0.74560535, %v3400_v12  ;;  %v5352_v20 = vadd.f32 %v2273_v24, %v2258_v52 }
 0x156   :  { %6958 = vst [vmem:[#allocation141_spill] sm:$0xff] %v5339_v3  ;;  %v1542_v50 = vrot.slane %v5328_v26, 1  ;;  %v5350_v22 = vmul.f32 0.49537602, %v3400_v12  ;;  %v1577_v56 = vrot.slane %v5336_v16, 2  ;;  %v1612_v58 = vrot.slane %v5339_v3, 3 }
 0x157   :  { %6959 = vst [vmem:[#allocation142_spill] sm:$0xff] %v5342_v62  ;;  %v1647_v14 = vrot.slane %v5342_v62, 4  ;;  %v6960_v1 = vrot.slane %v5188_v9, 1  ;;  %v1682_v36 = vrot.slane %v5347_v39, 5  ;;  %v5363_v17 = vmul.f32 -0.16087934, %v3400_v12 }
 0x158   :  { %v1578_v29 = vsel %vm108_vm1, %v6962_v40, %v1577_v56  ;;  %v6963_v2 = vrot.slane %v5208_v60, 3  ;;  %v6965_v23 = vrot.slane %v5228_v51, 5  ;;  %v6966_v40 = vrot.slane %v5350_v22, 6 }
 0x159   :  { %v1543_v57 = vsel %vm72_vm0, %v6960_v1, %v1542_v50  ;;  %6961 = vst [vmem:[#allocation143_spill] sm:$0xff] %v5363_v17  ;;  %v6964_v1 = vrot.slane %v5221_v15, 4  ;;  %v1746_v52 = vrot.slane %v5363_v17, 7  ;;  %v6967_v42 = vrot.slane %v5234_v43, 6 }
 0x15a   :  { %v1557_v24 = vadd.f32 %v1543_v57, %v5325_v7  ;;  %v1613_v35 = vsel %vm144_vm2, %v6963_v2, %v1612_v58  ;;  %v1683_v25 = vsel %vm216_vm4, %v6965_v23, %v1682_v36  ;;  %v5381_v57 = vmul.f32 0.07274334, %v3400_v12 }
 0x15b   :  { %v1648_v54 = vsel %vm180_vm3, %v6964_v1, %v1647_v14  ;;  %v1714_v2 = vsel %vm252_vm5, %v6967_v42, %v6966_v40  ;;  %v5389_v59 = vmul.f32 -0.030711679, %v3478_v28  ;;  %v5392_v1 = vmul.f32 0.009316233, %v3478_v28 }
 0x15c   :  { %v1592_v32 = vadd.f32 %v1578_v29, %v1557_v24  ;;  %v6968_v23 = vrot.slane %v5262_v47, 1  ;;  %v6969_v37 = vrot.slane %v5259_v63, 1  ;;  %v1830_v29 = vrot.slane %v5269_v48, 2 }
 0x15d   :  { %v5401_v24 = vmul.f32 -0.00079855067, %v3402_v13  ;;  %v6629_v49 = vrot.slane %v5381_v57, 3  ;;  %v6970_v40 = vrot.slane %v5238_v38, 7  ;;  %v2223_v5 = vrot.slane %v5392_v1, 1 }
 0x15e   :  { %v1796_v21 = vsel %vm72_vm0, %v6969_v37, %v6968_v23  ;;  %v1627_v42 = vadd.f32 %v1613_v35, %v1592_v32  ;;  %v2248_v18 = vrot.slane %v5389_v59, 2  ;;  %v6971_v63 = vrot.slane %v5266_v19, 2 }
 0x15f   :  { %v1747_v4 = vsel %vm276_vm6, %v6970_v40, %v1746_v52  ;;  %v2275_v61 = vsel %vm144_vm2, %v2272_v31, %v6629_v49  ;;  %v6972_v53 = vrot.slane %v5269_v48, 1  ;;  %v5428_v23 = vmul.f32 0.011326861, %v3402_v13 }
 0x160   :  { %v1831_v37 = vsel %vm108_vm1, %v6971_v63, %v1830_v29  ;;  %v1662_v35 = vadd.f32 %v1648_v54, %v1627_v42  ;;  %v2249_v30 = vsel %vm108_vm1, %v2246_v45, %v2248_v18  ;;  %v5421_v27 = vadd.f32 %v2275_v61, %v2259_v41 }
 0x161   :  { %v2224_v40 = vsel %vm72_vm0, %v6972_v53, %v2223_v5  ;;  %v5425_v63 = vmul.f32 -0.0015148092, %v3400_v12  ;;  %6973 = vst [vmem:[#allocation144_spill] sm:$0xff] %v5428_v23  ;;  %v5431_v31 = vmul.f32 -0.034585986, %v3402_v13  ;;  %v6632_v41 = vrot.slane %v5428_v23, 1 }
 0x162   :  { %v2236_v19 = vadd.f32 %v2224_v40, %v5401_v24  ;;  %v1697_v54 = vadd.f32 %v1683_v25, %v1662_v35  ;;  %v5434_v48 = vmul.f32 0.08103472, %v3402_v13  ;;  %v5437_v53 = vmul.f32 -0.18611091, %v3402_v13 }
 0x163   :  { %v5440_v61 = vmul.f32 0.74560535, %v3402_v13  ;;  %v6633_v42 = vrot.slane %v5431_v31, 2  ;;  %v5447_v40 = vmul.f32 0.49537602, %v3402_v13  ;;  %v1545_v55 = vsel %vm72_vm0, %v1542_v50, %v6632_v41 }
 0x164   :  { %6974 = vst [vmem:[#allocation145_spill] sm:$0xff] %v5434_v48  ;;  %6975 = vst [vmem:[#allocation146_spill] sm:$0xff] %v5437_v53  ;;  %v5442_v45 = vadd.f32 %v2249_v30, %v2236_v19  ;;  %v1728_v32 = vadd.f32 %v1714_v2, %v1697_v54  ;;  %v5460_v8 = vmul.f32 -0.16087934, %v3402_v13  ;;  %v6979_v54 = vrot.slane %v5401_v24, 3 }
 0x165   :  { %6976 = vst [vmem:[#allocation147_spill] sm:$0xff] %v5440_v61  ;;  %6977 = vst [vmem:[#allocation148_spill] sm:$0xff] %v5447_v40  ;;  %v1580_v30 = vsel %vm108_vm1, %v1577_v56, %v6633_v42  ;;  %v6980_v35 = vrot.slane %v5277_v6, 3  ;;  %v1558_v25 = vadd.f32 %v1545_v55, %v5425_v63  ;;  %v6981_v50 = vrot.slane %v5434_v48, 3 }
 0x166   :  { %6978 = vst [vmem:[#allocation149_spill] sm:$0xff] %v5460_v8  ;;  %v1763_v2 = vadd.f32 %v1747_v4, %v1728_v32  ;;  %v6982_v56 = vrot.slane %v5437_v53, 4  ;;  %v6983_v19 = vrot.slane %v5440_v61, 5  ;;  %v6636_v32 = vrot.slane %v5460_v8, 7 }
 0x167   :  { %v1866_v49 = vsel %vm144_vm2, %v6980_v35, %v6979_v54  ;;  %v1615_v41 = vsel %vm144_vm2, %v1612_v58, %v6981_v50  ;;  %v5479_v6 = vmul.f32 0.07274334, %v3402_v13  ;;  %v1593_v55 = vadd.f32 %v1580_v30, %v1558_v25 }
 0x168   :  { %v1650_v42 = vsel %vm180_vm3, %v1647_v14, %v6982_v56  ;;  %v1685_v4 = vsel %vm216_vm4, %v1682_v36, %v6983_v19  ;;  %v1775_v35 = vadd.f32 %v5381_v57, %v1763_v2  ;;  %v5483_v54 = vmul.f32 -0.030711679, %v3572_v44 }
 0x169   :  { %v1797_v58 = vrot.slane %v5389_v59, 1  ;;  %v6984_v50 = vrot.slane %v5447_v40, 6  ;;  %v6985_v14 = vrot.slane %v5350_v22, 6  ;;  %v1749_v36 = vsel %vm276_vm6, %v1746_v52, %v6636_v32 }
 0x16a   :  { %v5495_v19 = vmul.f32 0.009316233, %v3572_v44  ;;  %v1832_v25 = vrot.slane %v5392_v1, 2  ;;  %v1810_v30 = vadd.f32 %v1796_v21, %v1775_v35  ;;  %v1628_v2 = vadd.f32 %v1615_v41, %v1593_v55 }
 0x16b   :  { %v1716_v56 = vsel %vm252_vm5, %v6985_v14, %v6984_v50  ;;  %v5499_v0 = vmul.f32 -0.00079855067, %v3478_v28  ;;  %v6639_v59 = vrot.slane %v5483_v54, 2  ;;  %v6986_v3 = vrot.slane %v5262_v47, 1 }
 0x16c   :  { %v1833_v14 = vsel %vm108_vm1, %v1830_v29, %v1832_v25  ;;  %v2225_v52 = vrot.slane %v5495_v19, 1  ;;  %v2276_v32 = vrot.slane %v5479_v6, 3  ;;  %v1845_v60 = vadd.f32 %v1831_v37, %v1810_v30 }
 0x16d   :  { %v1798_v50 = vsel %vm72_vm0, %v6986_v3, %v1797_v58  ;;  %v1663_v62 = vadd.f32 %v1650_v42, %v1628_v2  ;;  %v6642_v21 = vrot.slane %v5499_v0, 3  ;;  %v2251_v1 = vsel %vm108_vm1, %v2248_v18, %v6639_v59 }
 0x16e   :  { %v2226_v41 = vsel %vm72_vm0, %v2223_v5, %v2225_v52  ;;  %v6987_v47 = vrot.slane %v5381_v57, 3  ;;  %v5518_v35 = vmul.f32 -0.0015148092, %v3402_v13  ;;  %v1880_v55 = vadd.f32 %v1866_v49, %v1845_v60 }
 0x16f   :  { %v1698_v37 = vadd.f32 %v1685_v4, %v1663_v62  ;;  %v2237_v42 = vadd.f32 %v2226_v41, %v5499_v0  ;;  %v5525_v18 = vmul.f32 0.011326861, %v3478_v28  ;;  %v5528_v5 = vmul.f32 -0.034585986, %v3478_v28 }
 0x170   :  { %v2277_v3 = vsel %vm144_vm2, %v6987_v47, %v2276_v32  ;;  %6988 = vst [vmem:[#allocation150_spill] sm:$0xff] %v5518_v35  ;;  %v5531_v57 = vmul.f32 0.08103472, %v3478_v28  ;;  %v6993_v2 = vrot.slane %v5363_v17, 4  ;;  %v6994_v47 = vrot.slane %v5238_v38, 4  ;;  %3328 = vst.msk [vmem:[%s6443_s2 + $0xa6] sm:$0xff] %vm399_vm8, %v1880_v55 }
 0x171   :  { %v5522_v30 = vadd.f32 %v2277_v3, %v5322_v34  ;;  %6990 = vst [vmem:[#allocation152_spill] sm:$0xff] %v5525_v18  ;;  %6991 = vst [vmem:[#allocation153_spill] sm:$0xff] %v5528_v5  ;;  %v1729_v60 = vadd.f32 %v1716_v56, %v1698_v37  ;;  %v5544_v34 = vadd.f32 %v2251_v1, %v2237_v42  ;;  %v5547_v62 = vmul.f32 -0.18611091, %v3478_v28 }
 0x172   :  { %6992 = vst [vmem:[#allocation154_spill] sm:$0xff] %v5531_v57  ;;  %v5538_v49 = vsel %vm180_vm3, %v6994_v47, %v6993_v2  ;;  %v5550_v4 = vmul.f32 0.74560535, %v3478_v28  ;;  %v1546_v41 = vrot.slane %v5525_v18, 1  ;;  %v1581_v3 = vrot.slane %v5528_v5, 2 }
 0x173   :  { %6989 = vst [vmem:[#allocation151_spill] sm:$0xff] %v5522_v30  ;;  %6995 = vst [vmem:[#allocation155_spill] sm:$0xff] %v5547_v62  ;;  %v1616_v2 = vrot.slane %v5531_v57, 3  ;;  %v5556_v47 = vmul.f32 0.49537602, %v3478_v28  ;;  %v1764_v29 = vadd.f32 %v1749_v36, %v1729_v60  ;;  %v6998_v56 = vrot.slane %v5401_v24, 3 }
 0x174   :  { %6996 = vst [vmem:[#allocation156_spill] sm:$0xff] %v5550_v4  ;;  %v1651_v55 = vrot.slane %v5547_v62, 4  ;;  %v1686_v37 = vrot.slane %v5550_v4, 5  ;;  %v6999_v42 = vrot.slane %v5428_v23, 1  ;;  %v7000_v57 = vrot.slane %v5431_v31, 2 }
 0x175   :  { %6997 = vst [vmem:[#allocation157_spill] sm:$0xff] %v5556_v47  ;;  %v1868_v1 = vsel %vm144_vm2, %v6998_v56, %v6642_v21  ;;  %v1717_v36 = vrot.slane %v5556_v47, 6  ;;  %v5573_v60 = vmul.f32 -0.16087934, %v3478_v28  ;;  %v1776_v24 = vadd.f32 %v5479_v6, %v1764_v29 }
 0x176   :  { %v1547_v59 = vsel %vm72_vm0, %v6999_v42, %v1546_v41  ;;  %v1582_v18 = vsel %vm108_vm1, %v7000_v57, %v1581_v3  ;;  %v7002_v21 = vrot.slane %v5434_v48, 3  ;;  %v7003_v4 = vrot.slane %v5437_v53, 4 }
 0x177   :  { %7001 = vst [vmem:[#allocation158_spill] sm:$0xff] %v5573_v60  ;;  %v1559_v56 = vadd.f32 %v1547_v59, %v5518_v35  ;;  %v7004_v5 = vrot.slane %v5440_v61, 5  ;;  %v1750_v47 = vrot.slane %v5573_v60, 7  ;;  %v5588_v30 = vmul.f32 0.07274334, %v3478_v28 }
 0x178   :  { %v1617_v62 = vsel %vm144_vm2, %v7002_v21, %v1616_v2  ;;  %v1652_v42 = vsel %vm180_vm3, %v7003_v4, %v1651_v55  ;;  %v6655_v6 = vrot.slane %v5483_v54, 1  ;;  %v1811_v59 = vadd.f32 %v1798_v50, %v1776_v24 }
 0x179   :  { %v1687_v57 = vsel %vm216_vm4, %v7004_v5, %v1686_v37  ;;  %v1594_v29 = vadd.f32 %v1582_v18, %v1559_v56  ;;  %v6656_v48 = vrot.slane %v5495_v19, 2  ;;  %v5593_v21 = vmul.f32 -0.00079855067, %v3572_v44 }
 0x17a   :  { %v7005_v4 = vrot.slane %v5447_v40, 6  ;;  %v7006_v5 = vrot.slane %v5460_v8, 7  ;;  %v1800_v17 = vsel %vm72_vm0, %v1797_v58, %v6655_v6  ;;  %v2278_v50 = vrot.slane %v5588_v30, 3 }
 0x17b   :  { %v1846_v18 = vadd.f32 %v1833_v14, %v1811_v59  ;;  %v1629_v24 = vadd.f32 %v1617_v62, %v1594_v29  ;;  %v1835_v56 = vsel %vm108_vm1, %v1832_v25, %v6656_v48  ;;  %v2238_v8 = vadd.f32 %v2225_v52, %v5593_v21 }
 0x17c   :  { %v1718_v53 = vsel %vm252_vm5, %v7005_v4, %v1717_v36  ;;  %v1751_v61 = vsel %vm276_vm6, %v7006_v5, %v1750_v47  ;;  %v1869_v4 = vrot.slane %v5593_v21, 3  ;;  %v2279_v5 = vsel %vm144_vm2, %v2276_v32, %v2278_v50 }
 0x17d   :  { %v5613_v35 = vmul.f32 0.011326861, %v3572_v44  ;;  %v1881_v58 = vadd.f32 %v1868_v1, %v1846_v18  ;;  %v1664_v6 = vadd.f32 %v1652_v42, %v1629_v24  ;;  %v5616_v14 = vadd.f32 %v2279_v5, %v5442_v45 }
 0x17e   :  { %v5619_v62 = vmul.f32 -0.0015148092, %v3478_v28  ;;  %v7010_v25 = vrot.slane %v5483_v54, 2  ;;  %v5625_v52 = vmul.f32 -0.034585986, %v3572_v44 }
 0x17f   :  { %7007 = vst [vmem:[#allocation159_spill] sm:$0xff] %v5613_v35  ;;  %7008 = vst [vmem:[#allocation160_spill] sm:$0xff] %v5616_v14  ;;  %v1548_v29 = vrot.slane %v5613_v35, 1  ;;  %v5628_v32 = vmul.f32 0.08103472, %v3572_v44  ;;  %v1699_v45 = vadd.f32 %v1687_v57, %v1664_v6 }
 0x180   :  { %7009 = vst [vmem:[#allocation161_spill] sm:$0xff] %v5619_v62  ;;  %v2263_v59 = vadd.f32 %v7010_v25, %v2238_v8  ;;  %7011 = vst [vmem:[#allocation162_spill] sm:$0xff] %v5625_v52  ;;  %v5635_v1 = vmul.f32 -0.18611091, %v3572_v44  ;;  %v5638_v42 = vmul.f32 0.74560535, %v3572_v44 }
 0x181   :  { %7012 = vst [vmem:[#allocation163_spill] sm:$0xff] %v5628_v32  ;;  %3329 = vst.msk [vmem:[%s6443_s2 + $0xae] sm:$0xff] %vm399_vm8, %v1881_v58  ;;  %v5641_v8 = vmul.f32 0.49537602, %v3572_v44  ;;  %v1549_v21 = vsel %vm72_vm0, %v1546_v41, %v1548_v29  ;;  %v1583_v18 = vrot.slane %v5625_v52, 2  ;;  %v1618_v24 = vrot.slane %v5628_v32, 3 }
 0x182   :  { %7013 = vst [vmem:[#allocation164_spill] sm:$0xff] %v5635_v1  ;;  %7014 = vst [vmem:[#allocation165_spill] sm:$0xff] %v5638_v42  ;;  %v5647_v5 = vmul.f32 -0.16087934, %v3572_v44  ;;  %v1730_v58 = vadd.f32 %v1718_v53, %v1699_v45  ;;  %v1560_v57 = vadd.f32 %v1549_v21, %v5619_v62  ;;  %v1653_v6 = vrot.slane %v5635_v1, 4 }
 0x183   :  { %7015 = vst [vmem:[#allocation166_spill] sm:$0xff] %v5641_v8  ;;  %v1688_v25 = vrot.slane %v5638_v42, 5  ;;  %v1584_v40 = vsel %vm108_vm1, %v1581_v3, %v1583_v18  ;;  %v1619_v48 = vsel %vm144_vm2, %v1616_v2, %v1618_v24  ;;  %v6661_v41 = vrot.slane %v5641_v8, 6 }
 0x184   :  { %7016 = vst [vmem:[#allocation167_spill] sm:$0xff] %v5647_v5  ;;  %v1752_v35 = vrot.slane %v5647_v5, 7  ;;  %v1765_v52 = vadd.f32 %v1751_v61, %v1730_v58  ;;  %v7017_v32 = vrot.slane %v5499_v0, 3  ;;  %v1595_v53 = vadd.f32 %v1584_v40, %v1560_v57 }
 0x185   :  { %v1654_v45 = vsel %vm180_vm3, %v1651_v55, %v1653_v6  ;;  %v1689_v21 = vsel %vm216_vm4, %v1686_v37, %v1688_v25  ;;  %v1720_v3 = vsel %vm252_vm5, %v1717_v36, %v6661_v41  ;;  %v1772_v2 = vmul.f32 0.07274334, %v3572_v44 }
 0x186   :  { %v1870_v14 = vsel %vm144_vm2, %v7017_v32, %v1869_v4  ;;  %v5666_v1 = vmul.f32 -0.030711679, %v3620_v33  ;;  %v1777_v61 = vadd.f32 %v5588_v30, %v1765_v52  ;;  %v1630_v58 = vadd.f32 %v1619_v48, %v1595_v53 }
 0x187   :  { %v5670_v0 = vmul.f32 0.009316233, %v3620_v33  ;;  %v5673_v40 = vmul.f32 -0.00079855067, %v3620_v33  ;;  %v1753_v55 = vsel %vm276_vm6, %v1750_v47, %v1752_v35  ;;  %v2280_v32 = vrot.slane %v1772_v2, 3 }
 0x188   :  { %v6669_v37 = vrot.slane %v5666_v1, 1  ;;  %v5678_v36 = vmul.f32 -0.0015148092, %v3572_v44  ;;  %v1812_v57 = vadd.f32 %v1800_v17, %v1777_v61  ;;  %v1665_v41 = vadd.f32 %v1654_v45, %v1630_v58 }
 0x189   :  { %v6668_v42 = vrot.slane %v5670_v0, 2  ;;  %v6667_v48 = vrot.slane %v5673_v40, 3  ;;  %v7019_v30 = vrot.slane %v5483_v54, 1  ;;  %v2281_v47 = vsel %vm144_vm2, %v2278_v50, %v2280_v32 }
 0x18a   :  { %7018 = vst [vmem:[#allocation168_spill] sm:$0xff] %v5678_v36  ;;  %v5688_v53 = vadd.f32 %v2280_v32, %v2263_v59  ;;  %v1561_v60 = vadd.f32 %v1548_v29, %v5678_v36  ;;  %v1847_v62 = vadd.f32 %v1835_v56, %v1812_v57  ;;  %v1700_v23 = vadd.f32 %v1689_v21, %v1665_v41 }
 0x18b   :  { %v1802_v52 = vsel %vm72_vm0, %v7019_v30, %v6669_v37  ;;  %v7021_v17 = vrot.slane %v5495_v19, 2  ;;  %v1872_v54 = vsel %vm144_vm2, %v1869_v4, %v6667_v48  ;;  %v5700_v61 = vadd.f32 %v2281_v47, %v5544_v34 }
 0x18c   :  { %7020 = vst [vmem:[#allocation169_spill] sm:$0xff] %v5688_v53  ;;  %v1596_v50 = vadd.f32 %v1583_v18, %v1561_v60  ;;  %v1738_v59 = vmul.f32 -0.16087934, %v3620_v33  ;;  %v1773_v29 = vmul.f32 0.07274334, %v3620_v33  ;;  %v1882_v56 = vadd.f32 %v1870_v14, %v1847_v62 }
 0x18d   :  { %v1837_v45 = vsel %vm108_vm1, %v7021_v17, %v6668_v42  ;;  %7022 = vst [vmem:[#allocation170_spill] sm:$0xff] %v5700_v61  ;;  %v1731_v41 = vadd.f32 %v1720_v3, %v1700_v23  ;;  %v1892_v21 = vmul.f32 -0.0011951893, %v3396_v10  ;;  %v5706_v19 = vmul.f32 -0.0011951893, %v3398_v11 }
 0x18e   :  { %v1631_v58 = vadd.f32 %v1618_v24, %v1596_v50  ;;  %v1754_v32 = vrot.slane %v1738_v59, 7  ;;  %v5709_v57 = vmul.f32 -0.0011951893, %v3400_v12  ;;  %v1898_v34 = vmul.f32 0.01084583, %v3396_v10  ;;  %3330 = vst.msk [vmem:[%s6443_s2 + $0xb6] sm:$0xff] %vm399_vm8, %v1882_v56 }
 0x18f   :  { %v1766_v60 = vadd.f32 %v1753_v55, %v1731_v41  ;;  %v5717_v23 = vmul.f32 0.01084583, %v3398_v11  ;;  %v5720_v4 = vmul.f32 0.01084583, %v3400_v12  ;;  %v5723_v14 = vmul.f32 0.01084583, %v3402_v13 }
 0x190   :  { %v1666_v62 = vadd.f32 %v1653_v6, %v1631_v58  ;;  %v1755_v18 = vsel %vm276_vm6, %v1752_v35, %v1754_v32  ;;  %v1910_v24 = vrot.slane %v1898_v34, 1  ;;  %v1933_v3 = vmul.f32 -0.034302063, %v3396_v10 }
 0x191   :  { %v1778_v30 = vadd.f32 %v1772_v2, %v1766_v60  ;;  %v1911_v47 = vrot.slane %v5717_v23, 1  ;;  %v1913_v55 = vrot.slane %v5720_v4, 1  ;;  %v6670_v17 = vrot.slane %v5723_v14, 1 }
 0x192   :  { %v1701_v50 = vadd.f32 %v1688_v25, %v1666_v62  ;;  %v1934_v59 = vmul.f32 -0.034302063, %v3398_v11  ;;  %v5732_v56 = vmul.f32 -0.034302063, %v3400_v12  ;;  %v5735_v6 = vmul.f32 -0.034302063, %v3402_v13 }
 0x193   :  { %v1813_v35 = vadd.f32 %v1802_v52, %v1778_v30  ;;  %v1912_v41 = vsel %vm72_vm0, %v1910_v24, %v1911_v47  ;;  %v1914_v2 = vsel %vm72_vm0, %v1911_v47, %v1913_v55  ;;  %v1916_v58 = vsel %vm72_vm0, %v1913_v55, %v6670_v17 }
 0x194   :  { %v7023_v32 = vrot.slane %v5641_v8, 6  ;;  %v1927_v34 = vadd.f32 %v1912_v41, %v1892_v21  ;;  %v1928_v60 = vadd.f32 %v1914_v2, %v5706_v19  ;;  %v1929_v62 = vadd.f32 %v1916_v58, %v5709_v57 }
 0x195   :  { %v1848_v48 = vadd.f32 %v1837_v45, %v1813_v35  ;;  %v1945_v42 = vrot.slane %v1933_v3, 2  ;;  %v1946_v37 = vrot.slane %v1934_v59, 2  ;;  %v1948_v52 = vrot.slane %v5732_v56, 2 }
 0x196   :  { %v1732_v25 = vadd.f32 %v7023_v32, %v1701_v50  ;;  %v1950_v30 = vrot.slane %v5735_v6, 2  ;;  %v1968_v47 = vmul.f32 0.080692895, %v3396_v10  ;;  %v5750_v55 = vmul.f32 0.080692895, %v3398_v11 }
 0x197   :  { %v1883_v17 = vadd.f32 %v1872_v54, %v1848_v48  ;;  %v1947_v21 = vsel %vm108_vm1, %v1945_v42, %v1946_v37  ;;  %v1949_v50 = vsel %vm108_vm1, %v1946_v37, %v1948_v52  ;;  %v2003_v41 = vmul.f32 -0.18151486, %v3396_v10 }
 0x198   :  { %v1767_v24 = vadd.f32 %v1755_v18, %v1732_v25  ;;  %v1951_v35 = vsel %vm108_vm1, %v1948_v52, %v1950_v30  ;;  %v1962_v18 = vadd.f32 %v1947_v21, %v1927_v34  ;;  %v1963_v2 = vadd.f32 %v1949_v50, %v1928_v60 }
 0x199   :  { %3331 = vst.msk [vmem:[%s6443_s2 + $0xbe] sm:$0xff] %vm399_vm8, %v1883_v17  ;;  %v1980_v58 = vrot.slane %v1968_v47, 3  ;;  %v1981_v48 = vrot.slane %v5750_v55, 3  ;;  %v2004_v42 = vmul.f32 -0.18151486, %v3398_v11  ;;  %v7024_v37 = vrot.slane %v5666_v1, 1 }
 0x19a   :  { %v1779_v3 = vadd.f32 %v1773_v29, %v1767_v24  ;;  %v2015_v32 = vrot.slane %v2003_v41, 4  ;;  %v2038_v29 = vmul.f32 0.62591106, %v3396_v10  ;;  %v2039_v25 = vmul.f32 0.62591106, %v3398_v11 }
 0x19b   :  { %v5767_v34 = vadd.f32 %v1951_v35, %v1929_v62  ;;  %v1982_v52 = vsel %vm144_vm2, %v1980_v58, %v1981_v48  ;;  %v2016_v24 = vrot.slane %v2004_v42, 4  ;;  %v2128_v17 = vrot.slane %v1934_v59, 1 }
 0x19c   :  { %v1814_v54 = vadd.f32 %v7024_v37, %v1779_v3  ;;  %v7025_v60 = vrot.slane %v5670_v0, 2  ;;  %v1997_v21 = vadd.f32 %v1982_v52, %v1962_v18  ;;  %v2050_v50 = vrot.slane %v2038_v29, 5 }
 0x19d   :  { %v2051_v45 = vrot.slane %v2039_v25, 5  ;;  %v2017_v1 = vsel %vm180_vm3, %v2015_v32, %v2016_v24  ;;  %v2073_v3 = vrot.slane %v2039_v25, 6  ;;  %v2129_v41 = vrot.slane %v5732_v56, 1 }
 0x19e   :  { %v1849_v47 = vadd.f32 %v7025_v60, %v1814_v54  ;;  %v2153_v37 = vrot.slane %v5717_v23, 2  ;;  %v7026_v11 = vrot.slane %v5673_v40, 3  ;;  %v2032_v35 = vadd.f32 %v2017_v1, %v1997_v21 }
 0x19f   :  { %v2052_v58 = vsel %vm216_vm4, %v2050_v50, %v2051_v45  ;;  %v2154_v59 = vrot.slane %v5720_v4, 2  ;;  %v2096_v0 = vrot.slane %v2004_v42, 7  ;;  %v2130_v18 = vsel %vm72_vm0, %v2128_v17, %v2129_v41 }
 0x1a0   :  { %v1884_v62 = vadd.f32 %v7026_v11, %v1849_v47  ;;  %v2183_v54 = vrot.slane %v5706_v19, 3  ;;  %v6673_v32 = vrot.slane %v5709_v57, 3  ;;  %v2067_v23 = vadd.f32 %v2052_v58, %v2032_v35 }
 0x1a1   :  { %v5787_v40 = vmul.f32 -0.0011951893, %v3402_v13  ;;  %v5790_v56 = vmul.f32 0.01084583, %v3478_v28  ;;  %v5793_v4 = vmul.f32 -0.034302063, %v3478_v28  ;;  %v2155_v42 = vsel %vm108_vm1, %v2153_v37, %v2154_v59 }
 0x1a2   :  { %3332 = vst.msk [vmem:[%s6443_s2 + $0xc6] sm:$0x3] %vm777_vm11, %v1884_v62  ;;  %v1970_v19 = vmul.f32 0.080692895, %v3400_v12  ;;  %v5798_v29 = vmul.f32 -0.18151486, %v3400_v12  ;;  %v2088_v52 = vadd.f32 %v2073_v3, %v2067_v23 }
 0x1a3   :  { %v5801_v25 = vmul.f32 0.62591106, %v3400_v12  ;;  %v1917_v17 = vrot.slane %v5790_v56, 1  ;;  %v1952_v60 = vrot.slane %v5793_v4, 2  ;;  %v2131_v47 = vrot.slane %v5735_v6, 1 }
 0x1a4   :  { %v1983_v21 = vrot.slane %v1970_v19, 3  ;;  %v2018_v50 = vrot.slane %v5798_v29, 4  ;;  %v2113_v11 = vadd.f32 %v2096_v0, %v2088_v52  ;;  %v7027_v62 = vrot.slane %v5723_v14, 1 }
 0x1a5   :  { %v2053_v1 = vrot.slane %v5801_v25, 5  ;;  %v2074_v37 = vrot.slane %v5801_v25, 6  ;;  %v1953_v35 = vsel %vm108_vm1, %v1950_v30, %v1952_v60  ;;  %v2097_v58 = vrot.slane %v5798_v29, 7 }
 0x1a6   :  { %v1918_v12 = vsel %vm72_vm0, %v7027_v62, %v1917_v17  ;;  %v2185_v6 = vsel %vm144_vm2, %v2183_v54, %v6673_v32  ;;  %v1984_v53 = vsel %vm144_vm2, %v1981_v48, %v1983_v21  ;;  %v2019_v8 = vsel %vm180_vm3, %v2016_v24, %v2018_v50 }
 0x1a7   :  { %v1930_v23 = vadd.f32 %v1918_v12, %v5787_v40  ;;  %v2120_v25 = vadd.f32 %v2113_v11, %v5750_v55  ;;  %v1998_v52 = vadd.f32 %v1984_v53, %v1963_v2  ;;  %v2054_v61 = vsel %vm216_vm4, %v2051_v45, %v2053_v1 }
 0x1a8   :  { %v2075_v62 = vsel %vm252_vm5, %v2073_v3, %v2074_v37  ;;  %v2098_v29 = vsel %vm276_vm6, %v2096_v0, %v2097_v58  ;;  %v2132_v36 = vsel %vm72_vm0, %v2129_v41, %v2131_v47  ;;  %v2156_v54 = vrot.slane %v5723_v14, 2 }
 0x1a9   :  { %v5823_v30 = vadd.f32 %v1953_v35, %v1930_v23  ;;  %v2145_v12 = vadd.f32 %v2130_v18, %v2120_v25  ;;  %v2033_v32 = vadd.f32 %v2019_v8, %v1998_v52  ;;  %v2186_v48 = vrot.slane %v5787_v40, 3 }
 0x1aa   :  { %v5830_v24 = vmul.f32 0.01084583, %v3572_v44  ;;  %v2157_v53 = vsel %vm108_vm1, %v2154_v59, %v2156_v54  ;;  %v5834_v55 = vmul.f32 -0.0011951893, %v3478_v28  ;;  %v5837_v45 = vmul.f32 -0.034302063, %v3572_v44 }
 0x1ab   :  { %v1971_v2 = vmul.f32 0.080692895, %v3402_v13  ;;  %v2170_v3 = vadd.f32 %v2155_v42, %v2145_v12  ;;  %v2068_v41 = vadd.f32 %v2054_v61, %v2033_v32  ;;  %v2006_v8 = vmul.f32 -0.18151486, %v3402_v13 }
 0x1ac   :  { %v1919_v14 = vrot.slane %v5830_v24, 1  ;;  %v1954_v0 = vrot.slane %v5837_v45, 2  ;;  %v2041_v40 = vmul.f32 0.62591106, %v3402_v13  ;;  %v2133_v59 = vrot.slane %v5793_v4, 1 }
 0x1ad   :  { %v1985_v18 = vrot.slane %v1971_v2, 3  ;;  %v2200_v11 = vadd.f32 %v2185_v6, %v2170_v3  ;;  %v2089_v35 = vadd.f32 %v2075_v62, %v2068_v41  ;;  %v2020_v25 = vrot.slane %v2006_v8, 4 }
 0x1ae   :  { %v1920_v23 = vsel %vm72_vm0, %v1917_v17, %v1919_v14  ;;  %v1955_v61 = vsel %vm108_vm1, %v1952_v60, %v1954_v0  ;;  %v2055_v42 = vrot.slane %v2041_v40, 5  ;;  %v2076_v62 = vrot.slane %v2041_v40, 6 }
 0x1af   :  { %v1931_v52 = vadd.f32 %v1920_v23, %v5834_v55  ;;  %v1986_v32 = vsel %vm144_vm2, %v1983_v21, %v1985_v18  ;;  %3333 = vst.msk [vmem:[%s6443_s2 + $0xc6] sm:$0xfc] %vm771_vm10, %v2200_v11  ;;  %v2114_v13 = vadd.f32 %v2098_v29, %v2089_v35  ;;  %v2021_v6 = vsel %vm180_vm3, %v2018_v50, %v2020_v25 }
 0x1b0   :  { %v1999_v4 = vadd.f32 %v1986_v32, %v5767_v34  ;;  %v7028_v17 = vrot.slane %v5709_v57, 3  ;;  %v2056_v60 = vsel %vm216_vm4, %v2053_v1, %v2055_v42  ;;  %v2099_v21 = vrot.slane %v2006_v8, 7 }
 0x1b1   :  { %v1966_v3 = vadd.f32 %v1955_v61, %v1931_v52  ;;  %v2121_v41 = vadd.f32 %v2114_v13, %v1970_v19  ;;  %v2134_v5 = vsel %vm72_vm0, %v2131_v47, %v2133_v59  ;;  %v2158_v11 = vrot.slane %v5790_v56, 2 }
 0x1b2   :  { %v2187_v12 = vsel %vm144_vm2, %v7028_v17, %v2186_v48  ;;  %v2034_v23 = vadd.f32 %v2021_v6, %v1999_v4  ;;  %v2077_v29 = vsel %vm252_vm5, %v2074_v37, %v2076_v62  ;;  %v2188_v34 = vrot.slane %v5834_v55, 3 }
 0x1b3   :  { %v5864_v50 = vmul.f32 -0.0011951893, %v3572_v44  ;;  %v1972_v57 = vmul.f32 0.080692895, %v3478_v28  ;;  %v2146_v40 = vadd.f32 %v2132_v36, %v2121_v41  ;;  %v2100_v1 = vsel %vm276_vm6, %v2097_v58, %v2099_v21 }
 0x1b4   :  { %v2069_v35 = vadd.f32 %v2056_v60, %v2034_v23  ;;  %v2007_v19 = vmul.f32 -0.18151486, %v3478_v28  ;;  %v2159_v8 = vsel %vm108_vm1, %v2156_v54, %v2158_v11  ;;  %v2042_v37 = vmul.f32 0.62591106, %v3478_v28 }
 0x1b5   :  { %v1932_v47 = vadd.f32 %v1919_v14, %v5864_v50  ;;  %v1987_v56 = vrot.slane %v1972_v57, 3  ;;  %v2171_v52 = vadd.f32 %v2157_v53, %v2146_v40  ;;  %v2189_v61 = vsel %vm144_vm2, %v2186_v48, %v2188_v34 }
 0x1b6   :  { %v2090_v55 = vadd.f32 %v2077_v29, %v2069_v35  ;;  %v2022_v32 = vrot.slane %v2007_v19, 4  ;;  %v2057_v36 = vrot.slane %v2042_v37, 5  ;;  %v2078_v4 = vrot.slane %v2042_v37, 6 }
 0x1b7   :  { %v1988_v13 = vsel %vm144_vm2, %v1985_v18, %v1987_v56  ;;  %v2101_v6 = vrot.slane %v2007_v19, 7  ;;  %v2201_v58 = vadd.f32 %v2187_v12, %v2171_v52  ;;  %v1967_v14 = vadd.f32 %v1954_v0, %v1932_v47 }
 0x1b8   :  { %v2115_v17 = vadd.f32 %v2100_v1, %v2090_v55  ;;  %v2000_v60 = vadd.f32 %v1988_v13, %v5823_v30  ;;  %v2023_v54 = vsel %vm180_vm3, %v2020_v25, %v2022_v32  ;;  %v2058_v41 = vsel %vm216_vm4, %v2055_v42, %v2057_v36 }
 0x1b9   :  { %v2079_v28 = vsel %vm252_vm5, %v2076_v62, %v2078_v4  ;;  %v2135_v53 = vrot.slane %v5837_v45, 1  ;;  %3334 = vst.msk [vmem:[%s6443_s2 + $0xce] sm:$0xff] %vm399_vm8, %v2201_v58  ;;  %v2160_v12 = vrot.slane %v5830_v24, 2  ;;  %v2190_v30 = vrot.slane %v5864_v50, 3 }
 0x1ba   :  { %v2122_v48 = vadd.f32 %v2115_v17, %v1971_v2  ;;  %v2035_v18 = vadd.f32 %v2023_v54, %v2000_v60  ;;  %v2102_v25 = vsel %vm276_vm6, %v2099_v21, %v2101_v6  ;;  %v1973_v0 = vmul.f32 0.080692895, %v3572_v44 }
 0x1bb   :  { %v2008_v42 = vmul.f32 -0.18151486, %v3572_v44  ;;  %v2043_v62 = vmul.f32 0.62591106, %v3572_v44  ;;  %v2136_v29 = vsel %vm72_vm0, %v2133_v59, %v2135_v53  ;;  %v2161_v40 = vsel %vm108_vm1, %v2158_v11, %v2160_v12 }
 0x1bc   :  { %v2147_v45 = vadd.f32 %v2134_v5, %v2122_v48  ;;  %v2070_v23 = vadd.f32 %v2058_v41, %v2035_v18  ;;  %v1989_v2 = vrot.slane %v1973_v0, 3  ;;  %v2191_v21 = vsel %vm144_vm2, %v2188_v34, %v2190_v30 }
 0x1bd   :  { %v2024_v35 = vrot.slane %v2008_v42, 4  ;;  %v2059_v1 = vrot.slane %v2043_v62, 5  ;;  %v2080_v24 = vrot.slane %v2043_v62, 6  ;;  %v2126_v47 = vmul.f32 -0.034302063, %v3620_v33 }
 0x1be   :  { %v2172_v19 = vadd.f32 %v2159_v8, %v2147_v45  ;;  %v2091_v50 = vadd.f32 %v2079_v28, %v2070_v23  ;;  %v1990_v37 = vsel %vm144_vm2, %v1987_v56, %v1989_v2  ;;  %v2002_v52 = vadd.f32 %v1989_v2, %v1967_v14 }
 0x1bf   :  { %v2025_v44 = vsel %vm180_vm3, %v2022_v32, %v2024_v35  ;;  %v2103_v5 = vrot.slane %v2008_v42, 7  ;;  %v2001_v13 = vadd.f32 %v1990_v37, %v1966_v3  ;;  %v2060_v11 = vsel %vm216_vm4, %v2057_v36, %v2059_v1 }
 0x1c0   :  { %v2202_v55 = vadd.f32 %v2189_v61, %v2172_v19  ;;  %v2116_v59 = vadd.f32 %v2102_v25, %v2091_v50  ;;  %v2081_v58 = vsel %vm252_vm5, %v2078_v4, %v2080_v24  ;;  %v2137_v17 = vrot.slane %v2126_v47, 1 }
 0x1c1   :  { %v2151_v8 = vmul.f32 0.01084583, %v3620_v33  ;;  %v2176_v34 = vmul.f32 -0.0011951893, %v3620_v33  ;;  %v2036_v32 = vadd.f32 %v2025_v44, %v2001_v13  ;;  %v2037_v60 = vadd.f32 %v2024_v35, %v2002_v52 }
 0x1c2   :  { %3335 = vst.msk [vmem:[%s6443_s2 + $0xd6] sm:$0xff] %vm399_vm8, %v2202_v55  ;;  %v2123_v56 = vadd.f32 %v2116_v59, %v1972_v57  ;;  %v2094_v61 = vmul.f32 -0.18151486, %v3620_v33  ;;  %v2104_v3 = vsel %vm276_vm6, %v2101_v6, %v2103_v5  ;;  %v2138_v36 = vsel %vm72_vm0, %v2135_v53, %v2137_v17 }
 0x1c3   :  { %v2162_v4 = vrot.slane %v2151_v8, 2  ;;  %v2192_v54 = vrot.slane %v2176_v34, 3  ;;  %v2071_v41 = vadd.f32 %v2060_v11, %v2036_v32  ;;  %v2072_v28 = vadd.f32 %v2059_v1, %v2037_v60  ;;  %v7033_v32 = vld [vmem:[#allocation144_spill] sm:$0xff] }
 0x1c4   :  { %v2148_v14 = vadd.f32 %v2136_v29, %v2123_v56  ;;  %v2105_v48 = vrot.slane %v2094_v61, 7  ;;  %v2119_v25 = vmul.f32 0.080692895, %v3620_v33  ;;  %v2294_v57 = vmul.f32 -0.16087934, %v3396_v10 }
 0x1c5   :  { %v2163_v18 = vsel %vm108_vm1, %v2160_v12, %v2162_v4  ;;  %v2319_v42 = vmul.f32 0.49537602, %v3396_v10  ;;  %v2092_v45 = vadd.f32 %v2081_v58, %v2071_v41  ;;  %v2093_v23 = vadd.f32 %v2080_v24, %v2072_v28  ;;  %v7031_v58 = vld [vmem:[#allocation142_spill] sm:$0xff]  ;;  %v7035_v41 = vld [vmem:[#allocation149_spill] sm:$0xff] }
 0x1c6   :  { %v2173_v62 = vadd.f32 %v2161_v40, %v2148_v14  ;;  %v2106_v6 = vsel %vm276_vm6, %v2103_v5, %v2105_v48  ;;  %v2193_v53 = vsel %vm144_vm2, %v2190_v30, %v2192_v54  ;;  %v2296_v2 = vrot.slane %v2294_v57, 4  ;;  %v7034_v14 = vld [vmem:[#allocation150_spill] sm:$0xff]  ;;  %v7037_v48 = vld [vmem:[#allocation143_spill] sm:$0xff] }
 0x1c7   :  { %v2321_v29 = vrot.slane %v2319_v42, 5  ;;  %v2344_v35 = vrot.slane %v5228_v51, 6  ;;  %v2117_v19 = vadd.f32 %v2104_v3, %v2092_v45  ;;  %v2118_v12 = vadd.f32 %v2106_v6, %v2093_v23  ;;  %v7040_v42 = vld [vmem:[#allocation151_spill] sm:$0xff]  ;;  %v7041_v45 = vld [vmem:[#allocation148_spill] sm:$0xff] }
 0x1c8   :  { %v2203_v1 = vadd.f32 %v2191_v21, %v2173_v62  ;;  %v2399_v50 = vrot.slane %v5201_v46, 1  ;;  %v7029_v47 = vrot.slane %v5238_v38, 4  ;;  %v7030_v40 = vrot.slane %v5234_v43, 5 }
 0x1c9   :  { %v2400_v52 = vrot.slane %v5336_v16, 1  ;;  %v2424_v30 = vrot.slane %v5188_v9, 2  ;;  %v2124_v51 = vadd.f32 %v2117_v19, %v1973_v0  ;;  %v2125_v21 = vadd.f32 %v2119_v25, %v2118_v12 }
 0x1ca   :  { %v2298_v37 = vsel %vm180_vm3, %v2296_v2, %v7029_v47  ;;  %v2323_v24 = vsel %vm216_vm4, %v2321_v29, %v7030_v40  ;;  %3336 = vst.msk [vmem:[%s6443_s2 + $0xde] sm:$0xff] %vm399_vm8, %v2203_v1  ;;  %v2425_v38 = vrot.slane %v5328_v26, 2  ;;  %v2367_v44 = vrot.slane %v5221_v15, 7  ;;  %v7043_v29 = vld [vmem:[#allocation146_spill] sm:$0xff]  ;;  %v7044_v1 = vld [vmem:[#allocation153_spill] sm:$0xff] }
 0x1cb   :  { %v2313_v46 = vadd.f32 %v2298_v37, %v5352_v20  ;;  %v2454_v5 = vrot.slane %v5325_v7, 3  ;;  %v2455_v55 = vrot.slane %v5425_v63, 3  ;;  %v2314_v9 = vadd.f32 %v5538_v49, %v5421_v27  ;;  %v7045_v37 = vld [vmem:[#allocation152_spill] sm:$0xff] }
 0x1cc   :  { %v2149_v16 = vadd.f32 %v2138_v36, %v2124_v51  ;;  %v2150_v59 = vadd.f32 %v2137_v17, %v2125_v21  ;;  %v2401_v11 = vsel %vm72_vm0, %v2399_v50, %v2400_v52  ;;  %v2426_v0 = vsel %vm108_vm1, %v2424_v30, %v2425_v38 }
 0x1cd   :  { %v2338_v13 = vadd.f32 %v2323_v24, %v2313_v46  ;;  %v2324_v20 = vrot.slane %v5350_v22, 5  ;;  %v2345_v26 = vrot.slane %v5347_v39, 6  ;;  %v2368_v15 = vrot.slane %v7031_v58, 7  ;;  %v7046_v46 = vld [vmem:[#allocation141_spill] sm:$0xff] }
 0x1ce   :  { %v2174_v8 = vadd.f32 %v2163_v18, %v2149_v16  ;;  %v2175_v7 = vadd.f32 %v2162_v4, %v2150_v59  ;;  %v2402_v63 = vrot.slane %v5431_v31, 1  ;;  %v2456_v27 = vsel %vm144_vm2, %v2454_v5, %v2455_v55  ;;  %v7047_v5 = vld [vmem:[#allocation161_spill] sm:$0xff]  ;;  %v7048_v59 = vld [vmem:[#allocation158_spill] sm:$0xff] }
 0x1cf   :  { %v2359_v34 = vadd.f32 %v2344_v35, %v2338_v13  ;;  %v7032_v49 = vmov %v7030_v40  ;;  %v2346_v56 = vsel %vm252_vm5, %v2344_v35, %v2345_v26  ;;  %v2427_v60 = vrot.slane %v7033_v32, 2  ;;  %v7054_v32 = vld [vmem:[#allocation155_spill] sm:$0xff] }
 0x1d0   :  { %v2325_v17 = vsel %vm216_vm4, %v7032_v49, %v2324_v20  ;;  %v2204_v22 = vadd.f32 %v2193_v53, %v2174_v8  ;;  %v2205_v61 = vadd.f32 %v2192_v54, %v2175_v7  ;;  %v2369_v36 = vsel %vm276_vm6, %v2367_v44, %v2368_v15  ;;  %v7039_v54 = vld [vmem:[#allocation140_spill] sm:$0xff]  ;;  %v7042_v53 = vld [vmem:[#allocation147_spill] sm:$0xff] }
 0x1d1   :  { %v2384_v39 = vadd.f32 %v2367_v44, %v2359_v34  ;;  %v2339_v3 = vadd.f32 %v2325_v17, %v2314_v9  ;;  %v2403_v4 = vsel %vm72_vm0, %v2400_v52, %v2402_v63  ;;  %v2457_v31 = vrot.slane %v7034_v14, 3  ;;  %v7052_v8 = vld [vmem:[#allocation156_spill] sm:$0xff] }
 0x1d2   :  { %v7036_v28 = vrot.slane %v7035_v41, 4  ;;  %v7038_v43 = vrot.slane %v7037_v48, 4  ;;  %3337 = vst.msk [vmem:[%s6443_s2 + $0xe6] sm:$0xff] %vm399_vm8, %v2204_v22  ;;  %v2326_v23 = vrot.slane %v7041_v45, 5  ;;  %v2428_v6 = vsel %vm108_vm1, %v2425_v38, %v2427_v60  ;;  %v7053_v34 = vld [vmem:[#allocation160_spill] sm:$0xff]  ;;  %v7058_v48 = vld [vmem:[#allocation167_spill] sm:$0xff] }
 0x1d3   :  { %3338 = vst.msk [vmem:[%s6443_s2 + $0xee] sm:$0x3] %vm777_vm11, %v2205_v61  ;;  %v2391_v25 = vadd.f32 %v2384_v39, %v7039_v54  ;;  %v2360_v57 = vadd.f32 %v2346_v56, %v2339_v3  ;;  %v2347_v2 = vrot.slane %v7042_v53, 6  ;;  %v2370_v35 = vrot.slane %v7043_v29, 7  ;;  %v7062_v53 = vld [vmem:[#allocation170_spill] sm:$0xff] }
 0x1d4   :  { %v2302_v18 = vsel %vm180_vm3, %v7038_v43, %v7036_v28  ;;  %v2404_v19 = vrot.slane %v7044_v1, 1  ;;  %v2327_v47 = vsel %vm216_vm4, %v2324_v20, %v2326_v23  ;;  %v2429_v40 = vrot.slane %v7045_v37, 2  ;;  %v7064_v1 = vld [vmem:[#allocation165_spill] sm:$0xff] }
 0x1d5   :  { %v2315_v62 = vadd.f32 %v2302_v18, %v7040_v42  ;;  %v2416_v12 = vadd.f32 %v2401_v11, %v2391_v25  ;;  %v2385_v50 = vadd.f32 %v2369_v36, %v2360_v57  ;;  %v2458_v24 = vsel %vm144_vm2, %v2455_v55, %v2457_v31  ;;  %v7051_v55 = vld [vmem:[#allocation157_spill] sm:$0xff]  ;;  %v7056_v36 = vld [vmem:[#allocation159_spill] sm:$0xff] }
 0x1d6   :  { %v2348_v30 = vsel %vm252_vm5, %v2345_v26, %v2347_v2  ;;  %v2371_v51 = vsel %vm276_vm6, %v2368_v15, %v2370_v35  ;;  %v2405_v44 = vsel %vm72_vm0, %v2402_v63, %v2404_v19  ;;  %v2459_v9 = vrot.slane %v7047_v5, 3 }
 0x1d7   :  { %v2340_v52 = vadd.f32 %v2327_v47, %v2315_v62  ;;  %v2441_v21 = vadd.f32 %v2426_v0, %v2416_v12  ;;  %v2392_v38 = vadd.f32 %v2385_v50, %v7046_v46  ;;  %v7049_v13 = vrot.slane %v7048_v59, 4  ;;  %v7061_v62 = vld [vmem:[#allocation168_spill] sm:$0xff] }
 0x1d8   :  { %v7050_v11 = vmov %v7036_v28  ;;  %v2328_v58 = vrot.slane %v7051_v55, 5  ;;  %v2349_v26 = vrot.slane %v7052_v8, 6  ;;  %v2430_v0 = vsel %vm108_vm1, %v2427_v60, %v2429_v40  ;;  %v7065_v50 = vld [vmem:[#allocation164_spill] sm:$0xff] }
 0x1d9   :  { %v2361_v16 = vadd.f32 %v2348_v30, %v2340_v52  ;;  %v2304_v20 = vsel %vm180_vm3, %v7050_v11, %v7049_v13  ;;  %v2471_v7 = vadd.f32 %v2456_v27, %v2441_v21  ;;  %v2417_v15 = vadd.f32 %v2403_v4, %v2392_v38  ;;  %v7055_v27 = vld [vmem:[#allocation162_spill] sm:$0xff]  ;;  %v7057_v4 = vld [vmem:[#allocation145_spill] sm:$0xff] }
 0x1da   :  { %v2316_v49 = vadd.f32 %v2304_v20, %v7053_v34  ;;  %v2329_v17 = vsel %vm216_vm4, %v2326_v23, %v2328_v58  ;;  %v2350_v56 = vsel %vm252_vm5, %v2347_v2, %v2349_v26  ;;  %v2372_v22 = vrot.slane %v7054_v32, 7  ;;  %v7066_v30 = vld [vmem:[#allocation154_spill] sm:$0xff]  ;;  %v7067_v20 = vld [vmem:[#allocation169_spill] sm:$0xff] }
 0x1db   :  { %v2386_v63 = vadd.f32 %v2371_v51, %v2361_v16  ;;  %3339 = vst.msk [vmem:[%s6443_s2 + $0xee] sm:$0xfc] %vm771_vm10, %v2471_v7  ;;  %v2442_v61 = vadd.f32 %v2428_v6, %v2417_v15  ;;  %v2406_v3 = vrot.slane %v7055_v27, 1  ;;  %v2431_v60 = vrot.slane %v7056_v36, 2 }
 0x1dc   :  { %v2341_v39 = vadd.f32 %v2329_v17, %v2316_v49  ;;  %v2460_v41 = vsel %vm144_vm2, %v2457_v31, %v2459_v9  ;;  %v2373_v28 = vsel %vm276_vm6, %v2370_v35, %v2372_v22  ;;  %v7059_v43 = vrot.slane %v7058_v48, 4  ;;  %v7063_v31 = vld [vmem:[#allocation166_spill] sm:$0xff]  ;;  %v7072_v48 = vld [vmem:[#allocation103_spill] sm:$0xff] }
 0x1dd   :  { %v2393_v14 = vadd.f32 %v2386_v63, %v7057_v4  ;;  %v7060_v18 = vmov %v7049_v13  ;;  %v2472_v25 = vadd.f32 %v2458_v24, %v2442_v61  ;;  %v2407_v42 = vsel %vm72_vm0, %v2404_v19, %v2406_v3  ;;  %v7069_v61 = vld [vmem:[#allocation98_spill] sm:$0xff] }
 0x1de   :  { %v2306_v54 = vsel %vm180_vm3, %v7060_v18, %v7059_v43  ;;  %v2362_v57 = vadd.f32 %v2350_v56, %v2341_v39  ;;  %v2461_v45 = vrot.slane %v7061_v62, 3  ;;  %v2432_v6 = vsel %vm108_vm1, %v2429_v40, %v2431_v60 }
 0x1df   :  { %v2418_v23 = vadd.f32 %v2405_v44, %v2393_v14  ;;  %v2317_v2 = vadd.f32 %v2306_v54, %v7062_v53  ;;  %v2330_v29 = vrot.slane %v7063_v31, 5  ;;  %3340 = vst.msk [vmem:[%s6443_s2 + $0xf6] sm:$0xff] %vm399_vm8, %v2472_v25  ;;  %v2351_v12 = vrot.slane %v7064_v1, 6  ;;  %v7073_v25 = vld [vmem:[#allocation97_spill] sm:$0xff]  ;;  %v7077_v53 = vld [vmem:[#allocation99_spill] sm:$0xff] }
 0x1e0   :  { %v2387_v35 = vadd.f32 %v2373_v28, %v2362_v57  ;;  %v2374_v47 = vrot.slane %v7065_v50, 7  ;;  %v2397_v19 = vmul.f32 -0.034585986, %v3620_v33  ;;  %v2422_v40 = vmul.f32 0.011326861, %v3620_v33 }
 0x1e1   :  { %v2443_v37 = vadd.f32 %v2430_v0, %v2418_v23  ;;  %v2331_v24 = vsel %vm216_vm4, %v2328_v58, %v2330_v29  ;;  %v6017_v52 = vmul.f32 -0.0015148092, %v3620_v33  ;;  %v2352_v46 = vsel %vm252_vm5, %v2349_v26, %v2351_v12 }
 0x1e2   :  { %v2394_v51 = vadd.f32 %v2387_v35, %v7066_v30  ;;  %v2342_v21 = vadd.f32 %v2331_v24, %v2317_v2  ;;  %v2375_v38 = vsel %vm276_vm6, %v2372_v22, %v2374_v47  ;;  %v2408_v5 = vrot.slane %v2397_v19, 1  ;;  %v7079_v35 = vld [vmem:[#allocation102_spill] sm:$0xff]  ;;  %v7083_v30 = vld [vmem:[#allocation109_spill] sm:$0xff] }
 0x1e3   :  { %v2473_v44 = vadd.f32 %v2460_v41, %v2443_v37  ;;  %v2433_v16 = vrot.slane %v2422_v40, 2  ;;  %v2463_v59 = vrot.slane %v6017_v52, 3  ;;  %v7068_v55 = vmov %v7059_v43  ;;  %v7071_v41 = vld [vmem:[#allocation95_spill] sm:$0xff]  ;;  %v7081_v37 = vld [vmem:[#allocation101_spill] sm:$0xff]  ;;  %v7082_v40 = vld [vmem:[#allocation114_spill] sm:$0xff] }
 0x1e4   :  { %v2419_v13 = vadd.f32 %v2407_v42, %v2394_v51  ;;  %v2363_v11 = vadd.f32 %v2352_v46, %v2342_v21  ;;  %v2318_v58 = vadd.f32 %v7068_v55, %v7067_v20  ;;  %v2365_v8 = vmul.f32 -0.18611091, %v3620_v33  ;;  %v7074_v42 = vld [vmem:[#allocation94_spill] sm:$0xff] }
 0x1e5   :  { %3341 = vst.msk [vmem:[%s6443_s2 + $0xfe] sm:$0xff] %vm399_vm8, %v2473_v44  ;;  %v2462_v26 = vsel %vm144_vm2, %v2459_v9, %v2461_v45  ;;  %v2409_v7 = vsel %vm72_vm0, %v2406_v3, %v2408_v5  ;;  %v2434_v15 = vsel %vm108_vm1, %v2431_v60, %v2433_v16  ;;  %v2390_v0 = vmul.f32 0.08103472, %v3620_v33  ;;  %v7070_v9 = vld [vmem:[#allocation163_spill] sm:$0xff] }
 0x1e6   :  { %v2444_v34 = vadd.f32 %v2432_v6, %v2419_v13  ;;  %v2388_v49 = vadd.f32 %v2375_v38, %v2363_v11  ;;  %v2343_v63 = vadd.f32 %v2330_v29, %v2318_v58  ;;  %v2376_v17 = vrot.slane %v2365_v8, 7  ;;  %v7086_v38 = vld [vmem:[#allocation108_spill] sm:$0xff]  ;;  %v7087_v13 = vld [vmem:[#allocation106_spill] sm:$0xff] }
 0x1e7   :  { %v2464_v56 = vsel %vm144_vm2, %v2461_v45, %v2463_v59  ;;  %v2565_v32 = vmul.f32 -0.1285575, %v3396_v10  ;;  %v2590_v22 = vmul.f32 0.36150613, %v3396_v10  ;;  %v2615_v39 = vrot.slane %v7069_v61, 6  ;;  %v7075_v45 = vld [vmem:[#allocation100_spill] sm:$0xff] }
 0x1e8   :  { %v2474_v27 = vadd.f32 %v2462_v26, %v2444_v34  ;;  %v2395_v36 = vadd.f32 %v2388_v49, %v7070_v9  ;;  %v2364_v3 = vadd.f32 %v2351_v12, %v2343_v63  ;;  %v2377_v60 = vsel %vm276_vm6, %v2374_v47, %v2376_v17  ;;  %v7080_v47 = vld [vmem:[#allocation107_spill] sm:$0xff]  ;;  %v7088_v8 = vld [vmem:[#allocation110_spill] sm:$0xff]  ;;  %v7090_v49 = vld [vmem:[#allocation105_spill] sm:$0xff] }
 0x1e9   :  { %v2567_v4 = vrot.slane %v2565_v32, 4  ;;  %v2592_v14 = vrot.slane %v2590_v22, 5  ;;  %v2670_v28 = vrot.slane %v7071_v41, 1  ;;  %v2671_v43 = vrot.slane %v7072_v48, 1  ;;  %v7091_v32 = vld [vmem:[#allocation112_spill] sm:$0xff] }
 0x1ea   :  { %3342 = vst.msk [vmem:[%s6443_s2 + $0x106] sm:$0xff] %vm399_vm8, %v2474_v27  ;;  %v2420_v18 = vadd.f32 %v2409_v7, %v2395_v36  ;;  %v2389_v54 = vadd.f32 %v2377_v60, %v2364_v3  ;;  %v2638_v57 = vrot.slane %v7073_v25, 7  ;;  %v2695_v62 = vrot.slane %v7074_v42, 2  ;;  %v7092_v27 = vld [vmem:[#allocation111_spill] sm:$0xff]  ;;  %v7094_v60 = vld [vmem:[#allocation118_spill] sm:$0xff]  ;;  %v7097_v25 = vld [vmem:[#allocation120_spill] sm:$0xff] }
 0x1eb   :  { %v7076_v23 = vrot.slane %v7075_v45, 4  ;;  %v7078_v2 = vrot.slane %v7077_v53, 5  ;;  %v2672_v29 = vsel %vm72_vm0, %v2670_v28, %v2671_v43  ;;  %v2696_v1 = vrot.slane %v7079_v35, 2  ;;  %v7093_v36 = vld [vmem:[#allocation119_spill] sm:$0xff] }
 0x1ec   :  { %v2445_v12 = vadd.f32 %v2434_v15, %v2420_v18  ;;  %v2396_v50 = vadd.f32 %v2390_v0, %v2389_v54  ;;  %v2725_v24 = vrot.slane %v7081_v37, 3  ;;  %v2726_v52 = vrot.slane %v7082_v40, 3  ;;  %v7104_v37 = vld [vmem:[#allocation104_spill] sm:$0xff] }
 0x1ed   :  { %v2569_v6 = vsel %vm180_vm3, %v2567_v4, %v7076_v23  ;;  %v2594_v31 = vsel %vm216_vm4, %v2592_v14, %v7078_v2  ;;  %v7084_v51 = vrot.slane %v7083_v30, 4  ;;  %v7085_v21 = vmov %v7076_v23  ;;  %v7099_v23 = vld [vmem:[#allocation96_spill] sm:$0xff] }
 0x1ee   :  { %v2584_v19 = vadd.f32 %v2569_v6, %v7080_v47  ;;  %v2595_v44 = vrot.slane %v7086_v38, 5  ;;  %v2616_v11 = vrot.slane %v7087_v13, 6  ;;  %v2475_v20 = vadd.f32 %v2464_v56, %v2445_v12  ;;  %v7105_v38 = vld [vmem:[#allocation131_spill] sm:$0xff] }
 0x1ef   :  { %v2571_v46 = vsel %vm180_vm3, %v7085_v21, %v7084_v51  ;;  %v2421_v55 = vadd.f32 %v2408_v5, %v2396_v50  ;;  %v2697_v7 = vsel %vm108_vm1, %v2695_v62, %v2696_v1  ;;  %v7089_v15 = vmov %v7078_v2  ;;  %v7098_v62 = vld [vmem:[#allocation117_spill] sm:$0xff]  ;;  %v7101_v2 = vld [vmem:[#allocation115_spill] sm:$0xff] }
 0x1f0   :  { %v2609_v58 = vadd.f32 %v2594_v31, %v2584_v19  ;;  %v2585_v26 = vadd.f32 %v2571_v46, %v7088_v8  ;;  %v2596_v0 = vsel %vm216_vm4, %v7089_v15, %v2595_v44  ;;  %v2617_v34 = vsel %vm252_vm5, %v2615_v39, %v2616_v11  ;;  %3343 = vst.msk [vmem:[%s6443_s2 + $0x10e] sm:$0xff] %vm399_vm8, %v2475_v20  ;;  %v7103_v50 = vld [vmem:[#allocation121_spill] sm:$0xff] }
 0x1f1   :  { %v2639_v63 = vrot.slane %v7090_v49, 7  ;;  %v2446_v17 = vadd.f32 %v2433_v16, %v2421_v55  ;;  %v2673_v22 = vrot.slane %v7091_v32, 1  ;;  %v2698_v9 = vrot.slane %v7092_v27, 2  ;;  %v7106_v55 = vld [vmem:[#allocation127_spill] sm:$0xff] }
 0x1f2   :  { %v2630_v5 = vadd.f32 %v2615_v39, %v2609_v58  ;;  %v2610_v56 = vadd.f32 %v2596_v0, %v2585_v26  ;;  %v2728_v3 = vrot.slane %v7093_v36, 3  ;;  %v7095_v4 = vrot.slane %v7094_v60, 4  ;;  %v7109_v26 = vld [vmem:[#allocation130_spill] sm:$0xff]  ;;  %v7114_v36 = vld [vmem:[#allocation128_spill] sm:$0xff] }
 0x1f3   :  { %v2640_v61 = vsel %vm276_vm6, %v2638_v57, %v2639_v63  ;;  %v7096_v14 = vmov %v7084_v51  ;;  %v2476_v28 = vadd.f32 %v2463_v59, %v2446_v17  ;;  %v2727_v16 = vsel %vm144_vm2, %v2725_v24, %v2726_v52 }
 0x1f4   :  { %v2573_v41 = vsel %vm180_vm3, %v7096_v14, %v7095_v4  ;;  %v2655_v48 = vadd.f32 %v2638_v57, %v2630_v5  ;;  %v2631_v39 = vadd.f32 %v2617_v34, %v2610_v56  ;;  %v2674_v18 = vsel %vm72_vm0, %v2671_v43, %v2673_v22  ;;  %v7100_v57 = vld [vmem:[#allocation116_spill] sm:$0xff]  ;;  %v7111_v34 = vld [vmem:[#allocation125_spill] sm:$0xff] }
 0x1f5   :  { %v2699_v54 = vsel %vm108_vm1, %v2696_v1, %v2698_v9  ;;  %v2586_v42 = vadd.f32 %v2573_v41, %v7097_v25  ;;  %v2597_v45 = vrot.slane %v7098_v62, 5  ;;  %3344 = vst.msk [vmem:[%s6443_s2 + $0x116] sm:$0x3] %vm777_vm11, %v2476_v28  ;;  %v2618_v53 = vrot.slane %v7100_v57, 6  ;;  %v7102_v1 = vld [vmem:[#allocation122_spill] sm:$0xff]  ;;  %v7115_v14 = vld [vmem:[#allocation113_spill] sm:$0xff] }
 0x1f6   :  { %v2662_v6 = vadd.f32 %v2655_v48, %v7099_v23  ;;  %v2656_v59 = vadd.f32 %v2640_v61, %v2631_v39  ;;  %v2641_v31 = vrot.slane %v7101_v2, 7  ;;  %v2729_v43 = vsel %vm144_vm2, %v2726_v52, %v2728_v3  ;;  %v7116_v39 = vld [vmem:[#allocation136_spill] sm:$0xff]  ;;  %v7121_v57 = vld [vmem:[#allocation134_spill] sm:$0xff]  ;;  %v7122_v2 = vld [vmem:[#allocation139_spill] sm:$0xff] }
 0x1f7   :  { %v2598_v35 = vsel %vm216_vm4, %v2595_v44, %v2597_v45  ;;  %v2675_v12 = vrot.slane %v7102_v1, 1  ;;  %v2700_v47 = vrot.slane %v7103_v50, 2  ;;  %v2619_v30 = vsel %vm252_vm5, %v2616_v11, %v2618_v53  ;;  %v7110_v11 = vld [vmem:[#allocation126_spill] sm:$0xff] }
 0x1f8   :  { %v2687_v19 = vadd.f32 %v2672_v29, %v2662_v6  ;;  %v2663_v24 = vadd.f32 %v2656_v59, %v7104_v37  ;;  %v2611_v40 = vadd.f32 %v2598_v35, %v2586_v42  ;;  %v2642_v51 = vsel %vm276_vm6, %v2639_v63, %v2641_v31  ;;  %v7112_v63 = vld [vmem:[#allocation124_spill] sm:$0xff]  ;;  %v7119_v42 = vld [vmem:[#allocation135_spill] sm:$0xff]  ;;  %v7120_v6 = vld [vmem:[#allocation138_spill] sm:$0xff] }
 0x1f9   :  { %v2676_v21 = vsel %vm72_vm0, %v2673_v22, %v2675_v12  ;;  %v2701_v46 = vsel %vm108_vm1, %v2698_v9, %v2700_v47  ;;  %v2730_v52 = vrot.slane %v7105_v38, 3  ;;  %v7107_v58 = vrot.slane %v7106_v55, 4  ;;  %v7123_v35 = vld [vmem:[#allocation133_spill] sm:$0xff]  ;;  %v7124_v38 = vld [vmem:[#allocation123_spill] sm:$0xff] }
 0x1fa   :  { %v2712_v13 = vadd.f32 %v2697_v7, %v2687_v19  ;;  %v2688_v44 = vadd.f32 %v2674_v18, %v2663_v24  ;;  %v2632_v20 = vadd.f32 %v2619_v30, %v2611_v40  ;;  %v7108_v29 = vmov %v7095_v4  ;;  %v7113_v7 = vld [vmem:[#allocation129_spill] sm:$0xff] }
 0x1fb   :  { %v2575_v8 = vsel %vm180_vm3, %v7108_v29, %v7107_v58  ;;  %v2599_v0 = vrot.slane %v7110_v11, 5  ;;  %v2620_v49 = vrot.slane %v7111_v34, 6  ;;  %v2643_v17 = vrot.slane %v7112_v63, 7 }
 0x1fc   :  { %v2587_v15 = vadd.f32 %v2575_v8, %v7109_v26  ;;  %v2742_v5 = vadd.f32 %v2727_v16, %v2712_v13  ;;  %v2713_v56 = vadd.f32 %v2699_v54, %v2688_v44  ;;  %v2657_v32 = vadd.f32 %v2642_v51, %v2632_v20  ;;  %v7125_v20 = vld [vmem:[#allocation137_spill] sm:$0xff] }
 0x1fd   :  { %v2677_v22 = vrot.slane %v7113_v7, 1  ;;  %v2731_v61 = vsel %vm144_vm2, %v2728_v3, %v2730_v52  ;;  %v2600_v27 = vsel %vm216_vm4, %v2597_v45, %v2599_v0  ;;  %v2621_v9 = vsel %vm252_vm5, %v2618_v53, %v2620_v49 }
 0x1fe   :  { %v2702_v60 = vrot.slane %v7114_v36, 2  ;;  %3345 = vst.msk [vmem:[%s6443_s2 + $0x116] sm:$0xfc] %vm771_vm10, %v2742_v5  ;;  %v2743_v4 = vadd.f32 %v2729_v43, %v2713_v56  ;;  %v2664_v41 = vadd.f32 %v2657_v32, %v7115_v14  ;;  %v2612_v28 = vadd.f32 %v2600_v27, %v2587_v15  ;;  %v7127_v56 = vld [vmem:[#allocation132_spill] sm:$0xff] }
 0x1ff   :  { %v2644_v48 = vsel %vm276_vm6, %v2641_v31, %v2643_v17  ;;  %v2678_v16 = vsel %vm72_vm0, %v2675_v12, %v2677_v22  ;;  %v7117_v18 = vrot.slane %v7116_v39, 4  ;;  %v7118_v54 = vmov %v7107_v58  ;;  %v7131_v39 = vld [vmem:[#allocation49_spill] sm:$0xff] }
 0x200   :  { %v2703_v3 = vsel %vm108_vm1, %v2700_v47, %v2702_v60  ;;  %v2601_v62 = vrot.slane %v7119_v42, 5  ;;  %3346 = vst.msk [vmem:[%s6443_s2 + $0x11e] sm:$0xff] %vm399_vm8, %v2743_v4  ;;  %v2689_v45 = vadd.f32 %v2676_v21, %v2664_v41  ;;  %v2633_v23 = vadd.f32 %v2621_v9, %v2612_v28  ;;  %v7133_v42 = vld [vmem:[#allocation48_spill] sm:$0xff] }
 0x201   :  { %v2577_v25 = vsel %vm180_vm3, %v7118_v54, %v7117_v18  ;;  %v2622_v53 = vrot.slane %v7121_v57, 6  ;;  %v2732_v31 = vrot.slane %v7122_v2, 3  ;;  %v2645_v1 = vrot.slane %v7123_v35, 7  ;;  %v7132_v54 = vld [vmem:[#allocation57_spill] sm:$0xff]  ;;  %v7138_v35 = vld [vmem:[#allocation56_spill] sm:$0xff] }
 0x202   :  { %v2588_v59 = vadd.f32 %v2577_v25, %v7120_v6  ;;  %v2602_v43 = vsel %vm216_vm4, %v2599_v0, %v2601_v62  ;;  %v2668_v12 = vmul.f32 -0.030875737, %v3620_v33  ;;  %v2714_v50 = vadd.f32 %v2701_v46, %v2689_v45  ;;  %v7134_v6 = vld [vmem:[#allocation60_spill] sm:$0xff]  ;;  %v7135_v57 = vld [vmem:[#allocation53_spill] sm:$0xff] }
 0x203   :  { %v2658_v47 = vadd.f32 %v2644_v48, %v2633_v23  ;;  %v2623_v37 = vsel %vm252_vm5, %v2620_v49, %v2622_v53  ;;  %v2646_v24 = vsel %vm276_vm6, %v2643_v17, %v2645_v1  ;;  %v2693_v30 = vmul.f32 0.010384526, %v3620_v33  ;;  %v7129_v48 = vld [vmem:[#allocation54_spill] sm:$0xff] }
 0x204   :  { %v2613_v19 = vadd.f32 %v2602_v43, %v2588_v59  ;;  %v2679_v40 = vrot.slane %v2668_v12, 1  ;;  %v2718_v51 = vmul.f32 -0.0016136946, %v3620_v33  ;;  %v2744_v21 = vadd.f32 %v2731_v61, %v2714_v50  ;;  %v7139_v12 = vld [vmem:[#allocation55_spill] sm:$0xff] }
 0x205   :  { %v2665_v13 = vadd.f32 %v2658_v47, %v7124_v38  ;;  %v7126_v55 = vmov %v7117_v18  ;;  %v2733_v46 = vsel %vm144_vm2, %v2730_v52, %v2732_v31  ;;  %v2704_v29 = vrot.slane %v2693_v30, 2  ;;  %v7140_v47 = vld [vmem:[#allocation65_spill] sm:$0xff] }
 0x206   :  { %v2634_v44 = vadd.f32 %v2623_v37, %v2613_v19  ;;  %v2589_v58 = vadd.f32 %v7126_v55, %v7125_v20  ;;  %v2734_v8 = vrot.slane %v2718_v51, 3  ;;  %v2636_v26 = vmul.f32 -0.17105956, %v3620_v33  ;;  %3347 = vst.msk [vmem:[%s6443_s2 + $0x126] sm:$0xff] %vm399_vm8, %v2744_v21  ;;  %v7141_v51 = vld [vmem:[#allocation63_spill] sm:$0xff]  ;;  %v7144_v55 = vld [vmem:[#allocation64_spill] sm:$0xff] }
 0x207   :  { %v2690_v15 = vadd.f32 %v2678_v16, %v2665_v13  ;;  %v2680_v0 = vsel %vm72_vm0, %v2677_v22, %v2679_v40  ;;  %v2705_v49 = vsel %vm108_vm1, %v2702_v60, %v2704_v29  ;;  %v2661_v17 = vmul.f32 0.07245068, %v3620_v33  ;;  %v7128_v22 = vld [vmem:[#allocation52_spill] sm:$0xff] }
 0x208   :  { %v2659_v11 = vadd.f32 %v2646_v24, %v2634_v44  ;;  %v2614_v34 = vadd.f32 %v2601_v62, %v2589_v58  ;;  %v2647_v63 = vrot.slane %v2636_v26, 7  ;;  %v2836_v52 = vmul.f32 -0.089232184, %v3396_v10 }
 0x209   :  { %v2715_v5 = vadd.f32 %v2703_v3, %v2690_v15  ;;  %v2861_v61 = vmul.f32 0.23163672, %v3396_v10  ;;  %v2735_v27 = vsel %vm144_vm2, %v2732_v31, %v2734_v8  ;;  %v2886_v4 = vrot.slane %v7128_v22, 6  ;;  %v7137_v31 = vld [vmem:[#allocation51_spill] sm:$0xff] }
 0x20a   :  { %v2666_v32 = vadd.f32 %v2659_v11, %v7127_v56  ;;  %v2635_v7 = vadd.f32 %v2622_v53, %v2614_v34  ;;  %v2648_v9 = vsel %vm276_vm6, %v2645_v1, %v2647_v63  ;;  %v2838_v36 = vrot.slane %v2836_v52, 4  ;;  %v7146_v11 = vld [vmem:[#allocation61_spill] sm:$0xff]  ;;  %v7147_v34 = vld [vmem:[#allocation59_spill] sm:$0xff] }
 0x20b   :  { %v2745_v14 = vadd.f32 %v2733_v46, %v2715_v5  ;;  %v2863_v28 = vrot.slane %v2861_v61, 5  ;;  %v7130_v16 = vrot.slane %v7129_v48, 4  ;;  %v2941_v18 = vrot.slane %v7131_v39, 1  ;;  %v7145_v46 = vld [vmem:[#allocation62_spill] sm:$0xff]  ;;  %v7149_v5 = vld [vmem:[#allocation67_spill] sm:$0xff] }
 0x20c   :  { %v2691_v60 = vadd.f32 %v2680_v0, %v2666_v32  ;;  %v2660_v41 = vadd.f32 %v2648_v9, %v2635_v7  ;;  %v2942_v25 = vrot.slane %v7132_v54, 1  ;;  %v2966_v62 = vrot.slane %v7133_v42, 2  ;;  %v7150_v32 = vld [vmem:[#allocation66_spill] sm:$0xff] }
 0x20d   :  { %v2840_v3 = vsel %vm180_vm3, %v2838_v36, %v7130_v16  ;;  %3348 = vst.msk [vmem:[%s6443_s2 + $0x12e] sm:$0xff] %vm399_vm8, %v2745_v14  ;;  %v7136_v53 = vrot.slane %v7135_v57, 5  ;;  %v2909_v43 = vrot.slane %v7137_v31, 7  ;;  %v2967_v1 = vrot.slane %v7138_v35, 2 }
 0x20e   :  { %v2716_v45 = vadd.f32 %v2705_v49, %v2691_v60  ;;  %v2667_v23 = vadd.f32 %v2661_v17, %v2660_v41  ;;  %v2855_v59 = vadd.f32 %v2840_v3, %v7134_v6  ;;  %v2996_v50 = vrot.slane %v7139_v12, 3  ;;  %v7151_v60 = vld [vmem:[#allocation73_spill] sm:$0xff] }
 0x20f   :  { %v2865_v2 = vsel %vm216_vm4, %v2863_v28, %v7136_v53  ;;  %v2997_v19 = vrot.slane %v7140_v47, 3  ;;  %v7142_v21 = vrot.slane %v7141_v51, 4  ;;  %v7143_v38 = vmov %v7130_v16  ;;  %v7152_v28 = vld [vmem:[#allocation50_spill] sm:$0xff]  ;;  %v7153_v16 = vld [vmem:[#allocation72_spill] sm:$0xff] }
 0x210   :  { %v2746_v37 = vadd.f32 %v2735_v27, %v2716_v45  ;;  %v2692_v24 = vadd.f32 %v2679_v40, %v2667_v23  ;;  %v2880_v30 = vadd.f32 %v2865_v2, %v2855_v59  ;;  %v2943_v44 = vsel %vm72_vm0, %v2941_v18, %v2942_v25  ;;  %v7156_v18 = vld [vmem:[#allocation71_spill] sm:$0xff]  ;;  %v7159_v23 = vld [vmem:[#allocation69_spill] sm:$0xff]  ;;  %v7160_v59 = vld [vmem:[#allocation76_spill] sm:$0xff] }
 0x211   :  { %v2842_v13 = vsel %vm180_vm3, %v7143_v38, %v7142_v21  ;;  %v2968_v20 = vsel %vm108_vm1, %v2966_v62, %v2967_v1  ;;  %v2866_v26 = vrot.slane %v7145_v46, 5  ;;  %v2887_v0 = vrot.slane %v7146_v11, 6  ;;  %v7158_v62 = vld [vmem:[#allocation70_spill] sm:$0xff] }
 0x212   :  { %v2856_v58 = vadd.f32 %v2842_v13, %v7144_v55  ;;  %3349 = vst.msk [vmem:[%s6443_s2 + $0x136] sm:$0xff] %vm399_vm8, %v2746_v37  ;;  %v2717_v40 = vadd.f32 %v2704_v29, %v2692_v24  ;;  %v2901_v15 = vadd.f32 %v2886_v4, %v2880_v30  ;;  %v2910_v49 = vrot.slane %v7147_v34, 7  ;;  %v7162_v24 = vld [vmem:[#allocation58_spill] sm:$0xff]  ;;  %v7169_v34 = vld [vmem:[#allocation83_spill] sm:$0xff] }
 0x213   :  { %v2998_v63 = vsel %vm144_vm2, %v2996_v50, %v2997_v19  ;;  %v7148_v17 = vmov %v7136_v53  ;;  %v2944_v56 = vrot.slane %v7149_v5, 1  ;;  %v2969_v7 = vrot.slane %v7150_v32, 2 }
 0x214   :  { %v2867_v52 = vsel %vm216_vm4, %v7148_v17, %v2866_v26  ;;  %v2747_v61 = vadd.f32 %v2734_v8, %v2717_v40  ;;  %v2926_v27 = vadd.f32 %v2909_v43, %v2901_v15  ;;  %v2888_v29 = vsel %vm252_vm5, %v2886_v4, %v2887_v0  ;;  %v7168_v40 = vld [vmem:[#allocation79_spill] sm:$0xff] }
 0x215   :  { %v2881_v9 = vadd.f32 %v2867_v52, %v2856_v58  ;;  %v2911_v36 = vsel %vm276_vm6, %v2909_v43, %v2910_v49  ;;  %v2945_v22 = vsel %vm72_vm0, %v2942_v25, %v2944_v56  ;;  %v2970_v14 = vsel %vm108_vm1, %v2967_v1, %v2969_v7  ;;  %v7157_v25 = vld [vmem:[#allocation74_spill] sm:$0xff]  ;;  %v7161_v43 = vld [vmem:[#allocation75_spill] sm:$0xff] }
 0x216   :  { %v2999_v41 = vrot.slane %v7151_v60, 3  ;;  %3350 = vst.msk [vmem:[%s6443_s2 + $0x13e] sm:$0x3] %vm777_vm11, %v2747_v61  ;;  %v2933_v48 = vadd.f32 %v2926_v27, %v7152_v28  ;;  %v7154_v3 = vrot.slane %v7153_v16, 4  ;;  %v7155_v4 = vmov %v7142_v21  ;;  %v7163_v21 = vld [vmem:[#allocation84_spill] sm:$0xff] }
 0x217   :  { %v2902_v8 = vadd.f32 %v2888_v29, %v2881_v9  ;;  %v2868_v54 = vrot.slane %v7156_v18, 5  ;;  %v2889_v45 = vrot.slane %v7158_v62, 6  ;;  %v2912_v6 = vrot.slane %v7159_v23, 7  ;;  %v7172_v29 = vld [vmem:[#allocation82_spill] sm:$0xff]  ;;  %v7177_v18 = vld [vmem:[#allocation91_spill] sm:$0xff]  ;;  %v7178_v62 = vld [vmem:[#allocation93_spill] sm:$0xff] }
 0x218   :  { %v2844_v39 = vsel %vm180_vm3, %v7155_v4, %v7154_v3  ;;  %v2946_v57 = vrot.slane %v7160_v59, 1  ;;  %v2958_v53 = vadd.f32 %v2943_v44, %v2933_v48  ;;  %v2971_v35 = vrot.slane %v7161_v43, 2  ;;  %v7164_v44 = vld [vmem:[#allocation81_spill] sm:$0xff]  ;;  %v7174_v48 = vld [vmem:[#allocation90_spill] sm:$0xff]  ;;  %v7180_v59 = vld [vmem:[#allocation88_spill] sm:$0xff] }
 0x219   :  { %v2857_v42 = vadd.f32 %v2844_v39, %v7157_v25  ;;  %v2927_v2 = vadd.f32 %v2911_v36, %v2902_v8  ;;  %v2869_v31 = vsel %vm216_vm4, %v2866_v26, %v2868_v54  ;;  %v3000_v1 = vsel %vm144_vm2, %v2997_v19, %v2999_v41  ;;  %v7167_v19 = vld [vmem:[#allocation80_spill] sm:$0xff] }
 0x21a   :  { %v2890_v50 = vsel %vm252_vm5, %v2887_v0, %v2889_v45  ;;  %v2913_v47 = vsel %vm276_vm6, %v2910_v49, %v2912_v6  ;;  %v2983_v37 = vadd.f32 %v2968_v20, %v2958_v53  ;;  %v2947_v51 = vsel %vm72_vm0, %v2944_v56, %v2946_v57  ;;  %v7170_v56 = vld [vmem:[#allocation78_spill] sm:$0xff]  ;;  %v7173_v36 = vld [vmem:[#allocation68_spill] sm:$0xff] }
 0x21b   :  { %v2882_v12 = vadd.f32 %v2869_v31, %v2857_v42  ;;  %v2934_v30 = vadd.f32 %v2927_v2, %v7162_v24  ;;  %v3001_v38 = vrot.slane %v7163_v21, 3  ;;  %v7165_v55 = vrot.slane %v7164_v44, 4  ;;  %v7181_v2 = vld [vmem:[#allocation87_spill] sm:$0xff] }
 0x21c   :  { %v7166_v58 = vmov %v7154_v3  ;;  %v2870_v26 = vrot.slane %v7167_v19, 5  ;;  %v2891_v15 = vrot.slane %v7168_v40, 6  ;;  %v3013_v11 = vadd.f32 %v2998_v63, %v2983_v37  ;;  %v7171_v63 = vld [vmem:[#allocation85_spill] sm:$0xff] }
 0x21d   :  { %v2903_v13 = vadd.f32 %v2890_v50, %v2882_v12  ;;  %v2846_v46 = vsel %vm180_vm3, %v7166_v58, %v7165_v55  ;;  %v2959_v0 = vadd.f32 %v2945_v22, %v2934_v30  ;;  %v2972_v20 = vsel %vm108_vm1, %v2969_v7, %v2971_v35  ;;  %v7182_v50 = vld [vmem:[#allocation77_spill] sm:$0xff] }
 0x21e   :  { %v2858_v49 = vadd.f32 %v2846_v46, %v7169_v34  ;;  %v2871_v52 = vsel %vm216_vm4, %v2868_v54, %v2870_v26  ;;  %v2892_v5 = vsel %vm252_vm5, %v2889_v45, %v2891_v15  ;;  %v2914_v32 = vrot.slane %v7170_v56, 7  ;;  %3351 = vst.msk [vmem:[%s6443_s2 + $0x13e] sm:$0xfc] %vm771_vm10, %v3013_v11  ;;  %v7183_v46 = vld [vmem:[#allocation92_spill] sm:$0xff] }
 0x21f   :  { %v2928_v17 = vadd.f32 %v2913_v47, %v2903_v13  ;;  %v2984_v61 = vadd.f32 %v2970_v14, %v2959_v0  ;;  %v2948_v9 = vrot.slane %v7171_v63, 1  ;;  %v2973_v7 = vrot.slane %v7172_v29, 2  ;;  %v7185_v11 = vld [vmem:[#allocation44_spill] sm:$0xff]  ;;  %v7186_v29 = vld [vmem:[#allocation86_spill] sm:$0xff] }
 0x220   :  { %v2883_v27 = vadd.f32 %v2871_v52, %v2858_v49  ;;  %v3002_v60 = vsel %vm144_vm2, %v2999_v41, %v3001_v38  ;;  %v2915_v28 = vsel %vm276_vm6, %v2912_v6, %v2914_v32  ;;  %v7175_v8 = vrot.slane %v7174_v48, 4  ;;  %v7179_v41 = vld [vmem:[#allocation89_spill] sm:$0xff]  ;;  %v7188_v48 = vld [vmem:[#allocation11_spill] sm:$0xff] }
 0x221   :  { %v2935_v22 = vadd.f32 %v2928_v17, %v7173_v36  ;;  %v7176_v16 = vmov %v7165_v55  ;;  %v3014_v4 = vadd.f32 %v3000_v1, %v2984_v61  ;;  %v2949_v14 = vsel %vm72_vm0, %v2946_v57, %v2948_v9 }
 0x222   :  { %v2848_v3 = vsel %vm180_vm3, %v7176_v16, %v7175_v8  ;;  %v2904_v39 = vadd.f32 %v2892_v5, %v2883_v27  ;;  %v3003_v54 = vrot.slane %v7177_v18, 3  ;;  %v2974_v42 = vsel %vm108_vm1, %v2971_v35, %v2973_v7  ;;  %v7191_v18 = vld [vmem:[#allocation8_spill] sm:$0xff] }
 0x223   :  { %v2960_v25 = vadd.f32 %v2947_v51, %v2935_v22  ;;  %v2859_v45 = vadd.f32 %v2848_v3, %v7178_v62  ;;  %v2872_v23 = vrot.slane %v7179_v41, 5  ;;  %3352 = vst.msk [vmem:[%s6443_s2 + $0x146] sm:$0xff] %vm399_vm8, %v3014_v4  ;;  %v2893_v53 = vrot.slane %v7180_v59, 6  ;;  %v7195_v41 = vld [vmem:[#allocation2_spill] sm:$0xff] }
 0x224   :  { %v2929_v6 = vadd.f32 %v2915_v28, %v2904_v39  ;;  %v2916_v31 = vrot.slane %v7181_v2, 7  ;;  %v2939_v57 = vmul.f32 -0.022847652, %v3620_v33  ;;  %v2964_v35 = vmul.f32 0.007762679, %v3620_v33  ;;  %v7190_v39 = vld [vmem:[#allocation5_spill] sm:$0xff] }
 0x225   :  { %v2985_v43 = vadd.f32 %v2972_v20, %v2960_v25  ;;  %v2873_v1 = vsel %vm216_vm4, %v2870_v26, %v2872_v23  ;;  %v6278_v12 = vmul.f32 -0.0013430684, %v3620_v33  ;;  %v2894_v24 = vsel %vm252_vm5, %v2891_v15, %v2893_v53 }
 0x226   :  { %v2936_v47 = vadd.f32 %v2929_v6, %v7182_v50  ;;  %v2884_v37 = vadd.f32 %v2873_v1, %v2859_v45  ;;  %v2917_v30 = vsel %vm276_vm6, %v2914_v32, %v2916_v31  ;;  %v2950_v21 = vrot.slane %v2939_v57, 1  ;;  %v7196_v6 = vld [vmem:[#allocation10_spill] sm:$0xff]  ;;  %v7198_v1 = vld [vmem:[#allocation9_spill] sm:$0xff] }
 0x227   :  { %v3015_v51 = vadd.f32 %v3002_v60, %v2985_v43  ;;  %v2975_v13 = vrot.slane %v2964_v35, 2  ;;  %v3005_v44 = vrot.slane %v6278_v12, 3  ;;  %v7184_v19 = vmov %v7175_v8  ;;  %v7187_v60 = vld [vmem:[#allocation3_spill] sm:$0xff]  ;;  %v7199_v12 = vld [vmem:[#allocation17_spill] sm:$0xff] }
 0x228   :  { %v2961_v55 = vadd.f32 %v2949_v14, %v2936_v47  ;;  %v2905_v58 = vadd.f32 %v2894_v24, %v2884_v37  ;;  %v2860_v26 = vadd.f32 %v7184_v19, %v7183_v46  ;;  %v2907_v40 = vmul.f32 -0.13388182, %v3620_v33  ;;  %v7202_v24 = vld [vmem:[#allocation16_spill] sm:$0xff] }
 0x229   :  { %v3118_v0 = vrot.slane %v7185_v11, 4  ;;  %3353 = vst.msk [vmem:[%s6443_s2 + $0x14e] sm:$0xff] %vm399_vm8, %v3015_v51  ;;  %v3004_v15 = vsel %vm144_vm2, %v3001_v38, %v3003_v54  ;;  %v2951_v20 = vsel %vm72_vm0, %v2948_v9, %v2950_v21  ;;  %v2976_v34 = vsel %vm108_vm1, %v2973_v7, %v2975_v13  ;;  %v7203_v51 = vld [vmem:[#allocation15_spill] sm:$0xff] }
 0x22a   :  { %v2986_v49 = vadd.f32 %v2974_v42, %v2961_v55  ;;  %v2930_v17 = vadd.f32 %v2917_v30, %v2905_v58  ;;  %v2885_v52 = vadd.f32 %v2872_v23, %v2860_v26  ;;  %v2918_v5 = vrot.slane %v2907_v40, 7  ;;  %v7193_v42 = vld [vmem:[#allocation7_spill] sm:$0xff]  ;;  %v7204_v26 = vld [vmem:[#allocation18_spill] sm:$0xff] }
 0x22b   :  { %v3006_v56 = vsel %vm144_vm2, %v3003_v54, %v3005_v44  ;;  %v2932_v32 = vmul.f32 0.054391768, %v3620_v33  ;;  %v3107_v61 = vmul.f32 -0.047507085, %v3396_v10  ;;  %v3132_v27 = vmul.f32 0.11241254, %v3396_v10 }
 0x22c   :  { %v3016_v63 = vadd.f32 %v3004_v15, %v2986_v49  ;;  %v2937_v36 = vadd.f32 %v2930_v17, %v7186_v29  ;;  %v2906_v38 = vadd.f32 %v2893_v53, %v2885_v52  ;;  %v2919_v9 = vsel %vm276_vm6, %v2916_v31, %v2918_v5  ;;  %v7189_v10 = vld [vmem:[#allocation6_spill] sm:$0xff]  ;;  %v7197_v31 = vld [vmem:[#allocation13_spill] sm:$0xff]  ;;  %v7205_v15 = vld [vmem:[#allocation19_spill] sm:$0xff] }
 0x22d   :  { %v3109_v22 = vrot.slane %v3107_v61, 4  ;;  %v3134_v7 = vrot.slane %v3132_v27, 5  ;;  %v3212_v28 = vrot.slane %v7187_v60, 1  ;;  %v3213_v8 = vrot.slane %v7188_v48, 1  ;;  %v7207_v52 = vld [vmem:[#allocation14_spill] sm:$0xff]  ;;  %v7208_v61 = vld [vmem:[#allocation21_spill] sm:$0xff] }
 0x22e   :  { %3354 = vst.msk [vmem:[%s6443_s2 + $0x156] sm:$0xff] %vm399_vm8, %v3016_v63  ;;  %v2962_v16 = vadd.f32 %v2951_v20, %v2937_v36  ;;  %v2931_v3 = vadd.f32 %v2919_v9, %v2906_v38  ;;  %v3157_v4 = vrot.slane %v7189_v10, 6  ;;  %v3180_v14 = vrot.slane %v7190_v39, 7  ;;  %v7209_v29 = vld [vmem:[#allocation20_spill] sm:$0xff]  ;;  %v7210_v38 = vld [vmem:[#allocation27_spill] sm:$0xff] }
 0x22f   :  { %v7192_v54 = vrot.slane %v7191_v18, 4  ;;  %v7194_v62 = vrot.slane %v7193_v42, 5  ;;  %v3237_v23 = vrot.slane %v7195_v41, 2  ;;  %v3238_v59 = vrot.slane %v7196_v6, 2  ;;  %v7214_v39 = vld [vmem:[#allocation28_spill] sm:$0xff]  ;;  %v7218_v41 = vld [vmem:[#allocation23_spill] sm:$0xff] }
 0x230   :  { %v2987_v53 = vadd.f32 %v2976_v34, %v2962_v16  ;;  %v2938_v2 = vadd.f32 %v2932_v32, %v2931_v3  ;;  %v3214_v43 = vsel %vm72_vm0, %v3212_v28, %v3213_v8  ;;  %v3267_v35 = vrot.slane %v7198_v1, 3  ;;  %v7216_v42 = vld [vmem:[#allocation4_spill] sm:$0xff] }
 0x231   :  { %v3111_v25 = vsel %vm180_vm3, %v3109_v22, %v7192_v54  ;;  %v3136_v45 = vsel %vm216_vm4, %v3134_v7, %v7194_v62  ;;  %v7200_v50 = vrot.slane %v7199_v12, 4  ;;  %v7201_v47 = vmov %v7192_v54  ;;  %v7211_v22 = vld [vmem:[#allocation26_spill] sm:$0xff]  ;;  %v7215_v54 = vld [vmem:[#allocation25_spill] sm:$0xff]  ;;  %v7220_v1 = vld [vmem:[#allocation12_spill] sm:$0xff] }
 0x232   :  { %v3126_v57 = vadd.f32 %v3111_v25, %v7197_v31  ;;  %v3137_v30 = vrot.slane %v7202_v24, 5  ;;  %v3158_v55 = vrot.slane %v7203_v51, 6  ;;  %v3017_v58 = vadd.f32 %v3006_v56, %v2987_v53  ;;  %v7221_v24 = vld [vmem:[#allocation29_spill] sm:$0xff] }
 0x233   :  { %v3113_v37 = vsel %vm180_vm3, %v7201_v47, %v7200_v50  ;;  %v2963_v46 = vadd.f32 %v2950_v21, %v2938_v2  ;;  %v3268_v20 = vrot.slane %v7205_v15, 3  ;;  %v7206_v34 = vmov %v7194_v62  ;;  %v7219_v2 = vld [vmem:[#allocation30_spill] sm:$0xff] }
 0x234   :  { %v3151_v19 = vadd.f32 %v3136_v45, %v3126_v57  ;;  %v3127_v40 = vadd.f32 %v3113_v37, %v7204_v26  ;;  %v3138_v49 = vsel %vm216_vm4, %v7206_v34, %v3137_v30  ;;  %v3159_v17 = vsel %vm252_vm5, %v3157_v4, %v3158_v55  ;;  %3355 = vst.msk [vmem:[%s6443_s2 + $0x15e] sm:$0xff] %vm399_vm8, %v3017_v58  ;;  %v7222_v58 = vld [vmem:[#allocation38_spill] sm:$0xff] }
 0x235   :  { %v3181_v5 = vrot.slane %v7207_v52, 7  ;;  %v2988_v56 = vadd.f32 %v2975_v13, %v2963_v46  ;;  %v3215_v27 = vrot.slane %v7208_v61, 1  ;;  %v3240_v36 = vrot.slane %v7209_v29, 2 }
 0x236   :  { %v3172_v21 = vadd.f32 %v3157_v4, %v3151_v19  ;;  %v3152_v32 = vadd.f32 %v3138_v49, %v3127_v40  ;;  %v3270_v9 = vrot.slane %v7210_v38, 3  ;;  %v7212_v7 = vrot.slane %v7211_v22, 4 }
 0x237   :  { %v3182_v63 = vsel %vm276_vm6, %v3180_v14, %v3181_v5  ;;  %v7213_v60 = vmov %v7200_v50  ;;  %v3018_v48 = vadd.f32 %v3005_v44, %v2988_v56  ;;  %v3239_v13 = vsel %vm108_vm1, %v3237_v23, %v3238_v59 }
 0x238   :  { %v3115_v28 = vsel %vm180_vm3, %v7213_v60, %v7212_v7  ;;  %v3197_v16 = vadd.f32 %v3180_v14, %v3172_v21  ;;  %v3173_v3 = vadd.f32 %v3159_v17, %v3152_v32  ;;  %v3269_v10 = vsel %vm144_vm2, %v3267_v35, %v3268_v20  ;;  %v7217_v14 = vld [vmem:[#allocation24_spill] sm:$0xff]  ;;  %v7228_v17 = vld [vmem:[#allocation33_spill] sm:$0xff] }
 0x239   :  { %v3216_v4 = vsel %vm72_vm0, %v3213_v8, %v3215_v27  ;;  %v3128_v18 = vadd.f32 %v3115_v28, %v7214_v39  ;;  %v3139_v25 = vrot.slane %v7215_v54, 5  ;;  %3356 = vst.msk [vmem:[%s6443_s2 + $0x166] sm:$0x3] %vm777_vm11, %v3018_v48  ;;  %v3160_v45 = vrot.slane %v7217_v14, 6  ;;  %v7231_v28 = vld [vmem:[#allocation22_spill] sm:$0xff]  ;;  %v7234_v39 = vld [vmem:[#allocation43_spill] sm:$0xff] }
 0x23a   :  { %v3204_v62 = vadd.f32 %v3197_v16, %v7216_v42  ;;  %v3198_v44 = vadd.f32 %v3182_v63, %v3173_v3  ;;  %v3183_v23 = vrot.slane %v7218_v41, 7  ;;  %v3241_v6 = vsel %vm108_vm1, %v3238_v59, %v3240_v36  ;;  %v7235_v42 = vld [vmem:[#allocation47_spill] sm:$0xff] }
 0x23b   :  { %v3271_v8 = vsel %vm144_vm2, %v3268_v20, %v3270_v9  ;;  %v3140_v53 = vsel %vm216_vm4, %v3137_v30, %v3139_v25  ;;  %v3217_v31 = vrot.slane %v7219_v2, 1  ;;  %v3161_v50 = vsel %vm252_vm5, %v3158_v55, %v3160_v45  ;;  %v7223_v30 = vld [vmem:[#allocation35_spill] sm:$0xff]  ;;  %v7226_v20 = vld [vmem:[#allocation37_spill] sm:$0xff]  ;;  %v7227_v55 = vld [vmem:[#allocation34_spill] sm:$0xff] }
 0x23c   :  { %v3229_v57 = vadd.f32 %v3214_v43, %v3204_v62  ;;  %v3205_v35 = vadd.f32 %v3198_v44, %v7220_v1  ;;  %v3153_v12 = vadd.f32 %v3140_v53, %v3128_v18  ;;  %v3184_v47 = vsel %vm276_vm6, %v3181_v5, %v3183_v23  ;;  %v7229_v5 = vld [vmem:[#allocation32_spill] sm:$0xff]  ;;  %v7236_v44 = vld [vmem:[#allocation42_spill] sm:$0xff] }
 0x23d   :  { %v3218_v37 = vsel %vm72_vm0, %v3215_v27, %v3217_v31  ;;  %v3242_v51 = vrot.slane %v7221_v24, 2  ;;  %v3272_v59 = vrot.slane %v7222_v58, 3  ;;  %v7224_v40 = vrot.slane %v7223_v30, 4  ;;  %v7230_v27 = vld [vmem:[#allocation39_spill] sm:$0xff] }
 0x23e   :  { %v3254_v46 = vadd.f32 %v3239_v13, %v3229_v57  ;;  %v3230_v19 = vadd.f32 %v3216_v4, %v3205_v35  ;;  %v3174_v26 = vadd.f32 %v3161_v50, %v3153_v12  ;;  %v7225_v43 = vmov %v7212_v7  ;;  %v7239_v24 = vld [vmem:[#allocation31_spill] sm:$0xff] }
 0x23f   :  { %v3117_v15 = vsel %vm180_vm3, %v7225_v43, %v7224_v40  ;;  %v3141_v49 = vrot.slane %v7227_v55, 5  ;;  %v3162_v52 = vrot.slane %v7228_v17, 6  ;;  %v3185_v56 = vrot.slane %v7229_v5, 7 }
 0x240   :  { %v3129_v34 = vadd.f32 %v3117_v15, %v7226_v20  ;;  %v3284_v21 = vadd.f32 %v3269_v10, %v3254_v46  ;;  %v3255_v32 = vadd.f32 %v3241_v6, %v3230_v19  ;;  %v3199_v61 = vadd.f32 %v3184_v47, %v3174_v26  ;;  %v7238_v6 = vld [vmem:[#allocation41_spill] sm:$0xff]  ;;  %v7240_v19 = vld [vmem:[#allocation46_spill] sm:$0xff] }
 0x241   :  { %v3219_v63 = vrot.slane %v7230_v27, 1  ;;  %v3243_v29 = vsel %vm108_vm1, %v3240_v36, %v3242_v51  ;;  %v3273_v38 = vsel %vm144_vm2, %v3270_v9, %v3272_v59  ;;  %v3142_v22 = vsel %vm216_vm4, %v3139_v25, %v3141_v49  ;;  %v7232_v36 = vld [vmem:[#allocation36_spill] sm:$0xff] }
 0x242   :  { %v3163_v7 = vsel %vm252_vm5, %v3160_v45, %v3162_v52  ;;  %3357 = vst.msk [vmem:[%s6443_s2 + $0x166] sm:$0xfc] %vm771_vm10, %v3284_v21  ;;  %v3285_v60 = vadd.f32 %v3271_v8, %v3255_v32  ;;  %v3206_v48 = vadd.f32 %v3199_v61, %v7231_v28  ;;  %v3154_v16 = vadd.f32 %v3142_v22, %v3129_v34  ;;  %v7237_v45 = vld [vmem:[#allocation45_spill] sm:$0xff] }
 0x243   :  { %v3186_v13 = vsel %vm276_vm6, %v3183_v23, %v3185_v56  ;;  %v3220_v3 = vsel %vm72_vm0, %v3217_v31, %v3219_v63  ;;  %v3244_v10 = vrot.slane %v7232_v36, 2  ;;  %v7233_v9 = vmov %v7224_v40 }
 0x244   :  { %v3119_v4 = vsel %vm180_vm3, %v7233_v9, %v3118_v0  ;;  %v3143_v18 = vrot.slane %v7234_v39, 5  ;;  %3358 = vst.msk [vmem:[%s6443_s2 + $0x16e] sm:$0xff] %vm399_vm8, %v3285_v60  ;;  %v3231_v54 = vadd.f32 %v3218_v37, %v3206_v48  ;;  %v3175_v25 = vadd.f32 %v3163_v7, %v3154_v16 }
 0x245   :  { %v3130_v62 = vadd.f32 %v3119_v4, %v7235_v42  ;;  %v3164_v14 = vrot.slane %v7236_v44, 6  ;;  %v3274_v41 = vrot.slane %v7237_v45, 3  ;;  %v3187_v8 = vrot.slane %v7238_v6, 7 }
 0x246   :  { %v3144_v23 = vsel %vm216_vm4, %v3141_v49, %v3143_v18  ;;  %v3210_v53 = vmul.f32 -0.0106432345, %v3620_v33  ;;  %v3256_v2 = vadd.f32 %v3243_v29, %v3231_v54  ;;  %v3200_v31 = vadd.f32 %v3186_v13, %v3175_v25 }
 0x247   :  { %v3155_v57 = vadd.f32 %v3144_v23, %v3130_v62  ;;  %v3165_v1 = vsel %vm252_vm5, %v3162_v52, %v3164_v14  ;;  %v3188_v35 = vsel %vm276_vm6, %v3185_v56, %v3187_v8  ;;  %v3235_v50 = vmul.f32 0.0033873392, %v3620_v33  ;;  %v7241_v52 = vld [vmem:[#allocation40_spill] sm:$0xff] }
 0x248   :  { %v3221_v12 = vrot.slane %v3210_v53, 1  ;;  %v3260_v47 = vmul.f32 -0.0005810527, %v3620_v33  ;;  %v3286_v37 = vadd.f32 %v3273_v38, %v3256_v2  ;;  %v3207_v58 = vadd.f32 %v3200_v31, %v7239_v24 }
 0x249   :  { %v3176_v46 = vadd.f32 %v3165_v1, %v3155_v57  ;;  %v3131_v26 = vadd.f32 %v3118_v0, %v7240_v19  ;;  %v3245_v30 = vsel %vm108_vm1, %v3242_v51, %v3244_v10  ;;  %v3246_v40 = vrot.slane %v3235_v50, 2 }
 0x24a   :  { %v3178_v43 = vmul.f32 -0.073541895, %v3620_v33  ;;  %3359 = vst.msk [vmem:[%s6443_s2 + $0x176] sm:$0xff] %vm399_vm8, %v3286_v37  ;;  %v3232_v15 = vadd.f32 %v3220_v3, %v3207_v58  ;;  %v3275_v55 = vsel %vm144_vm2, %v3272_v59, %v3274_v41  ;;  %v3222_v49 = vsel %vm72_vm0, %v3219_v63, %v3221_v12 }
 0x24b   :  { %v3201_v20 = vadd.f32 %v3188_v35, %v3176_v46  ;;  %v3156_v34 = vadd.f32 %v3143_v18, %v3131_v26  ;;  %v3276_v17 = vrot.slane %v3260_v47, 3  ;;  %v3203_v56 = vmul.f32 0.027250847, %v3620_v33 }
 0x24c   :  { %v3189_v11 = vrot.slane %v3178_v43, 7  ;;  %v3257_v0 = vadd.f32 %v3245_v30, %v3232_v15  ;;  %v3247_v21 = vsel %vm108_vm1, %v3244_v10, %v3246_v40 }
 0x24d   :  { %v3208_v51 = vadd.f32 %v3201_v20, %v7241_v52  ;;  %v3177_v5 = vadd.f32 %v3164_v14, %v3156_v34  ;;  %v3277_v38 = vsel %vm144_vm2, %v3274_v41, %v3276_v17 }
 0x24e   :  { %v3190_v32 = vsel %vm276_vm6, %v3187_v8, %v3189_v11  ;;  %v3287_v61 = vadd.f32 %v3275_v55, %v3257_v0 }
 0x24f   :  { %v3233_v27 = vadd.f32 %v3222_v49, %v3208_v51  ;;  %v3202_v29 = vadd.f32 %v3190_v32, %v3177_v5 }
 0x250   :  { %3360 = vst.msk [vmem:[%s6443_s2 + $0x17e] sm:$0xff] %vm399_vm8, %v3287_v61 }
 0x251   :  { %v3258_v59 = vadd.f32 %v3247_v21, %v3233_v27  ;;  %v3209_v63 = vadd.f32 %v3203_v56, %v3202_v29 }
 0x253   :  { %v3288_v22 = vadd.f32 %v3277_v38, %v3258_v59  ;;  %v3234_v7 = vadd.f32 %v3221_v12, %v3209_v63 }
 0x255   :  { %3361 = vst.msk [vmem:[%s6443_s2 + $0x186] sm:$0xff] %vm399_vm8, %v3288_v22  ;;  %v3259_v33 = vadd.f32 %v3246_v40, %v3234_v7 }
 0x257   :  { %v3289_v60 = vadd.f32 %v3276_v17, %v3259_v33 }
 0x259   :  { %3362 = vst.msk [vmem:[%s6443_s2 + $0x18e] sm:$0x3] %vm777_vm11, %v3289_v60 }

</bundles_post_ra>
